<compile_context>
chip_gen: v5e
topology: v5e:2x2
jax: 0.10.0
libtpu: 0.0.40
codegen_flags: <defaults>
</compile_context>

<pallas_src>
import functools
import math

import jax
import jax.numpy as jnp
from jax.experimental import pallas as pl
from jax.experimental.pallas import tpu as pltpu

LN_EPS = 1e-5


def _layernorm(v, w, b):
    mu = jnp.mean(v, axis=-1, keepdims=True)
    var = jnp.mean((v - mu) ** 2, axis=-1, keepdims=True)
    return (v - mu) * jax.lax.rsqrt(var + LN_EPS) * w + b


def _gelu_tanh(v):
    # tanh-approximate GELU (see TODO above re: exact erf form).
    c = 0.7978845608028654  # sqrt(2/pi)
    return 0.5 * v * (1.0 + jnp.tanh(c * (v + 0.044715 * v * v * v)))


def block_kernel(
    x_ref,         # (bt, L, D)   input batch block (x dtype)
    vecs_ref,      # (8, W)       packed 1-D params, f32 (see wrapper)
    w_in_ref,      # (D, 3D)      in_proj_weight.T, bf16 (fused QKV)
    w_o_ref,       # (D, D)       out_proj.weight.T, bf16
    w_fc_ref,      # (D, MW)      mlp.c_fc.weight.T, bf16
    w_proj_ref,    # (MW, D)      mlp.c_proj.weight.T, bf16
    o_ref,         # (bt, L, D)
    *,
    n_head: int,
):
    bt, L, D = x_ref.shape
    MW = w_fc_ref.shape[1]
    hd = D // n_head
    scale = 1.0 / math.sqrt(hd)
    N = bt * L

    # (bt, L, D) -> (N, D): merges leading dims only (minor dim unchanged).
    x = x_ref[...].astype(jnp.float32).reshape(N, D)

    # Packed 1-D params (kept 2-D so everything broadcasts along the lane axis).
    ln1_w = vecs_ref[0:1, :D]
    ln1_b = vecs_ref[1:2, :D]
    ln2_w = vecs_ref[2:3, :D]
    ln2_b = vecs_ref[3:4, :D]
    b_o = vecs_ref[4:5, :D]
    b_pr = vecs_ref[5:6, :D]
    b_in = vecs_ref[6:7, :3 * D]
    b_fc = vecs_ref[7:8, :MW]

    # ---- attention branch: x + attn(ln_1(x)) ----
    xn = _layernorm(x, ln1_w, ln1_b)                               # f32 (N, D)
    qkv = jnp.dot(xn.astype(jnp.bfloat16), w_in_ref[...],
                  preferred_element_type=jnp.float32) + b_in       # (N, 3D) f32
    q = qkv[:, :D] * scale                                         # scale hoisted once
    k = qkv[:, D:2 * D]
    v = qkv[:, 2 * D:]

    def split_heads(t):
        # (N, D) -> (n_head * bt, L, hd): heads folded into the *leading* batch
        # dim (cheap leading-axis concat + major-dim reshapes), so both
        # attention matmuls below are a single batched einsum over all heads.
        return jnp.concatenate(
            [t[:, h * hd:(h + 1) * hd].reshape(bt, L, hd) for h in range(n_head)],
            axis=0,
        ).astype(jnp.bfloat16)

    qh = split_heads(q)
    kh = split_heads(k)
    vh = split_heads(v)

    s = jnp.einsum("bqd,bkd->bqk", qh, kh,
                   preferred_element_type=jnp.float32)             # (nh*bt, L, L)
    s = s - jnp.max(s, axis=-1, keepdims=True)
    p = jnp.exp(s)
    p = p * pl.reciprocal(jnp.sum(p, axis=-1, keepdims=True), approx=True)
    o = jnp.einsum("bqk,bkd->bqd", p.astype(jnp.bfloat16), vh,
                   preferred_element_type=jnp.float32)             # (nh*bt, L, hd)

    # Merge heads back to (N, D) = (bt*L, n_head*hd).
    attn = jnp.concatenate(
        [o[h * bt:(h + 1) * bt].reshape(N, hd) for h in range(n_head)], axis=-1)
    attn = jnp.dot(attn.astype(jnp.bfloat16), w_o_ref[...],
                   preferred_element_type=jnp.float32) + b_o

    x1 = x + attn                                                  # ls_1 is Identity

    # ---- MLP branch: x1 + mlp(ln_2(x1)) ----
    xn2 = _layernorm(x1, ln2_w, ln2_b)
    h1 = jnp.dot(xn2.astype(jnp.bfloat16), w_fc_ref[...],
                 preferred_element_type=jnp.float32) + b_fc        # (N, MW)
    h1 = _gelu_tanh(h1)
    y = jnp.dot(h1.astype(jnp.bfloat16), w_proj_ref[...],
                preferred_element_type=jnp.float32) + b_pr         # (N, D)

    out = x1 + y                                                   # ls_2 is Identity
    o_ref[...] = out.reshape(o_ref.shape).astype(o_ref.dtype)


def _auto_block_b(B, L, target_rows=256):
    """Pick a batch block so block_b*L fills the MXU; keep >=2 grid steps if possible."""
    divs = [d for d in range(1, B + 1) if B % d == 0]
    for d in divs:                       # smallest block reaching target + >=2 steps
        if d * L >= target_rows and B // d >= 2:
            return d
    for d in divs:                       # otherwise reach the target in one step
        if d * L >= target_rows:
            return d
    return B                             # small problem: take the whole batch


def residual_attention_block(x, params, n_head, *, block_b=None):
    """x: (B, L, d_model) -> (B, L, d_model)."""
    B, L, D = x.shape
    MW = params["fc_w"].shape[0]
    assert D % n_head == 0
    hd = D // n_head

    if block_b is None:
        block_b = _auto_block_b(B, L)
    assert B % block_b == 0

    # Weights: pre-transpose (row-major `rows @ W.T` on the MXU) and pre-cast to
    # bf16 (MXU-native dtype; halves weight DMA bytes and VMEM footprint).
    wdt = jnp.bfloat16
    w_in_T = params["in_proj_w"].T.astype(wdt)     # (D, 3D) fused QKV
    w_o_T = params["out_proj_w"].T.astype(wdt)     # (D, D)
    w_fc_T = params["fc_w"].T.astype(wdt)          # (D, MW)
    w_proj_T = params["proj_w"].T.astype(wdt)      # (MW, D)

    # Pack all 1-D params into a single lane-padded (8, W) f32 tile: one
    # BlockSpec / DMA instead of eight tiny arrays.
    W = max(3 * D, MW, D)
    W = ((W + 127) // 128) * 128
    vecs = jnp.zeros((8, W), jnp.float32)
    vecs = vecs.at[0, :D].set(params["ln1_w"].astype(jnp.float32))
    vecs = vecs.at[1, :D].set(params["ln1_b"].astype(jnp.float32))
    vecs = vecs.at[2, :D].set(params["ln2_w"].astype(jnp.float32))
    vecs = vecs.at[3, :D].set(params["ln2_b"].astype(jnp.float32))
    vecs = vecs.at[4, :D].set(params["out_proj_b"].astype(jnp.float32))
    vecs = vecs.at[5, :D].set(params["proj_b"].astype(jnp.float32))
    vecs = vecs.at[6, :3 * D].set(params["in_proj_b"].astype(jnp.float32))
    vecs = vecs.at[7, :MW].set(params["fc_b"].astype(jnp.float32))

    kernel = functools.partial(block_kernel, n_head=n_head)

    # --- VMEM budget & cost estimate ---
    itemsize = x.dtype.itemsize
    weight_bytes = (D * 3 * D + D * D + 2 * D * MW) * 2            # bf16
    vec_bytes = 8 * W * 4
    io_bytes = 4 * block_b * L * D * itemsize                      # in+out, double-buffered
    rows = block_b * L
    live_bytes = rows * (7 * D + 2 * MW) * 4 + 2 * n_head * block_b * L * L * 4
    est = 2 * weight_bytes + 2 * vec_bytes + io_bytes + live_bytes
    vmem_limit = int(min(max(2 * est, 32 * 1024 * 1024), 64 * 1024 * 1024))
    # TODO(synk): if the estimate still exceeds v7x's 64 MiB VMEM at very large
    # d_model, stream the MLP weights over an extra "arbitrary" MW grid axis.

    flops = (2 * B * L * D * 3 * D          # fused QKV projection
             + 4 * B * n_head * L * L * hd  # scores + PV
             + 2 * B * L * D * D            # out projection
             + 4 * B * L * D * MW)          # fc + proj
    transcendentals = B * n_head * L * L + B * L * MW              # softmax exp + gelu tanh
    bytes_accessed = 2 * B * L * D * itemsize + weight_bytes + vec_bytes
    cost = pl.CostEstimate(flops=int(flops),
                           transcendentals=int(transcendentals),
                           bytes_accessed=int(bytes_accessed))

    grid = (B // block_b,)
    out_shape = jax.ShapeDtypeStruct((B, L, D), x.dtype)

    def run(resident_weights: bool):
        # Constant-index weights/vecs: single-buffer them so they are not
        # double-buffered by the pipeline (halves weight VMEM; matters on v7x).
        wk = {"pipeline_mode": pl.Buffered(1)} if resident_weights else {}
        in_specs = [
            pl.BlockSpec((block_b, L, D), lambda b: (b, 0, 0)),     # x batch block
            pl.BlockSpec((8, W), lambda b: (0, 0), **wk),           # packed vectors
            pl.BlockSpec((D, 3 * D), lambda b: (0, 0), **wk),       # W_in.T
            pl.BlockSpec((D, D), lambda b: (0, 0), **wk),           # W_out.T
            pl.BlockSpec((D, MW), lambda b: (0, 0), **wk),          # W_fc.T
            pl.BlockSpec((MW, D), lambda b: (0, 0), **wk),          # W_proj.T
        ]
        out_specs = pl.BlockSpec((block_b, L, D), lambda b: (b, 0, 0))
        return pl.pallas_call(
            kernel,
            out_shape=out_shape,
            grid_spec=pltpu.PrefetchScalarGridSpec(
                num_scalar_prefetch=0,
                grid=grid,
                in_specs=in_specs,
                out_specs=out_specs,
            ),
            compiler_params=pltpu.CompilerParams(
                dimension_semantics=("parallel",),
                vmem_limit_bytes=vmem_limit,
            ),
            cost_estimate=cost,
        )(x, vecs, w_in_T, w_o_T, w_fc_T, w_proj_T)

    try:
        return run(True)
    except Exception:
        # TODO(synk): pl.Buffered(1) single-buffering of resident weights not
        # supported by this jax/Mosaic build; fall back to default buffering.
        return run(False)


def residual_attention_block_ref(x, params, n_head):
    """Plain-JAX (f32) reference mirroring the PyTorch module's math."""
    orig_dtype = x.dtype
    x = x.astype(jnp.float32)
    B, L, D = x.shape
    hd = D // n_head
    scale = 1.0 / math.sqrt(hd)

    xn = _layernorm(x, params["ln1_w"], params["ln1_b"])
    qkv = xn @ params["in_proj_w"].T + params["in_proj_b"]          # (B, L, 3D)
    q, k, v = jnp.split(qkv, 3, axis=-1)
    qh = (q * scale).reshape(B, L, n_head, hd).transpose(0, 2, 1, 3)
    kh = k.reshape(B, L, n_head, hd).transpose(0, 2, 1, 3)
    vh = v.reshape(B, L, n_head, hd).transpose(0, 2, 1, 3)
    s = jnp.einsum("bhqd,bhkd->bhqk", qh, kh)
    p = jax.nn.softmax(s, axis=-1)
    o = jnp.einsum("bhqk,bhkd->bhqd", p, vh).transpose(0, 2, 1, 3).reshape(B, L, D)
    attn = o @ params["out_proj_w"].T + params["out_proj_b"]

    x1 = x + attn
    xn2 = _layernorm(x1, params["ln2_w"], params["ln2_b"])
    h = _gelu_tanh(xn2 @ params["fc_w"].T + params["fc_b"])
    y = h @ params["proj_w"].T + params["proj_b"]
    return (x1 + y).astype(orig_dtype)


def make_params(key, d_model, mlp_ratio=4.0):
    mw = int(d_model * mlp_ratio)
    ks = jax.random.split(key, 12)
    s = 0.02
    return {
        "ln1_w": 1.0 + 0.1 * jax.random.normal(ks[0], (d_model,), jnp.float32),
        "ln1_b": 0.1 * jax.random.normal(ks[1], (d_model,), jnp.float32),
        "ln2_w": 1.0 + 0.1 * jax.random.normal(ks[2], (d_model,), jnp.float32),
        "ln2_b": 0.1 * jax.random.normal(ks[3], (d_model,), jnp.float32),
        "in_proj_w": s * jax.random.normal(ks[4], (3 * d_model, d_model), jnp.float32),
        "in_proj_b": s * jax.random.normal(ks[5], (3 * d_model,), jnp.float32),
        "out_proj_w": s * jax.random.normal(ks[6], (d_model, d_model), jnp.float32),
        "out_proj_b": s * jax.random.normal(ks[7], (d_model,), jnp.float32),
        "fc_w": s * jax.random.normal(ks[8], (mw, d_model), jnp.float32),
        "fc_b": s * jax.random.normal(ks[9], (mw,), jnp.float32),
        "proj_w": s * jax.random.normal(ks[10], (d_model, mw), jnp.float32),
        "proj_b": s * jax.random.normal(ks[11], (d_model,), jnp.float32),
    }


if __name__ == "__main__":
    # Small shapes consistent with the module: d_model=32, n_head=4,
    # mlp_ratio=4 (mlp_width=128), batch=2, seq=16.
    B, L = 2, 16
    d_model, n_head = 32, 4

    key = jax.random.PRNGKey(0)
    kx, kp = jax.random.split(key)
    x = jax.random.normal(kx, (B, L, d_model), jnp.float32)
    params = make_params(kp, d_model, mlp_ratio=4.0)

    out = residual_attention_block(x, params, n_head)
    out = jax.block_until_ready(out)

    ref = residual_attention_block_ref(x, params, n_head)
    assert out.shape == (B, L, d_model)
    max_err = float(jnp.max(jnp.abs(out.astype(jnp.float32) - ref.astype(jnp.float32))))
    # bf16 MXU operands -> slightly looser tolerance than a pure-f32 kernel.
    assert jnp.allclose(out, ref, rtol=2e-2, atol=2e-2), (
        f"mismatch vs reference (max abs err {max_err})")
    print("KERNEL_OK")
</pallas_src>

<mosaic_0001>
module attributes {stable_mosaic.version = 11 : i64} {
  func.func @block_kernel(%arg0: i32, %arg1: memref<2x16x32xf32, #tpu.memory_space<vmem>>, %arg2: memref<8x128xf32, #tpu.memory_space<vmem>>, %arg3: memref<32x96xbf16, #tpu.memory_space<vmem>>, %arg4: memref<32x32xbf16, #tpu.memory_space<vmem>>, %arg5: memref<32x128xbf16, #tpu.memory_space<vmem>>, %arg6: memref<128x32xbf16, #tpu.memory_space<vmem>>, %arg7: memref<2x16x32xf32, #tpu.memory_space<vmem>>) attributes {dimension_semantics = [#tpu.dimension_semantics<parallel>], iteration_bounds = array<i64: 1>, scalar_prefetch = 0 : i64, scratch_operands = 0 : i64, tpu.core_type = #tpu.core_type<tc>, window_params = [{transform_indices = @transform_0, window_bounds = array<i64: 2, 16, 32>}, {pipeline_mode = #tpu.pipeline_mode<synchronous>, transform_indices = @transform_1, window_bounds = array<i64: 8, 128>}, {pipeline_mode = #tpu.pipeline_mode<synchronous>, transform_indices = @transform_2, window_bounds = array<i64: 32, 96>}, {pipeline_mode = #tpu.pipeline_mode<synchronous>, transform_indices = @transform_3, window_bounds = array<i64: 32, 32>}, {pipeline_mode = #tpu.pipeline_mode<synchronous>, transform_indices = @transform_4, window_bounds = array<i64: 32, 128>}, {pipeline_mode = #tpu.pipeline_mode<synchronous>, transform_indices = @transform_5, window_bounds = array<i64: 128, 32>}, {transform_indices = @transform_6, window_bounds = array<i64: 2, 16, 32>}]} {
    %c0 = arith.constant 0 : index
    %c0_0 = arith.constant 0 : index
    %c0_1 = arith.constant 0 : index
    %0 = vector.load %arg1[%c0, %c0_0, %c0_1] : memref<2x16x32xf32, #tpu.memory_space<vmem>>, vector<2x16x32xf32>
    %1 = vector.shape_cast %0 : vector<2x16x32xf32> to vector<32x32xf32>
    %c0_2 = arith.constant 0 : index
    %c0_3 = arith.constant 0 : index
    %2 = vector.load %arg2[%c0_2, %c0_3] : memref<8x128xf32, #tpu.memory_space<vmem>>, vector<1x32xf32>
    %c1 = arith.constant 1 : index
    %c0_4 = arith.constant 0 : index
    %3 = vector.load %arg2[%c1, %c0_4] : memref<8x128xf32, #tpu.memory_space<vmem>>, vector<1x32xf32>
    %c2 = arith.constant 2 : index
    %c0_5 = arith.constant 0 : index
    %4 = vector.load %arg2[%c2, %c0_5] : memref<8x128xf32, #tpu.memory_space<vmem>>, vector<1x32xf32>
    %c3 = arith.constant 3 : index
    %c0_6 = arith.constant 0 : index
    %5 = vector.load %arg2[%c3, %c0_6] : memref<8x128xf32, #tpu.memory_space<vmem>>, vector<1x32xf32>
    %c4 = arith.constant 4 : index
    %c0_7 = arith.constant 0 : index
    %6 = vector.load %arg2[%c4, %c0_7] : memref<8x128xf32, #tpu.memory_space<vmem>>, vector<1x32xf32>
    %c5 = arith.constant 5 : index
    %c0_8 = arith.constant 0 : index
    %7 = vector.load %arg2[%c5, %c0_8] : memref<8x128xf32, #tpu.memory_space<vmem>>, vector<1x32xf32>
    %c6 = arith.constant 6 : index
    %c0_9 = arith.constant 0 : index
    %8 = vector.load %arg2[%c6, %c0_9] : memref<8x128xf32, #tpu.memory_space<vmem>>, vector<1x96xf32>
    %c7 = arith.constant 7 : index
    %c0_10 = arith.constant 0 : index
    %9 = vector.load %arg2[%c7, %c0_10] : memref<8x128xf32, #tpu.memory_space<vmem>>, vector<1x128xf32>
    %cst = arith.constant dense<0.000000e+00> : vector<32xf32>
    %10 = vector.multi_reduction <add>, %1, %cst [1] : vector<32x32xf32> to vector<32xf32>
    %11 = vector.shape_cast %10 : vector<32xf32> to vector<32x1xf32>
    %cst_11 = arith.constant 3.200000e+01 : f32
    %12 = vector.broadcast %cst_11 : f32 to vector<32x1xf32>
    %13 = arith.divf %11, %12 : vector<32x1xf32>
    %14 = vector.broadcast %13 : vector<32x1xf32> to vector<32x32xf32>
    %15 = arith.subf %1, %14 : vector<32x32xf32>
    %16 = arith.mulf %15, %15 : vector<32x32xf32>
    %cst_12 = arith.constant dense<0.000000e+00> : vector<32xf32>
    %17 = vector.multi_reduction <add>, %16, %cst_12 [1] : vector<32x32xf32> to vector<32xf32>
    %18 = vector.shape_cast %17 : vector<32xf32> to vector<32x1xf32>
    %cst_13 = arith.constant 3.200000e+01 : f32
    %19 = vector.broadcast %cst_13 : f32 to vector<32x1xf32>
    %20 = arith.divf %18, %19 : vector<32x1xf32>
    %21 = vector.broadcast %13 : vector<32x1xf32> to vector<32x32xf32>
    %22 = arith.subf %1, %21 : vector<32x32xf32>
    %cst_14 = arith.constant 9.99999974E-6 : f32
    %23 = vector.broadcast %cst_14 : f32 to vector<32x1xf32>
    %24 = arith.addf %20, %23 : vector<32x1xf32>
    %25 = math.rsqrt %24 : vector<32x1xf32>
    %26 = vector.broadcast %25 : vector<32x1xf32> to vector<32x32xf32>
    %27 = arith.mulf %22, %26 : vector<32x32xf32>
    %28 = vector.broadcast %2 : vector<1x32xf32> to vector<32x32xf32>
    %29 = arith.mulf %27, %28 : vector<32x32xf32>
    %30 = vector.broadcast %3 : vector<1x32xf32> to vector<32x32xf32>
    %31 = arith.addf %29, %30 : vector<32x32xf32>
    %32 = arith.truncf %31 : vector<32x32xf32> to vector<32x32xbf16>
    %c0_15 = arith.constant 0 : index
    %c0_16 = arith.constant 0 : index
    %33 = vector.load %arg3[%c0_15, %c0_16] : memref<32x96xbf16, #tpu.memory_space<vmem>>, vector<32x96xbf16>
    %cst_17 = arith.constant dense<0.000000e+00> : vector<32x96xf32>
    %34 = tpu.matmul %32, %33, %cst_17 {dimension_numbers = #tpu.dot_dimension_numbers<[1], [0], [0], [1], [0, 0, 1, 1], [], []>} : vector<32x32xbf16>, vector<32x96xbf16>, vector<32x96xf32> -> vector<32x96xf32>
    %35 = vector.broadcast %8 : vector<1x96xf32> to vector<32x96xf32>
    %36 = arith.addf %34, %35 : vector<32x96xf32>
    %37 = vector.extract_strided_slice %36 {offsets = [0, 0], sizes = [32, 32], strides = [1, 1]} : vector<32x96xf32> to vector<32x32xf32>
    %cst_18 = arith.constant 0.353553385 : f32
    %38 = vector.broadcast %cst_18 : f32 to vector<32x32xf32>
    %39 = arith.mulf %37, %38 : vector<32x32xf32>
    %40 = vector.extract_strided_slice %36 {offsets = [0, 32], sizes = [32, 32], strides = [1, 1]} : vector<32x96xf32> to vector<32x32xf32>
    %41 = vector.extract_strided_slice %36 {offsets = [0, 64], sizes = [32, 32], strides = [1, 1]} : vector<32x96xf32> to vector<32x32xf32>
    %42 = vector.extract_strided_slice %39 {offsets = [0, 0], sizes = [32, 8], strides = [1, 1]} : vector<32x32xf32> to vector<32x8xf32>
    %43 = vector.shape_cast %42 : vector<32x8xf32> to vector<2x16x8xf32>
    %44 = vector.extract_strided_slice %39 {offsets = [0, 8], sizes = [32, 8], strides = [1, 1]} : vector<32x32xf32> to vector<32x8xf32>
    %45 = vector.shape_cast %44 : vector<32x8xf32> to vector<2x16x8xf32>
    %46 = vector.extract_strided_slice %39 {offsets = [0, 16], sizes = [32, 8], strides = [1, 1]} : vector<32x32xf32> to vector<32x8xf32>
    %47 = vector.shape_cast %46 : vector<32x8xf32> to vector<2x16x8xf32>
    %48 = vector.extract_strided_slice %39 {offsets = [0, 24], sizes = [32, 8], strides = [1, 1]} : vector<32x32xf32> to vector<32x8xf32>
    %49 = vector.shape_cast %48 : vector<32x8xf32> to vector<2x16x8xf32>
    %50 = tpu.concatenate %43, %45, %47, %49 in 0 : vector<2x16x8xf32>, vector<2x16x8xf32>, vector<2x16x8xf32>, vector<2x16x8xf32> -> vector<8x16x8xf32>
    %51 = arith.truncf %50 : vector<8x16x8xf32> to vector<8x16x8xbf16>
    %52 = vector.extract_strided_slice %40 {offsets = [0, 0], sizes = [32, 8], strides = [1, 1]} : vector<32x32xf32> to vector<32x8xf32>
    %53 = vector.shape_cast %52 : vector<32x8xf32> to vector<2x16x8xf32>
    %54 = vector.extract_strided_slice %40 {offsets = [0, 8], sizes = [32, 8], strides = [1, 1]} : vector<32x32xf32> to vector<32x8xf32>
    %55 = vector.shape_cast %54 : vector<32x8xf32> to vector<2x16x8xf32>
    %56 = vector.extract_strided_slice %40 {offsets = [0, 16], sizes = [32, 8], strides = [1, 1]} : vector<32x32xf32> to vector<32x8xf32>
    %57 = vector.shape_cast %56 : vector<32x8xf32> to vector<2x16x8xf32>
    %58 = vector.extract_strided_slice %40 {offsets = [0, 24], sizes = [32, 8], strides = [1, 1]} : vector<32x32xf32> to vector<32x8xf32>
    %59 = vector.shape_cast %58 : vector<32x8xf32> to vector<2x16x8xf32>
    %60 = tpu.concatenate %53, %55, %57, %59 in 0 : vector<2x16x8xf32>, vector<2x16x8xf32>, vector<2x16x8xf32>, vector<2x16x8xf32> -> vector<8x16x8xf32>
    %61 = arith.truncf %60 : vector<8x16x8xf32> to vector<8x16x8xbf16>
    %62 = vector.extract_strided_slice %41 {offsets = [0, 0], sizes = [32, 8], strides = [1, 1]} : vector<32x32xf32> to vector<32x8xf32>
    %63 = vector.shape_cast %62 : vector<32x8xf32> to vector<2x16x8xf32>
    %64 = vector.extract_strided_slice %41 {offsets = [0, 8], sizes = [32, 8], strides = [1, 1]} : vector<32x32xf32> to vector<32x8xf32>
    %65 = vector.shape_cast %64 : vector<32x8xf32> to vector<2x16x8xf32>
    %66 = vector.extract_strided_slice %41 {offsets = [0, 16], sizes = [32, 8], strides = [1, 1]} : vector<32x32xf32> to vector<32x8xf32>
    %67 = vector.shape_cast %66 : vector<32x8xf32> to vector<2x16x8xf32>
    %68 = vector.extract_strided_slice %41 {offsets = [0, 24], sizes = [32, 8], strides = [1, 1]} : vector<32x32xf32> to vector<32x8xf32>
    %69 = vector.shape_cast %68 : vector<32x8xf32> to vector<2x16x8xf32>
    %70 = tpu.concatenate %63, %65, %67, %69 in 0 : vector<2x16x8xf32>, vector<2x16x8xf32>, vector<2x16x8xf32>, vector<2x16x8xf32> -> vector<8x16x8xf32>
    %71 = arith.truncf %70 : vector<8x16x8xf32> to vector<8x16x8xbf16>
    "tpu.trace_start"() <{level = 10 : i32, message = "bqd,bkd->bqk"}> : () -> ()
    %cst_19 = arith.constant dense<0.000000e+00> : vector<8x16x16xf32>
    %72 = tpu.matmul %51, %61, %cst_19 {dimension_numbers = #tpu.dot_dimension_numbers<[2], [2], [1], [1], [0, 0, 0, 1, 1, 1], [0], [0]>} : vector<8x16x8xbf16>, vector<8x16x8xbf16>, vector<8x16x16xf32> -> vector<8x16x16xf32>
    "tpu.trace_stop"() : () -> ()
    %cst_20 = arith.constant dense<0xFF800000> : vector<8x16xf32>
    %73 = vector.multi_reduction <maximumf>, %72, %cst_20 [2] : vector<8x16x16xf32> to vector<8x16xf32>
    %74 = vector.shape_cast %73 : vector<8x16xf32> to vector<8x16x1xf32>
    %75 = vector.broadcast %74 : vector<8x16x1xf32> to vector<8x16x16xf32>
    %76 = arith.subf %72, %75 : vector<8x16x16xf32>
    %77 = math.exp %76 : vector<8x16x16xf32>
    %cst_21 = arith.constant dense<0.000000e+00> : vector<8x16xf32>
    %78 = vector.multi_reduction <add>, %77, %cst_21 [2] : vector<8x16x16xf32> to vector<8x16xf32>
    %79 = vector.shape_cast %78 : vector<8x16xf32> to vector<8x16x1xf32>
    %80 = tpu.reciprocal %79 {approx = true} : vector<8x16x1xf32> -> vector<8x16x1xf32>
    %81 = vector.broadcast %80 : vector<8x16x1xf32> to vector<8x16x16xf32>
    %82 = arith.mulf %77, %81 : vector<8x16x16xf32>
    %83 = arith.truncf %82 : vector<8x16x16xf32> to vector<8x16x16xbf16>
    "tpu.trace_start"() <{level = 10 : i32, message = "bqk,bkd->bqd"}> : () -> ()
    %cst_22 = arith.constant dense<0.000000e+00> : vector<8x16x8xf32>
    %84 = tpu.matmul %83, %71, %cst_22 {dimension_numbers = #tpu.dot_dimension_numbers<[2], [1], [1], [2], [0, 0, 0, 1, 1, 2], [0], [0]>} : vector<8x16x16xbf16>, vector<8x16x8xbf16>, vector<8x16x8xf32> -> vector<8x16x8xf32>
    "tpu.trace_stop"() : () -> ()
    %85 = vector.extract_strided_slice %84 {offsets = [0, 0, 0], sizes = [2, 16, 8], strides = [1, 1, 1]} : vector<8x16x8xf32> to vector<2x16x8xf32>
    %86 = vector.shape_cast %85 : vector<2x16x8xf32> to vector<32x8xf32>
    %87 = vector.extract_strided_slice %84 {offsets = [2, 0, 0], sizes = [2, 16, 8], strides = [1, 1, 1]} : vector<8x16x8xf32> to vector<2x16x8xf32>
    %88 = vector.shape_cast %87 : vector<2x16x8xf32> to vector<32x8xf32>
    %89 = vector.extract_strided_slice %84 {offsets = [4, 0, 0], sizes = [2, 16, 8], strides = [1, 1, 1]} : vector<8x16x8xf32> to vector<2x16x8xf32>
    %90 = vector.shape_cast %89 : vector<2x16x8xf32> to vector<32x8xf32>
    %91 = vector.extract_strided_slice %84 {offsets = [6, 0, 0], sizes = [2, 16, 8], strides = [1, 1, 1]} : vector<8x16x8xf32> to vector<2x16x8xf32>
    %92 = vector.shape_cast %91 : vector<2x16x8xf32> to vector<32x8xf32>
    %93 = tpu.concatenate %86, %88, %90, %92 in 1 : vector<32x8xf32>, vector<32x8xf32>, vector<32x8xf32>, vector<32x8xf32> -> vector<32x32xf32>
    %94 = arith.truncf %93 : vector<32x32xf32> to vector<32x32xbf16>
    %c0_23 = arith.constant 0 : index
    %c0_24 = arith.constant 0 : index
    %95 = vector.load %arg4[%c0_23, %c0_24] : memref<32x32xbf16, #tpu.memory_space<vmem>>, vector<32x32xbf16>
    %cst_25 = arith.constant dense<0.000000e+00> : vector<32x32xf32>
    %96 = tpu.matmul %94, %95, %cst_25 {dimension_numbers = #tpu.dot_dimension_numbers<[1], [0], [0], [1], [0, 0, 1, 1], [], []>} : vector<32x32xbf16>, vector<32x32xbf16>, vector<32x32xf32> -> vector<32x32xf32>
    %97 = vector.broadcast %6 : vector<1x32xf32> to vector<32x32xf32>
    %98 = arith.addf %96, %97 : vector<32x32xf32>
    %99 = arith.addf %1, %98 : vector<32x32xf32>
    %cst_26 = arith.constant dense<0.000000e+00> : vector<32xf32>
    %100 = vector.multi_reduction <add>, %99, %cst_26 [1] : vector<32x32xf32> to vector<32xf32>
    %101 = vector.shape_cast %100 : vector<32xf32> to vector<32x1xf32>
    %cst_27 = arith.constant 3.200000e+01 : f32
    %102 = vector.broadcast %cst_27 : f32 to vector<32x1xf32>
    %103 = arith.divf %101, %102 : vector<32x1xf32>
    %104 = vector.broadcast %103 : vector<32x1xf32> to vector<32x32xf32>
    %105 = arith.subf %99, %104 : vector<32x32xf32>
    %106 = arith.mulf %105, %105 : vector<32x32xf32>
    %cst_28 = arith.constant dense<0.000000e+00> : vector<32xf32>
    %107 = vector.multi_reduction <add>, %106, %cst_28 [1] : vector<32x32xf32> to vector<32xf32>
    %108 = vector.shape_cast %107 : vector<32xf32> to vector<32x1xf32>
    %cst_29 = arith.constant 3.200000e+01 : f32
    %109 = vector.broadcast %cst_29 : f32 to vector<32x1xf32>
    %110 = arith.divf %108, %109 : vector<32x1xf32>
    %111 = vector.broadcast %103 : vector<32x1xf32> to vector<32x32xf32>
    %112 = arith.subf %99, %111 : vector<32x32xf32>
    %cst_30 = arith.constant 9.99999974E-6 : f32
    %113 = vector.broadcast %cst_30 : f32 to vector<32x1xf32>
    %114 = arith.addf %110, %113 : vector<32x1xf32>
    %115 = math.rsqrt %114 : vector<32x1xf32>
    %116 = vector.broadcast %115 : vector<32x1xf32> to vector<32x32xf32>
    %117 = arith.mulf %112, %116 : vector<32x32xf32>
    %118 = vector.broadcast %4 : vector<1x32xf32> to vector<32x32xf32>
    %119 = arith.mulf %117, %118 : vector<32x32xf32>
    %120 = vector.broadcast %5 : vector<1x32xf32> to vector<32x32xf32>
    %121 = arith.addf %119, %120 : vector<32x32xf32>
    %122 = arith.truncf %121 : vector<32x32xf32> to vector<32x32xbf16>
    %c0_31 = arith.constant 0 : index
    %c0_32 = arith.constant 0 : index
    %123 = vector.load %arg5[%c0_31, %c0_32] : memref<32x128xbf16, #tpu.memory_space<vmem>>, vector<32x128xbf16>
    %cst_33 = arith.constant dense<0.000000e+00> : vector<32x128xf32>
    %124 = tpu.matmul %122, %123, %cst_33 {dimension_numbers = #tpu.dot_dimension_numbers<[1], [0], [0], [1], [0, 0, 1, 1], [], []>} : vector<32x32xbf16>, vector<32x128xbf16>, vector<32x128xf32> -> vector<32x128xf32>
    %125 = vector.broadcast %9 : vector<1x128xf32> to vector<32x128xf32>
    %126 = arith.addf %124, %125 : vector<32x128xf32>
    %cst_34 = arith.constant 5.000000e-01 : f32
    %127 = vector.broadcast %cst_34 : f32 to vector<32x128xf32>
    %128 = arith.mulf %127, %126 : vector<32x128xf32>
    %cst_35 = arith.constant 4.471500e-02 : f32
    %129 = vector.broadcast %cst_35 : f32 to vector<32x128xf32>
    %130 = arith.mulf %129, %126 : vector<32x128xf32>
    %131 = arith.mulf %130, %126 : vector<32x128xf32>
    %132 = arith.mulf %131, %126 : vector<32x128xf32>
    %133 = arith.addf %126, %132 : vector<32x128xf32>
    %cst_36 = arith.constant 0.797884583 : f32
    %134 = vector.broadcast %cst_36 : f32 to vector<32x128xf32>
    %135 = arith.mulf %134, %133 : vector<32x128xf32>
    %136 = math.tanh %135 : vector<32x128xf32>
    %cst_37 = arith.constant 1.000000e+00 : f32
    %137 = vector.broadcast %cst_37 : f32 to vector<32x128xf32>
    %138 = arith.addf %137, %136 : vector<32x128xf32>
    %139 = arith.mulf %128, %138 : vector<32x128xf32>
    %140 = arith.truncf %139 : vector<32x128xf32> to vector<32x128xbf16>
    %c0_38 = arith.constant 0 : index
    %c0_39 = arith.constant 0 : index
    %141 = vector.load %arg6[%c0_38, %c0_39] : memref<128x32xbf16, #tpu.memory_space<vmem>>, vector<128x32xbf16>
    %cst_40 = arith.constant dense<0.000000e+00> : vector<32x32xf32>
    %142 = tpu.matmul %140, %141, %cst_40 {dimension_numbers = #tpu.dot_dimension_numbers<[1], [0], [0], [1], [0, 0, 1, 1], [], []>} : vector<32x128xbf16>, vector<128x32xbf16>, vector<32x32xf32> -> vector<32x32xf32>
    %143 = vector.broadcast %7 : vector<1x32xf32> to vector<32x32xf32>
    %144 = arith.addf %142, %143 : vector<32x32xf32>
    %145 = arith.addf %99, %144 : vector<32x32xf32>
    %146 = vector.shape_cast %145 : vector<32x32xf32> to vector<2x16x32xf32>
    %c0_41 = arith.constant 0 : index
    %c0_42 = arith.constant 0 : index
    %c0_43 = arith.constant 0 : index
    %147 = vector.load %arg7[%c0_41, %c0_42, %c0_43] : memref<2x16x32xf32, #tpu.memory_space<vmem>>, vector<2x16x32xf32>
    tpu.vector_store %arg7[%c0_41, %c0_42, %c0_43], %146 {strides = array<i32>} : memref<2x16x32xf32, #tpu.memory_space<vmem>>, vector<2x16x32xf32>,
    return
  }
  func.func @transform_0(%arg0: i32) -> (i32, i32, i32) {
    %c0_i32 = arith.constant 0 : i32
    %c0_i32_0 = arith.constant 0 : i32
    %c0_i32_1 = arith.constant 0 : i32
    return %arg0, %c0_i32, %c0_i32_0 : i32, i32, i32
  }
  func.func @transform_1(%arg0: i32) -> (i32, i32) {
    %c0_i32 = arith.constant 0 : i32
    %c0_i32_0 = arith.constant 0 : i32
    %c0_i32_1 = arith.constant 0 : i32
    return %c0_i32, %c0_i32_0 : i32, i32
  }
  func.func @transform_2(%arg0: i32) -> (i32, i32) {
    %c0_i32 = arith.constant 0 : i32
    %c0_i32_0 = arith.constant 0 : i32
    %c0_i32_1 = arith.constant 0 : i32
    return %c0_i32, %c0_i32_0 : i32, i32
  }
  func.func @transform_3(%arg0: i32) -> (i32, i32) {
    %c0_i32 = arith.constant 0 : i32
    %c0_i32_0 = arith.constant 0 : i32
    %c0_i32_1 = arith.constant 0 : i32
    return %c0_i32, %c0_i32_0 : i32, i32
  }
  func.func @transform_4(%arg0: i32) -> (i32, i32) {
    %c0_i32 = arith.constant 0 : i32
    %c0_i32_0 = arith.constant 0 : i32
    %c0_i32_1 = arith.constant 0 : i32
    return %c0_i32, %c0_i32_0 : i32, i32
  }
  func.func @transform_5(%arg0: i32) -> (i32, i32) {
    %c0_i32 = arith.constant 0 : i32
    %c0_i32_0 = arith.constant 0 : i32
    %c0_i32_1 = arith.constant 0 : i32
    return %c0_i32, %c0_i32_0 : i32, i32
  }
  func.func @transform_6(%arg0: i32) -> (i32, i32, i32) {
    %c0_i32 = arith.constant 0 : i32
    %c0_i32_0 = arith.constant 0 : i32
    %c0_i32_1 = arith.constant 0 : i32
    return %arg0, %c0_i32, %c0_i32_0 : i32, i32, i32
  }
}

module attributes {stable_mosaic.version = 11 : i64} {
  func.func @block_kernel(%arg0: i32, %arg1: memref<2x16x32xf32, #tpu.memory_space<vmem>>, %arg2: memref<8x128xf32, #tpu.memory_space<vmem>>, %arg3: memref<32x96xbf16, #tpu.memory_space<vmem>>, %arg4: memref<32x32xbf16, #tpu.memory_space<vmem>>, %arg5: memref<32x128xbf16, #tpu.memory_space<vmem>>, %arg6: memref<128x32xbf16, #tpu.memory_space<vmem>>, %arg7: memref<2x16x32xf32, #tpu.memory_space<vmem>>) attributes {dimension_semantics = [#tpu.dimension_semantics<parallel>], iteration_bounds = array<i64: 1>, scalar_prefetch = 0 : i64, scratch_operands = 0 : i64, tpu.core_type = #tpu.core_type<tc>, window_params = [{transform_indices = @transform_0, window_bounds = array<i64: 2, 16, 32>}, {pipeline_mode = #tpu.pipeline_mode<synchronous>, transform_indices = @transform_1, window_bounds = array<i64: 8, 128>}, {pipeline_mode = #tpu.pipeline_mode<synchronous>, transform_indices = @transform_2, window_bounds = array<i64: 32, 96>}, {pipeline_mode = #tpu.pipeline_mode<synchronous>, transform_indices = @transform_3, window_bounds = array<i64: 32, 32>}, {pipeline_mode = #tpu.pipeline_mode<synchronous>, transform_indices = @transform_4, window_bounds = array<i64: 32, 128>}, {pipeline_mode = #tpu.pipeline_mode<synchronous>, transform_indices = @transform_5, window_bounds = array<i64: 128, 32>}, {transform_indices = @transform_6, window_bounds = array<i64: 2, 16, 32>}]} {
    %c0 = arith.constant 0 : index
    %c0_0 = arith.constant 0 : index
    %c0_1 = arith.constant 0 : index
    %0 = vector.load %arg1[%c0, %c0_0, %c0_1] : memref<2x16x32xf32, #tpu.memory_space<vmem>>, vector<2x16x32xf32>
    %1 = vector.shape_cast %0 : vector<2x16x32xf32> to vector<32x32xf32>
    %c0_2 = arith.constant 0 : index
    %c0_3 = arith.constant 0 : index
    %2 = vector.load %arg2[%c0_2, %c0_3] : memref<8x128xf32, #tpu.memory_space<vmem>>, vector<1x32xf32>
    %c1 = arith.constant 1 : index
    %c0_4 = arith.constant 0 : index
    %3 = vector.load %arg2[%c1, %c0_4] : memref<8x128xf32, #tpu.memory_space<vmem>>, vector<1x32xf32>
    %c2 = arith.constant 2 : index
    %c0_5 = arith.constant 0 : index
    %4 = vector.load %arg2[%c2, %c0_5] : memref<8x128xf32, #tpu.memory_space<vmem>>, vector<1x32xf32>
    %c3 = arith.constant 3 : index
    %c0_6 = arith.constant 0 : index
    %5 = vector.load %arg2[%c3, %c0_6] : memref<8x128xf32, #tpu.memory_space<vmem>>, vector<1x32xf32>
    %c4 = arith.constant 4 : index
    %c0_7 = arith.constant 0 : index
    %6 = vector.load %arg2[%c4, %c0_7] : memref<8x128xf32, #tpu.memory_space<vmem>>, vector<1x32xf32>
    %c5 = arith.constant 5 : index
    %c0_8 = arith.constant 0 : index
    %7 = vector.load %arg2[%c5, %c0_8] : memref<8x128xf32, #tpu.memory_space<vmem>>, vector<1x32xf32>
    %c6 = arith.constant 6 : index
    %c0_9 = arith.constant 0 : index
    %8 = vector.load %arg2[%c6, %c0_9] : memref<8x128xf32, #tpu.memory_space<vmem>>, vector<1x96xf32>
    %c7 = arith.constant 7 : index
    %c0_10 = arith.constant 0 : index
    %9 = vector.load %arg2[%c7, %c0_10] : memref<8x128xf32, #tpu.memory_space<vmem>>, vector<1x128xf32>
    %cst = arith.constant dense<0.000000e+00> : vector<32xf32>
    %10 = vector.multi_reduction <add>, %1, %cst [1] : vector<32x32xf32> to vector<32xf32>
    %11 = vector.shape_cast %10 : vector<32xf32> to vector<32x1xf32>
    %cst_11 = arith.constant 3.200000e+01 : f32
    %12 = vector.broadcast %cst_11 : f32 to vector<32x1xf32>
    %13 = arith.divf %11, %12 : vector<32x1xf32>
    %14 = vector.broadcast %13 : vector<32x1xf32> to vector<32x32xf32>
    %15 = arith.subf %1, %14 : vector<32x32xf32>
    %16 = arith.mulf %15, %15 : vector<32x32xf32>
    %cst_12 = arith.constant dense<0.000000e+00> : vector<32xf32>
    %17 = vector.multi_reduction <add>, %16, %cst_12 [1] : vector<32x32xf32> to vector<32xf32>
    %18 = vector.shape_cast %17 : vector<32xf32> to vector<32x1xf32>
    %cst_13 = arith.constant 3.200000e+01 : f32
    %19 = vector.broadcast %cst_13 : f32 to vector<32x1xf32>
    %20 = arith.divf %18, %19 : vector<32x1xf32>
    %21 = vector.broadcast %13 : vector<32x1xf32> to vector<32x32xf32>
    %22 = arith.subf %1, %21 : vector<32x32xf32>
    %cst_14 = arith.constant 9.99999974E-6 : f32
    %23 = vector.broadcast %cst_14 : f32 to vector<32x1xf32>
    %24 = arith.addf %20, %23 : vector<32x1xf32>
    %25 = math.rsqrt %24 : vector<32x1xf32>
    %26 = vector.broadcast %25 : vector<32x1xf32> to vector<32x32xf32>
    %27 = arith.mulf %22, %26 : vector<32x32xf32>
    %28 = vector.broadcast %2 : vector<1x32xf32> to vector<32x32xf32>
    %29 = arith.mulf %27, %28 : vector<32x32xf32>
    %30 = vector.broadcast %3 : vector<1x32xf32> to vector<32x32xf32>
    %31 = arith.addf %29, %30 : vector<32x32xf32>
    %32 = arith.truncf %31 : vector<32x32xf32> to vector<32x32xbf16>
    %c0_15 = arith.constant 0 : index
    %c0_16 = arith.constant 0 : index
    %33 = vector.load %arg3[%c0_15, %c0_16] : memref<32x96xbf16, #tpu.memory_space<vmem>>, vector<32x96xbf16>
    %cst_17 = arith.constant dense<0.000000e+00> : vector<32x96xf32>
    %34 = tpu.matmul %32, %33, %cst_17 {dimension_numbers = #tpu.dot_dimension_numbers<[1], [0], [0], [1], [0, 0, 1, 1], [], []>} : vector<32x32xbf16>, vector<32x96xbf16>, vector<32x96xf32> -> vector<32x96xf32>
    %35 = vector.broadcast %8 : vector<1x96xf32> to vector<32x96xf32>
    %36 = arith.addf %34, %35 : vector<32x96xf32>
    %37 = vector.extract_strided_slice %36 {offsets = [0, 0], sizes = [32, 32], strides = [1, 1]} : vector<32x96xf32> to vector<32x32xf32>
    %cst_18 = arith.constant 0.353553385 : f32
    %38 = vector.broadcast %cst_18 : f32 to vector<32x32xf32>
    %39 = arith.mulf %37, %38 : vector<32x32xf32>
    %40 = vector.extract_strided_slice %36 {offsets = [0, 32], sizes = [32, 32], strides = [1, 1]} : vector<32x96xf32> to vector<32x32xf32>
    %41 = vector.extract_strided_slice %36 {offsets = [0, 64], sizes = [32, 32], strides = [1, 1]} : vector<32x96xf32> to vector<32x32xf32>
    %42 = vector.extract_strided_slice %39 {offsets = [0, 0], sizes = [32, 8], strides = [1, 1]} : vector<32x32xf32> to vector<32x8xf32>
    %43 = vector.shape_cast %42 : vector<32x8xf32> to vector<2x16x8xf32>
    %44 = vector.extract_strided_slice %39 {offsets = [0, 8], sizes = [32, 8], strides = [1, 1]} : vector<32x32xf32> to vector<32x8xf32>
    %45 = vector.shape_cast %44 : vector<32x8xf32> to vector<2x16x8xf32>
    %46 = vector.extract_strided_slice %39 {offsets = [0, 16], sizes = [32, 8], strides = [1, 1]} : vector<32x32xf32> to vector<32x8xf32>
    %47 = vector.shape_cast %46 : vector<32x8xf32> to vector<2x16x8xf32>
    %48 = vector.extract_strided_slice %39 {offsets = [0, 24], sizes = [32, 8], strides = [1, 1]} : vector<32x32xf32> to vector<32x8xf32>
    %49 = vector.shape_cast %48 : vector<32x8xf32> to vector<2x16x8xf32>
    %50 = tpu.concatenate %43, %45, %47, %49 in 0 : vector<2x16x8xf32>, vector<2x16x8xf32>, vector<2x16x8xf32>, vector<2x16x8xf32> -> vector<8x16x8xf32>
    %51 = arith.truncf %50 : vector<8x16x8xf32> to vector<8x16x8xbf16>
    %52 = vector.extract_strided_slice %40 {offsets = [0, 0], sizes = [32, 8], strides = [1, 1]} : vector<32x32xf32> to vector<32x8xf32>
    %53 = vector.shape_cast %52 : vector<32x8xf32> to vector<2x16x8xf32>
    %54 = vector.extract_strided_slice %40 {offsets = [0, 8], sizes = [32, 8], strides = [1, 1]} : vector<32x32xf32> to vector<32x8xf32>
    %55 = vector.shape_cast %54 : vector<32x8xf32> to vector<2x16x8xf32>
    %56 = vector.extract_strided_slice %40 {offsets = [0, 16], sizes = [32, 8], strides = [1, 1]} : vector<32x32xf32> to vector<32x8xf32>
    %57 = vector.shape_cast %56 : vector<32x8xf32> to vector<2x16x8xf32>
    %58 = vector.extract_strided_slice %40 {offsets = [0, 24], sizes = [32, 8], strides = [1, 1]} : vector<32x32xf32> to vector<32x8xf32>
    %59 = vector.shape_cast %58 : vector<32x8xf32> to vector<2x16x8xf32>
    %60 = tpu.concatenate %53, %55, %57, %59 in 0 : vector<2x16x8xf32>, vector<2x16x8xf32>, vector<2x16x8xf32>, vector<2x16x8xf32> -> vector<8x16x8xf32>
    %61 = arith.truncf %60 : vector<8x16x8xf32> to vector<8x16x8xbf16>
    %62 = vector.extract_strided_slice %41 {offsets = [0, 0], sizes = [32, 8], strides = [1, 1]} : vector<32x32xf32> to vector<32x8xf32>
    %63 = vector.shape_cast %62 : vector<32x8xf32> to vector<2x16x8xf32>
    %64 = vector.extract_strided_slice %41 {offsets = [0, 8], sizes = [32, 8], strides = [1, 1]} : vector<32x32xf32> to vector<32x8xf32>
    %65 = vector.shape_cast %64 : vector<32x8xf32> to vector<2x16x8xf32>
    %66 = vector.extract_strided_slice %41 {offsets = [0, 16], sizes = [32, 8], strides = [1, 1]} : vector<32x32xf32> to vector<32x8xf32>
    %67 = vector.shape_cast %66 : vector<32x8xf32> to vector<2x16x8xf32>
    %68 = vector.extract_strided_slice %41 {offsets = [0, 24], sizes = [32, 8], strides = [1, 1]} : vector<32x32xf32> to vector<32x8xf32>
    %69 = vector.shape_cast %68 : vector<32x8xf32> to vector<2x16x8xf32>
    %70 = tpu.concatenate %63, %65, %67, %69 in 0 : vector<2x16x8xf32>, vector<2x16x8xf32>, vector<2x16x8xf32>, vector<2x16x8xf32> -> vector<8x16x8xf32>
    %71 = arith.truncf %70 : vector<8x16x8xf32> to vector<8x16x8xbf16>
    "tpu.trace_start"() <{level = 10 : i32, message = "bqd,bkd->bqk"}> : () -> ()
    %cst_19 = arith.constant dense<0.000000e+00> : vector<8x16x16xf32>
    %72 = tpu.matmul %51, %61, %cst_19 {dimension_numbers = #tpu.dot_dimension_numbers<[2], [2], [1], [1], [0, 0, 0, 1, 1, 1], [0], [0]>} : vector<8x16x8xbf16>, vector<8x16x8xbf16>, vector<8x16x16xf32> -> vector<8x16x16xf32>
    "tpu.trace_stop"() : () -> ()
    %cst_20 = arith.constant dense<0xFF800000> : vector<8x16xf32>
    %73 = vector.multi_reduction <maximumf>, %72, %cst_20 [2] : vector<8x16x16xf32> to vector<8x16xf32>
    %74 = vector.shape_cast %73 : vector<8x16xf32> to vector<8x16x1xf32>
    %75 = vector.broadcast %74 : vector<8x16x1xf32> to vector<8x16x16xf32>
    %76 = arith.subf %72, %75 : vector<8x16x16xf32>
    %77 = math.exp %76 : vector<8x16x16xf32>
    %cst_21 = arith.constant dense<0.000000e+00> : vector<8x16xf32>
    %78 = vector.multi_reduction <add>, %77, %cst_21 [2] : vector<8x16x16xf32> to vector<8x16xf32>
    %79 = vector.shape_cast %78 : vector<8x16xf32> to vector<8x16x1xf32>
    %80 = tpu.reciprocal %79 {approx = true} : vector<8x16x1xf32> -> vector<8x16x1xf32>
    %81 = vector.broadcast %80 : vector<8x16x1xf32> to vector<8x16x16xf32>
    %82 = arith.mulf %77, %81 : vector<8x16x16xf32>
    %83 = arith.truncf %82 : vector<8x16x16xf32> to vector<8x16x16xbf16>
    "tpu.trace_start"() <{level = 10 : i32, message = "bqk,bkd->bqd"}> : () -> ()
    %cst_22 = arith.constant dense<0.000000e+00> : vector<8x16x8xf32>
    %84 = tpu.matmul %83, %71, %cst_22 {dimension_numbers = #tpu.dot_dimension_numbers<[2], [1], [1], [2], [0, 0, 0, 1, 1, 2], [0], [0]>} : vector<8x16x16xbf16>, vector<8x16x8xbf16>, vector<8x16x8xf32> -> vector<8x16x8xf32>
    "tpu.trace_stop"() : () -> ()
    %85 = vector.extract_strided_slice %84 {offsets = [0, 0, 0], sizes = [2, 16, 8], strides = [1, 1, 1]} : vector<8x16x8xf32> to vector<2x16x8xf32>
    %86 = vector.shape_cast %85 : vector<2x16x8xf32> to vector<32x8xf32>
    %87 = vector.extract_strided_slice %84 {offsets = [2, 0, 0], sizes = [2, 16, 8], strides = [1, 1, 1]} : vector<8x16x8xf32> to vector<2x16x8xf32>
    %88 = vector.shape_cast %87 : vector<2x16x8xf32> to vector<32x8xf32>
    %89 = vector.extract_strided_slice %84 {offsets = [4, 0, 0], sizes = [2, 16, 8], strides = [1, 1, 1]} : vector<8x16x8xf32> to vector<2x16x8xf32>
    %90 = vector.shape_cast %89 : vector<2x16x8xf32> to vector<32x8xf32>
    %91 = vector.extract_strided_slice %84 {offsets = [6, 0, 0], sizes = [2, 16, 8], strides = [1, 1, 1]} : vector<8x16x8xf32> to vector<2x16x8xf32>
    %92 = vector.shape_cast %91 : vector<2x16x8xf32> to vector<32x8xf32>
    %93 = tpu.concatenate %86, %88, %90, %92 in 1 : vector<32x8xf32>, vector<32x8xf32>, vector<32x8xf32>, vector<32x8xf32> -> vector<32x32xf32>
    %94 = arith.truncf %93 : vector<32x32xf32> to vector<32x32xbf16>
    %c0_23 = arith.constant 0 : index
    %c0_24 = arith.constant 0 : index
    %95 = vector.load %arg4[%c0_23, %c0_24] : memref<32x32xbf16, #tpu.memory_space<vmem>>, vector<32x32xbf16>
    %cst_25 = arith.constant dense<0.000000e+00> : vector<32x32xf32>
    %96 = tpu.matmul %94, %95, %cst_25 {dimension_numbers = #tpu.dot_dimension_numbers<[1], [0], [0], [1], [0, 0, 1, 1], [], []>} : vector<32x32xbf16>, vector<32x32xbf16>, vector<32x32xf32> -> vector<32x32xf32>
    %97 = vector.broadcast %6 : vector<1x32xf32> to vector<32x32xf32>
    %98 = arith.addf %96, %97 : vector<32x32xf32>
    %99 = arith.addf %1, %98 : vector<32x32xf32>
    %cst_26 = arith.constant dense<0.000000e+00> : vector<32xf32>
    %100 = vector.multi_reduction <add>, %99, %cst_26 [1] : vector<32x32xf32> to vector<32xf32>
    %101 = vector.shape_cast %100 : vector<32xf32> to vector<32x1xf32>
    %cst_27 = arith.constant 3.200000e+01 : f32
    %102 = vector.broadcast %cst_27 : f32 to vector<32x1xf32>
    %103 = arith.divf %101, %102 : vector<32x1xf32>
    %104 = vector.broadcast %103 : vector<32x1xf32> to vector<32x32xf32>
    %105 = arith.subf %99, %104 : vector<32x32xf32>
    %106 = arith.mulf %105, %105 : vector<32x32xf32>
    %cst_28 = arith.constant dense<0.000000e+00> : vector<32xf32>
    %107 = vector.multi_reduction <add>, %106, %cst_28 [1] : vector<32x32xf32> to vector<32xf32>
    %108 = vector.shape_cast %107 : vector<32xf32> to vector<32x1xf32>
    %cst_29 = arith.constant 3.200000e+01 : f32
    %109 = vector.broadcast %cst_29 : f32 to vector<32x1xf32>
    %110 = arith.divf %108, %109 : vector<32x1xf32>
    %111 = vector.broadcast %103 : vector<32x1xf32> to vector<32x32xf32>
    %112 = arith.subf %99, %111 : vector<32x32xf32>
    %cst_30 = arith.constant 9.99999974E-6 : f32
    %113 = vector.broadcast %cst_30 : f32 to vector<32x1xf32>
    %114 = arith.addf %110, %113 : vector<32x1xf32>
    %115 = math.rsqrt %114 : vector<32x1xf32>
    %116 = vector.broadcast %115 : vector<32x1xf32> to vector<32x32xf32>
    %117 = arith.mulf %112, %116 : vector<32x32xf32>
    %118 = vector.broadcast %4 : vector<1x32xf32> to vector<32x32xf32>
    %119 = arith.mulf %117, %118 : vector<32x32xf32>
    %120 = vector.broadcast %5 : vector<1x32xf32> to vector<32x32xf32>
    %121 = arith.addf %119, %120 : vector<32x32xf32>
    %122 = arith.truncf %121 : vector<32x32xf32> to vector<32x32xbf16>
    %c0_31 = arith.constant 0 : index
    %c0_32 = arith.constant 0 : index
    %123 = vector.load %arg5[%c0_31, %c0_32] : memref<32x128xbf16, #tpu.memory_space<vmem>>, vector<32x128xbf16>
    %cst_33 = arith.constant dense<0.000000e+00> : vector<32x128xf32>
    %124 = tpu.matmul %122, %123, %cst_33 {dimension_numbers = #tpu.dot_dimension_numbers<[1], [0], [0], [1], [0, 0, 1, 1], [], []>} : vector<32x32xbf16>, vector<32x128xbf16>, vector<32x128xf32> -> vector<32x128xf32>
    %125 = vector.broadcast %9 : vector<1x128xf32> to vector<32x128xf32>
    %126 = arith.addf %124, %125 : vector<32x128xf32>
    %cst_34 = arith.constant 5.000000e-01 : f32
    %127 = vector.broadcast %cst_34 : f32 to vector<32x128xf32>
    %128 = arith.mulf %127, %126 : vector<32x128xf32>
    %cst_35 = arith.constant 4.471500e-02 : f32
    %129 = vector.broadcast %cst_35 : f32 to vector<32x128xf32>
    %130 = arith.mulf %129, %126 : vector<32x128xf32>
    %131 = arith.mulf %130, %126 : vector<32x128xf32>
    %132 = arith.mulf %131, %126 : vector<32x128xf32>
    %133 = arith.addf %126, %132 : vector<32x128xf32>
    %cst_36 = arith.constant 0.797884583 : f32
    %134 = vector.broadcast %cst_36 : f32 to vector<32x128xf32>
    %135 = arith.mulf %134, %133 : vector<32x128xf32>
    %136 = math.tanh %135 : vector<32x128xf32>
    %cst_37 = arith.constant 1.000000e+00 : f32
    %137 = vector.broadcast %cst_37 : f32 to vector<32x128xf32>
    %138 = arith.addf %137, %136 : vector<32x128xf32>
    %139 = arith.mulf %128, %138 : vector<32x128xf32>
    %140 = arith.truncf %139 : vector<32x128xf32> to vector<32x128xbf16>
    %c0_38 = arith.constant 0 : index
    %c0_39 = arith.constant 0 : index
    %141 = vector.load %arg6[%c0_38, %c0_39] : memref<128x32xbf16, #tpu.memory_space<vmem>>, vector<128x32xbf16>
    %cst_40 = arith.constant dense<0.000000e+00> : vector<32x32xf32>
    %142 = tpu.matmul %140, %141, %cst_40 {dimension_numbers = #tpu.dot_dimension_numbers<[1], [0], [0], [1], [0, 0, 1, 1], [], []>} : vector<32x128xbf16>, vector<128x32xbf16>, vector<32x32xf32> -> vector<32x32xf32>
    %143 = vector.broadcast %7 : vector<1x32xf32> to vector<32x32xf32>
    %144 = arith.addf %142, %143 : vector<32x32xf32>
    %145 = arith.addf %99, %144 : vector<32x32xf32>
    %146 = vector.shape_cast %145 : vector<32x32xf32> to vector<2x16x32xf32>
    %c0_41 = arith.constant 0 : index
    %c0_42 = arith.constant 0 : index
    %c0_43 = arith.constant 0 : index
    %147 = vector.load %arg7[%c0_41, %c0_42, %c0_43] : memref<2x16x32xf32, #tpu.memory_space<vmem>>, vector<2x16x32xf32>
    tpu.vector_store %arg7[%c0_41, %c0_42, %c0_43], %146 {strides = array<i32>} : memref<2x16x32xf32, #tpu.memory_space<vmem>>, vector<2x16x32xf32>,
    return
  }
  func.func @transform_0(%arg0: i32) -> (i32, i32, i32) {
    %c0_i32 = arith.constant 0 : i32
    %c0_i32_0 = arith.constant 0 : i32
    %c0_i32_1 = arith.constant 0 : i32
    return %arg0, %c0_i32, %c0_i32_0 : i32, i32, i32
  }
  func.func @transform_1(%arg0: i32) -> (i32, i32) {
    %c0_i32 = arith.constant 0 : i32
    %c0_i32_0 = arith.constant 0 : i32
    %c0_i32_1 = arith.constant 0 : i32
    return %c0_i32, %c0_i32_0 : i32, i32
  }
  func.func @transform_2(%arg0: i32) -> (i32, i32) {
    %c0_i32 = arith.constant 0 : i32
    %c0_i32_0 = arith.constant 0 : i32
    %c0_i32_1 = arith.constant 0 : i32
    return %c0_i32, %c0_i32_0 : i32, i32
  }
  func.func @transform_3(%arg0: i32) -> (i32, i32) {
    %c0_i32 = arith.constant 0 : i32
    %c0_i32_0 = arith.constant 0 : i32
    %c0_i32_1 = arith.constant 0 : i32
    return %c0_i32, %c0_i32_0 : i32, i32
  }
  func.func @transform_4(%arg0: i32) -> (i32, i32) {
    %c0_i32 = arith.constant 0 : i32
    %c0_i32_0 = arith.constant 0 : i32
    %c0_i32_1 = arith.constant 0 : i32
    return %c0_i32, %c0_i32_0 : i32, i32
  }
  func.func @transform_5(%arg0: i32) -> (i32, i32) {
    %c0_i32 = arith.constant 0 : i32
    %c0_i32_0 = arith.constant 0 : i32
    %c0_i32_1 = arith.constant 0 : i32
    return %c0_i32, %c0_i32_0 : i32, i32
  }
  func.func @transform_6(%arg0: i32) -> (i32, i32, i32) {
    %c0_i32 = arith.constant 0 : i32
    %c0_i32_0 = arith.constant 0 : i32
    %c0_i32_1 = arith.constant 0 : i32
    return %arg0, %c0_i32, %c0_i32_0 : i32, i32, i32
  }
}

</mosaic_0001>

<bundles_post_ra>
// kernel: tpu_custom_call.1
= control target key start
LH: loop header
LB: loop body
LE: loop exit
PB: predicated region body
PF: predicated region fallthrough
CT: control target
= control target key end

     0   :  { %11 = vsyncpa [#allocation3], 0  ;;  %s2177_s0 = inlined_call_operand.vmem [shape: f32[2,16,32], index: 0, kind: input, shape index: {}]   ;;  %s2178_s1 = inlined_call_operand.hbm [shape: f32[8,128], index: 1, kind: input, shape index: {}]   ;;  %s2179_s2 = inlined_call_operand.vmem [shape: bf16[32,96], index: 2, kind: input, shape index: {}]   ;;  %s2180_s3 = inlined_call_operand.vmem [shape: bf16[32,32], index: 3, kind: input, shape index: {}]   ;;  %s2181_s4 = inlined_call_operand.vmem [shape: bf16[32,128], index: 4, kind: input, shape index: {}]   ;;  %s2182_s5 = inlined_call_operand.vmem [shape: bf16[128,32], index: 5, kind: input, shape index: {}]   ;;  %s2183_s6 = inlined_call_operand.hbm [shape: f32[2,16,32], index: 6, kind: output, shape index: {}]  }
   0x1   :  { %12 = vsyncpa [#allocation4], 0  ;;  %s20_s23 = sshll.u32 %s2178_s1, 4  ;;  %s1715_s24 = smov [#allocation2]   ;;  %s21_s23 = int_to_ptr.hbm [resolvable:$true] %s20_s23 }
   0x2   :  { %s22_s25 = sshll.u32 %s1715_s24, 4  ;;  %s23_s25 = int_to_ptr.vmem [resolvable:$true] %s22_s25 }
   0x3   :  { %25 = dma.hbm_to_vmem [thread:$0]  %s21_s23, 128, %s23_s25, [#allocation3]  }
   0x4   :  { %1711 = dma.done.wait [#allocation3], 128  }
   0x5   :  { %1712 = vsyncadd [#allocation3], 4294967168  ;;  %vm51_vm0 = vcmask 261120   ;;  %v41_v0 = vld [vmem:[%s2177_s0 + $0x10] sm:$0xff]  ;;  %v39_v1 = vld [vmem:[%s2177_s0] sm:$0xff]  ;;  %v1716_v8 = vmov 32.0  }
   0x6   :  { %v58_v2 = vsel %vm51_vm0, %v41_v0, 0.0  ;;  %v52_v3 = vsel %vm51_vm0, %v39_v1, 0.0  ;;  %v42_v4 = vld [vmem:[%s2177_s0 + $0x18] sm:$0xff]  ;;  %v40_v5 = vld [vmem:[%s2177_s0 + $0x8] sm:$0xff]  ;;  %1569 = vrcp.f32 %v1716_v8  ;;  %v1445_v39 = vld [vmem:[%s2179_s2] sm:$0xff]  ;;  %s1718_s13 = smov 120  }
   0x7   :  { %59 = vadd.xlane.f32.xlu1 %v58_v2  ;;  %53 = vadd.xlane.f32.xlu0 %v52_v3  ;;  %v61_v6 = vsel %vm51_vm0, %v42_v4, 0.0  ;;  %v55_v7 = vsel %vm51_vm0, %v40_v5, 0.0  ;;  %v1446_v35 = vld [vmem:[%s2179_s2 + $0x8] sm:$0xff]  ;;  %s1717_s2 = smov 112   ;;  %s1719_s14 = smov 104   ;;  %vm329_vm14 = vcmask 64512  }
   0x8   :  { %188 = vmatpush.bf16.msra.mxu1 %v1446_v35  ;;  %s1720_s15 = smov 96   ;;  %s1721_s16 = smov 64   ;;  %vm574_vm15 = vcmask 130048  }
   0x9   :  { %s1722_s17 = smov 8   ;;  %s1723_s18 = smov 16  }
   0xa   :  { %s1724_s19 = smov 24   ;;  %s1354_s26 = sshll.u32 %s2183_s6, 4  ;;  %s1355_s26 = int_to_ptr.hbm [resolvable:$true] %s1354_s26 }
   0xb   :  { %s1726_s27 = smov 128  }
   0xc   :  { %v1570_v9 = vpop.eup %1569  ;;  %189 = vmatpush.bf16.msra.mxu1 %v1445_v39 }
   0xd   :  { %v65_v10 = vmul.f32 32.0, %v1570_v9  ;;  %vm69_vm1 = vweird.f32 %v1570_v9 }
   0xf   :  { %62 = vadd.xlane.f32.xlu1 %v61_v6  ;;  %56 = vadd.xlane.f32.xlu0 %v55_v7  ;;  %v66_v11 = vsub.f32 1.0, %v65_v10 }
  0x11   :  { %v67_v12 = vmul.f32 %v1570_v9, %v66_v11 }
  0x13   :  { %v68_v13 = vadd.f32 %v1570_v9, %v67_v12  ;;  %v1562_v12 = vld [vmem:[#allocation2 + $0x1] ss:$0 sm:$0xff] }
  0x15   :  { %v1781_v14 = vsel %vm69_vm1, %v1570_v9, %v68_v13  ;;  %vm1023_vm1 = vcmask 195584  }
  0x7a   :  { %v60_v15 = vpop.xlane.xlu1 %59  ;;  %v54_v16 = vpop.xlane.xlu0 %53 }
  0x7b   :  { %v73_v17 = vmul.f32 %v1781_v14, %v60_v15  ;;  %v71_v18 = vmul.f32 %v1781_v14, %v54_v16 }
  0x7d   :  { %v1785_v19 = vsub.f32 %v41_v0, %v73_v17  ;;  %v75_v20 = vsub.f32 %v39_v1, %v71_v18 }
  0x7f   :  { %v81_v21 = vmul.f32 %v1785_v19, %v1785_v19  ;;  %v79_v22 = vmul.f32 %v75_v20, %v75_v20 }
  0x81   :  { %v89_v23 = vsel %vm51_vm0, %v81_v21, 0.0  ;;  %v83_v24 = vsel %vm51_vm0, %v79_v22, 0.0 }
  0x82   :  { %v63_v25 = vpop.xlane.xlu1 %62  ;;  %90 = vadd.xlane.f32.xlu0 %v89_v23  ;;  %84 = vadd.xlane.f32.xlu2 %v83_v24  ;;  %v57_v26 = vpop.xlane.xlu0 %56 }
  0x83   :  { %v74_v27 = vmul.f32 %v1781_v14, %v63_v25  ;;  %v72_v28 = vmul.f32 %v1781_v14, %v57_v26 }
  0x85   :  { %v1793_v29 = vsub.f32 %v42_v4, %v74_v27  ;;  %v76_v30 = vsub.f32 %v40_v5, %v72_v28  ;;  %v1561_v5 = vld [vmem:[#allocation2] ss:$0 sm:$0xff] }
  0x87   :  { %v82_v31 = vmul.f32 %v1793_v29, %v1793_v29  ;;  %v80_v32 = vmul.f32 %v76_v30, %v76_v30 }
  0x89   :  { %v92_v33 = vsel %vm51_vm0, %v82_v31, 0.0  ;;  %v86_v34 = vsel %vm51_vm0, %v80_v32, 0.0  ;;  %v1563_v32 = vld [vmem:[#allocation2 + $0x6] ss:$0 sm:$0xff] }
  0x8a   :  { %93 = vadd.xlane.f32.xlu1 %v92_v33  ;;  %87 = vadd.xlane.f32.xlu2 %v86_v34 }
  0xf5   :  { %v85_v36 = vpop.xlane.xlu2 %84  ;;  %v91_v38 = vpop.xlane.xlu0 %90 }
  0xf6   :  { %v95_v37 = vmul.f32 %v85_v36, %v1781_v14  ;;  %v97_v41 = vmul.f32 %v91_v38, %v1781_v14 }
  0xf8   :  { %v99_v40 = vadd.f32 1e-05, %v95_v37  ;;  %v101_v42 = vadd.f32 1e-05, %v97_v41 }
  0xfa   :  { %1571 = vrsqrt.f32 %v99_v40  ;;  %vm109_vm3 = vweird.f32 %v99_v40  ;;  %vm129_vm10 = vweird.f32 %v101_v42 }
  0xfb   :  { %1573 = vrsqrt.f32 %v101_v42 }
  0xfd   :  { %v94_v43 = vpop.xlane.xlu1 %93  ;;  %v88_v44 = vpop.xlane.xlu2 %87 }
  0xfe   :  { %v98_v45 = vmul.f32 %v94_v43, %v1781_v14  ;;  %v96_v46 = vmul.f32 %v88_v44, %v1781_v14 }
 0x100   :  { %v1572_v47 = vpop.eup %1571  ;;  %v102_v48 = vadd.f32 1e-05, %v98_v45  ;;  %v100_v49 = vadd.f32 1e-05, %v96_v46 }
 0x101   :  { %v104_v50 = vmul.f32 %v1572_v47, %v99_v40  ;;  %v1574_v53 = vpop.eup %1573  ;;  %vm110_vm2 = vweird.f32 %v1572_v47 }
 0x102   :  { %1575 = vrsqrt.f32 %v102_v48  ;;  %v124_v59 = vmul.f32 %v1574_v53, %v101_v42  ;;  %vm111_vm4 = vmor %vm109_vm3, %vm110_vm2  ;;  %vm119_vm6 = vweird.f32 %v100_v49  ;;  %vm139_vm8 = vweird.f32 %v102_v48 }
 0x103   :  { %v105_v51 = vmul.f32 %v1572_v47, %v104_v50  ;;  %1577 = vrsqrt.f32 %v100_v49  ;;  %vm130_vm11 = vweird.f32 %v1574_v53 }
 0x104   :  { %v125_v0 = vmul.f32 %v1574_v53, %v124_v59  ;;  %vm131_vm13 = vmor %vm129_vm10, %vm130_vm11 }
 0x105   :  { %v106_v52 = vmul.f32 0.5, %v105_v51 }
 0x106   :  { %v126_v6 = vmul.f32 0.5, %v125_v0 }
 0x107   :  { %v107_v54 = vsub.f32 1.5, %v106_v52 }
 0x108   :  { %v1576_v55 = vpop.eup %1575  ;;  %v127_v13 = vsub.f32 1.5, %v126_v6 }
 0x109   :  { %v1578_v56 = vpop.eup %1577  ;;  %v134_v57 = vmul.f32 %v1576_v55, %v102_v48  ;;  %v108_v58 = vmul.f32 %v1572_v47, %v107_v54  ;;  %vm140_vm9 = vweird.f32 %v1576_v55 }
 0x10a   :  { %v114_v60 = vmul.f32 %v1578_v56, %v100_v49  ;;  %vm120_vm5 = vweird.f32 %v1578_v56  ;;  %vm141_vm12 = vmor %vm139_vm8, %vm140_vm9 }
 0x10b   :  { %v135_v61 = vmul.f32 %v1576_v55, %v134_v57  ;;  %v112_v63 = vsel %vm111_vm4, %v1572_v47, %v108_v58  ;;  %vm121_vm7 = vmor %vm119_vm6, %vm120_vm5 }
 0x10c   :  { %v115_v62 = vmul.f32 %v1578_v56, %v114_v60  ;;  %v143_v4 = vmul.f32 %v112_v63, %v75_v20  ;;  %v128_v20 = vmul.f32 %v1574_v53, %v127_v13 }
 0x10d   :  { %v136_v2 = vmul.f32 0.5, %v135_v61 }
 0x10e   :  { %v116_v1 = vmul.f32 0.5, %v115_v62  ;;  %v148_v11 = vmul.f32 %v1561_v5, %v143_v4  ;;  %v132_v23 = vsel %vm131_vm13, %v1574_v53, %v128_v20 }
 0x10f   :  { %v137_v8 = vsub.f32 1.5, %v136_v2  ;;  %v145_v25 = vmul.f32 %v132_v23, %v1785_v19 }
 0x110   :  { %v117_v3 = vsub.f32 1.5, %v116_v1  ;;  %v153_v17 = vadd.f32 %v1562_v12, %v148_v11 }
 0x111   :  { %v138_v16 = vmul.f32 %v1576_v55, %v137_v8  ;;  %v150_v27 = vmul.f32 %v1561_v5, %v145_v25 }
 0x112   :  { %v118_v7 = vmul.f32 %v1578_v56, %v117_v3 }
 0x113   :  { %v142_v22 = vsel %vm141_vm12, %v1576_v55, %v138_v16 }
 0x114   :  { %v122_v9 = vsel %vm121_vm7, %v1578_v56, %v118_v7  ;;  %v146_v24 = vmul.f32 %v142_v22, %v1793_v29 }
 0x115   :  { %v144_v10 = vmul.f32 %v122_v9, %v76_v30  ;;  %v155_v30 = vadd.f32 %v1562_v12, %v150_v27 }
 0x116   :  { %v151_v26 = vmul.f32 %v1561_v5, %v146_v24 }
 0x117   :  { %v149_v15 = vmul.f32 %v1561_v5, %v144_v10 }
 0x118   :  { %v156_v28 = vadd.f32 %v1562_v12, %v151_v26 }
 0x119   :  { %v154_v18 = vadd.f32 %v1562_v12, %v149_v15 }
 0x11a   :  { %v158_v31 = vpack.c.bf16 %v156_v28, %v155_v30 }
 0x11b   :  { %v157_v21 = vpack.c.bf16 %v154_v18, %v153_v17 }
 0x11d   :  { %1375 = vmatmul.msk.bf16.vlgmr.msra.gmra.mxu1 %vm51_vm0, %v157_v21 }
 0x12d   :  { %1376 = vmatmul.msk.bf16.gmra.mxu1 %vm51_vm0, %v158_v31 }
 0x19a   :  { %v191_v33 = vpop.f32.mrf.mxu1 }
 0x19b   :  { %v192_v34 = vadd.f32 %v1563_v32, %v191_v33 }
 0x19d   :  { %v201_v36 = vmul.f32 0.35355338, %v192_v34  ;;  %v301_v54 = vpack.c.bf16 %v192_v34, %v192_v34 }
 0x19f   :  { %v245_v40 = vpack.c.bf16 %v201_v36, %v201_v36  ;;  %v324_v62 = vunpack.c.l.b16 %v301_v54 }
 0x1a1   :  { %v1817_v42 = vunpack.c.l.b16 %v245_v40 }
 0x1a2   :  { %v193_v35 = vpop.f32.mrf.mxu1 }
 0x1a3   :  { %v194_v37 = vadd.f32 %v1563_v32, %v193_v35 }
 0x1a5   :  { %v1476_v38 = vpack.i.bf16 %v194_v37, %v192_v34  ;;  %v202_v39 = vmul.f32 0.35355338, %v194_v37  ;;  %v302_v50 = vpack.c.bf16 %v194_v37, %v194_v37 }
 0x1a7   :  { %1477 = vrot.lane.b32.xlu0 %v1476_v38, %s1717_s2  ;;  %1472 = vrot.lane.b32.xlu2 %v1476_v38, %s1718_s13  ;;  %v1815_v19 = vpack.i.bf16 %v202_v39, %v201_v36  ;;  %v246_v29 = vpack.c.bf16 %v202_v39, %v202_v39  ;;  %v325_v58 = vunpack.c.l.b16 %v302_v50 }
 0x1a9   :  { %v1819_v43 = vunpack.c.l.b16 %v246_v29  ;;  %v1835_v1 = vpack.c.b16 %v325_v58, %v324_v62 }
 0x1aa   :  { %v196_v41 = vpop.f32.mrf.mxu1 }
 0x1ab   :  { %v321_v44 = vpack.c.b16 %v1819_v43, %v1817_v42  ;;  %v197_v45 = vadd.f32 %v1563_v32, %v196_v41 }
 0x1ad   :  { %v203_v47 = vmul.f32 0.35355338, %v197_v45  ;;  %v303_v55 = vpack.c.bf16 %v197_v45, %v197_v45 }
 0x1af   :  { %1487 = vrot.lane.b32.xlu2 %v1476_v38, %s1719_s14  ;;  %v247_v53 = vpack.c.bf16 %v203_v47, %v203_v47  ;;  %v357_v63 = vunpack.c.l.b16 %v303_v55 }
 0x1b1   :  { %v1829_v60 = vunpack.c.l.b16 %v247_v53 }
 0x1b2   :  { %v198_v46 = vpop.f32.mrf.mxu1 }
 0x1b3   :  { %v199_v48 = vadd.f32 %v1563_v32, %v198_v46 }
 0x1b5   :  { %v1496_v49 = vpack.i.bf16 %v199_v48, %v197_v45  ;;  %v304_v51 = vpack.c.bf16 %v199_v48, %v199_v48  ;;  %v204_v52 = vmul.f32 0.35355338, %v199_v48 }
 0x1b7   :  { %1497 = vrot.lane.b32.xlu2 %v1496_v49, %s1719_s14  ;;  %1492 = vrot.lane.b32.xlu0 %v1496_v49, %s1717_s2  ;;  %v1827_v56 = vpack.i.bf16 %v204_v52, %v203_v47  ;;  %v248_v57 = vpack.c.bf16 %v204_v52, %v204_v52  ;;  %v358_v59 = vunpack.c.l.b16 %v304_v51 }
 0x1b8   :  { %1482 = vrot.lane.b32.xlu1 %v1496_v49, %s1718_s13 }
 0x1b9   :  { %v1831_v61 = vunpack.c.l.b16 %v248_v57  ;;  %v359_v2 = vpack.c.b16 %v358_v59, %v357_v63 }
 0x1bb   :  { %v354_v0 = vpack.c.b16 %v1831_v61, %v1829_v60 }
 0x1bf   :  { %327 = vrot.lane.b32.xlu0 %v1835_v1, %s1720_s15 }
 0x1c0   :  { %360 = vrot.lane.b32.xlu1 %v359_v2, %s1720_s15 }
 0x1c8   :  { %1502 = vrot.lane.b32.xlu1 %v1815_v19, %s1718_s13 }
 0x201   :  { %v1473_v3 = vpop.permute.xlu2 %1472 }
 0x202   :  { %v1475_v4 = vunpack.i.h.bf16 %v1473_v3  ;;  %v1474_v5 = vunpack.i.l.bf16 %v1473_v3 }
 0x204   :  { %v306_v6 = vpack.c.bf16 %v1475_v4, %v1475_v4  ;;  %v305_v7 = vpack.c.bf16 %v1474_v5, %v1474_v5 }
 0x206   :  { %v390_v8 = vunpack.c.l.b16 %v306_v6  ;;  %v389_v9 = vunpack.c.l.b16 %v305_v7 }
 0x208   :  { %v391_v10 = vpack.c.b16 %v390_v8, %v389_v9 }
 0x209   :  { %v1488_v11 = vpop.permute.xlu2 %1487 }
 0x20a   :  { %392 = vrot.lane.b32.xlu2 %v391_v10, %s1720_s15  ;;  %v1490_v16 = vunpack.i.h.bf16 %v1488_v11  ;;  %v1489_v17 = vunpack.i.l.bf16 %v1488_v11 }
 0x20c   :  { %v314_v23 = vpack.c.bf16 %v1490_v16, %v1490_v16  ;;  %v313_v24 = vpack.c.bf16 %v1489_v17, %v1489_v17 }
 0x20e   :  { %v518_v26 = vunpack.c.l.b16 %v314_v23  ;;  %v517_v27 = vunpack.c.l.b16 %v313_v24 }
 0x210   :  { %v1850_v28 = vpack.c.b16 %v518_v26, %v517_v27 }
 0x211   :  { %v1498_v49 = vpop.permute.xlu2 %1497 }
 0x212   :  { %1507 = vrot.lane.b32.xlu2 %v1815_v19, %s1717_s2  ;;  %v1500_v53 = vunpack.i.h.bf16 %v1498_v49  ;;  %v1499_v54 = vunpack.i.l.bf16 %v1498_v49 }
 0x214   :  { %v316_v55 = vpack.c.bf16 %v1500_v53, %v1500_v53  ;;  %v315_v57 = vpack.c.bf16 %v1499_v54, %v1499_v54 }
 0x216   :  { %v550_v58 = vunpack.c.l.b16 %v316_v55  ;;  %v549_v59 = vunpack.c.l.b16 %v315_v57 }
 0x218   :  { %v1878_v62 = vpack.c.b16 %v550_v58, %v549_v59 }
 0x219   :  { %v1478_v12 = vpop.permute.xlu0 %1477 }
 0x21a   :  { %v1480_v13 = vunpack.i.h.bf16 %v1478_v12  ;;  %v1479_v15 = vunpack.i.l.bf16 %v1478_v12  ;;  %1512 = vrot.lane.b32.xlu2 %v1827_v56, %s1718_s13 }
 0x21c   :  { %v310_v18 = vpack.c.bf16 %v1480_v13, %v1480_v13  ;;  %v309_v20 = vpack.c.bf16 %v1479_v15, %v1479_v15 }
 0x21e   :  { %v454_v21 = vunpack.c.l.b16 %v310_v18  ;;  %v453_v22 = vunpack.c.l.b16 %v309_v20 }
 0x220   :  { %v455_v25 = vpack.c.b16 %v454_v21, %v453_v22 }
 0x222   :  { %1522 = vrot.lane.b32.xlu2 %v1827_v56, %s1717_s2  ;;  %456 = vrot.lane.b32.xlu0 %v455_v25, %s1720_s15 }
 0x229   :  { %v1493_v30 = vpop.permute.xlu0 %1492 }
 0x22a   :  { %v1483_v31 = vpop.permute.xlu1 %1482  ;;  %v1495_v32 = vunpack.i.h.bf16 %v1493_v30  ;;  %v1494_v33 = vunpack.i.l.bf16 %v1493_v30  ;;  %822 = vrot.lane.b32.xlu2 %v391_v10, %s1721_s16  ;;  %520 = vrot.lane.b32.xlu0 %v1850_v28, %s1720_s15 }
 0x22b   :  { %v1485_v34 = vunpack.i.h.bf16 %v1483_v31  ;;  %v1484_v35 = vunpack.i.l.bf16 %v1483_v31 }
 0x22c   :  { %v312_v36 = vpack.c.bf16 %v1495_v32, %v1495_v32  ;;  %v311_v37 = vpack.c.bf16 %v1494_v33, %v1494_v33 }
 0x22d   :  { %v308_v38 = vpack.c.bf16 %v1485_v34, %v1485_v34  ;;  %v307_v39 = vpack.c.bf16 %v1484_v35, %v1484_v35 }
 0x22e   :  { %v486_v40 = vunpack.c.l.b16 %v312_v36  ;;  %v485_v29 = vunpack.c.l.b16 %v311_v37 }
 0x22f   :  { %v422_v41 = vunpack.c.l.b16 %v308_v38  ;;  %v421_v45 = vunpack.c.l.b16 %v307_v39 }
 0x230   :  { %v1855_v46 = vpack.c.b16 %v486_v40, %v485_v29 }
 0x231   :  { %v328_v47 = vpop.permute.xlu0 %327  ;;  %v1857_v48 = vpack.c.b16 %v422_v41, %v421_v45 }
 0x232   :  { %v361_v50 = vpop.permute.xlu1 %360  ;;  %797 = vrot.lane.b32.xlu2 %v359_v2, %s1721_s16  ;;  %488 = vrot.lane.b32.xlu0 %v1855_v46, %s1720_s15  ;;  %v334_v51 = vsel %vm329_vm14, %v328_v47, 0 }
 0x233   :  { %424 = vrot.lane.b32.xlu1 %v1857_v48, %s1720_s15  ;;  %343 = vmatpush.bf16.xpose.msrb.mxu1 %v334_v51  ;;  %v366_v52 = vsel %vm329_vm14, %v361_v50, 0 }
 0x234   :  { %375 = vmatpush.bf16.xpose.msra.mxu2 %v366_v52 }
 0x23a   :  { %1377 = vmatmul.msk.bf16.vlgmr.msrb.gmra.mxu1 %vm329_vm14, %v321_v44  ;;  %1527 = vrot.lane.b32.xlu0 %v1827_v56, %s1719_s14  ;;  %v1503_v42 = vpop.permute.xlu1 %1502 }
 0x23b   :  { %1517 = vrot.lane.b32.xlu1 %v1815_v19, %s1719_s14  ;;  %1378 = vmatmul.msk.bf16.vlgmr.msra.gmra.mxu2 %vm329_vm14, %v354_v0  ;;  %v1505_v43 = vunpack.i.h.bf16 %v1503_v42  ;;  %v1504_v19 = vunpack.i.l.bf16 %v1503_v42 }
 0x23d   :  { %v250_v44 = vpack.c.bf16 %v1505_v43, %v1505_v43  ;;  %v249_v56 = vpack.c.bf16 %v1504_v19, %v1504_v19 }
 0x23f   :  { %v385_v63 = vunpack.c.l.b16 %v250_v44  ;;  %v384_v0 = vunpack.c.l.b16 %v249_v56 }
 0x241   :  { %v386_v2 = vpack.c.b16 %v385_v63, %v384_v0 }
 0x242   :  { %772 = vrot.lane.b32.xlu0 %v1835_v1, %s1721_s16 }
 0x243   :  { %552 = vrot.lane.b32.xlu1 %v1878_v62, %s1720_s15 }
 0x24b   :  { %872 = vrot.lane.b32.xlu1 %v455_v25, %s1721_s16 }
 0x264   :  { %v393_v60 = vpop.permute.xlu2 %392 }
 0x265   :  { %v398_v61 = vsel %vm329_vm14, %v393_v60, 0 }
 0x266   :  { %407 = vmatpush.bf16.xpose.msra.mxu3 %v398_v61 }
 0x26c   :  { %v1508_v1 = vpop.permute.xlu2 %1507 }
 0x26d   :  { %1379 = vmatmul.msk.bf16.vlgmr.msra.gmra.mxu3 %vm329_vm14, %v386_v2  ;;  %v1510_v4 = vunpack.i.h.bf16 %v1508_v1  ;;  %v1509_v5 = vunpack.i.l.bf16 %v1508_v1 }
 0x26f   :  { %v254_v7 = vpack.c.bf16 %v1510_v4, %v1510_v4  ;;  %v253_v8 = vpack.c.bf16 %v1509_v5, %v1509_v5 }
 0x271   :  { %v449_v11 = vunpack.c.l.b16 %v254_v7  ;;  %v448_v12 = vunpack.c.l.b16 %v253_v8 }
 0x273   :  { %v450_v13 = vpack.c.b16 %v449_v11, %v448_v12 }
 0x274   :  { %v1513_v3 = vpop.permute.xlu2 %1512 }
 0x275   :  { %v1515_v21 = vunpack.i.h.bf16 %v1513_v3  ;;  %v1514_v22 = vunpack.i.l.bf16 %v1513_v3 }
 0x277   :  { %v252_v25 = vpack.c.bf16 %v1515_v21, %v1515_v21  ;;  %v251_v26 = vpack.c.bf16 %v1514_v22, %v1514_v22 }
 0x279   :  { %v417_v36 = vunpack.c.l.b16 %v252_v25  ;;  %v416_v37 = vunpack.c.l.b16 %v251_v26 }
 0x27b   :  { %v418_v39 = vpack.c.b16 %v417_v36, %v416_v37 }
 0x27c   :  { %v1523_v6 = vpop.permute.xlu2 %1522 }
 0x27d   :  { %v1525_v18 = vunpack.i.h.bf16 %v1523_v6  ;;  %v1524_v20 = vunpack.i.l.bf16 %v1523_v6 }
 0x27f   :  { %v256_v23 = vpack.c.bf16 %v1525_v18, %v1525_v18  ;;  %v255_v24 = vpack.c.bf16 %v1524_v20, %v1524_v20 }
 0x281   :  { %v481_v34 = vunpack.c.l.b16 %v256_v23  ;;  %v480_v35 = vunpack.c.l.b16 %v255_v24 }
 0x283   :  { %v482_v38 = vpack.c.b16 %v481_v34, %v480_v35 }
 0x284   :  { %v823_v15 = vpop.permute.xlu2 %822 }
 0x28c   :  { %v798_v32 = vpop.permute.xlu2 %797 }
 0x294   :  { %v457_v9 = vpop.permute.xlu0 %456 }
 0x295   :  { %v462_v10 = vsel %vm329_vm14, %v457_v9, 0 }
 0x296   :  { %471 = vmatpush.bf16.xpose.msrb.mxu2 %v462_v10 }
 0x29c   :  { %v521_v16 = vpop.permute.xlu0 %520 }
 0x29d   :  { %1381 = vmatmul.msk.bf16.vlgmr.msrb.gmra.mxu2 %vm329_vm14, %v450_v13  ;;  %v526_v17 = vsel %vm329_vm14, %v521_v16, 0 }
 0x29e   :  { %535 = vmatpush.bf16.xpose.msra.mxu0 %v526_v17 }
 0x2a4   :  { %v489_v27 = vpop.permute.xlu0 %488 }
 0x2a5   :  { %v425_v30 = vpop.permute.xlu1 %424  ;;  %v494_v31 = vsel %vm329_vm14, %v489_v27, 0 }
 0x2a6   :  { %835 = vmatpush.bf16.msrb.mxu0 %v823_v15  ;;  %v430_v33 = vsel %vm329_vm14, %v425_v30, 0  ;;  %503 = vmatpush.bf16.xpose.msrb.mxu3 %v494_v31 }
 0x2a7   :  { %439 = vmatpush.bf16.xpose.msra.mxu1 %v430_v33 }
 0x2ac   :  { %v1528_v40 = vpop.permute.xlu0 %1527 }
 0x2ad   :  { %v1518_v29 = vpop.permute.xlu1 %1517  ;;  %1382 = vmatmul.msk.bf16.vlgmr.msrb.gmra.mxu3 %vm329_vm14, %v482_v38  ;;  %v1530_v50 = vunpack.i.h.bf16 %v1528_v40  ;;  %v1529_v51 = vunpack.i.l.bf16 %v1528_v40 }
 0x2ae   :  { %810 = vmatpush.bf16.msra.mxu3 %v798_v32  ;;  %v1520_v41 = vunpack.i.h.bf16 %v1518_v29  ;;  %v1519_v45 = vunpack.i.l.bf16 %v1518_v29  ;;  %1380 = vmatmul.msk.bf16.vlgmr.msra.gmra.mxu1 %vm329_vm14, %v418_v39 }
 0x2af   :  { %v260_v54 = vpack.c.bf16 %v1530_v50, %v1530_v50  ;;  %v259_v55 = vpack.c.bf16 %v1529_v51, %v1529_v51 }
 0x2b0   :  { %v258_v47 = vpack.c.bf16 %v1520_v41, %v1520_v41  ;;  %v257_v49 = vpack.c.bf16 %v1519_v45, %v1519_v45 }
 0x2b1   :  { %v545_v19 = vunpack.c.l.b16 %v260_v54  ;;  %v544_v44 = vunpack.c.l.b16 %v259_v55 }
 0x2b2   :  { %v513_v52 = vunpack.c.l.b16 %v258_v47  ;;  %v512_v53 = vunpack.c.l.b16 %v257_v49 }
 0x2b3   :  { %v546_v60 = vpack.c.b16 %v545_v19, %v544_v44 }
 0x2b4   :  { %v773_v57 = vpop.permute.xlu0 %772  ;;  %v514_v58 = vpack.c.b16 %v513_v52, %v512_v53 }
 0x2b5   :  { %v553_v59 = vpop.permute.xlu1 %552  ;;  %785 = vmatpush.bf16.msra.mxu2 %v773_v57 }
 0x2b6   :  { %v558_v42 = vsel %vm329_vm14, %v553_v59, 0  ;;  %1383 = vmatmul.msk.bf16.vlgmr.msra.gmra.mxu0 %vm329_vm14, %v514_v58 }
 0x2b7   :  { %567 = vmatpush.bf16.xpose.msrb.mxu1 %v558_v42  ;;  %v345_v43 = vpop.f32.mrf.mxu1 }
 0x2b8   :  { %v575_v56 = vsel %vm574_vm15, %v345_v43, -inf }
 0x2b9   :  { %576 = vmax.xlane.f32.xlu2 %v575_v56 }
 0x2bd   :  { %v873_v61 = vpop.permute.xlu1 %872 }
 0x2be   :  { %v377_v63 = vpop.f32.mrf.mxu2  ;;  %1384 = vmatmul.msk.bf16.vlgmr.msrb.gmra.mxu1 %vm329_vm14, %v546_v60  ;;  %885 = vmatpush.bf16.msrb.mxu2 %v873_v61 }
 0x2bf   :  { %v347_v0 = vpop.f32.mrf.mxu1  ;;  %v581_v4 = vsel %vm574_vm15, %v377_v63, -inf }
 0x2c0   :  { %v578_v2 = vsel %vm574_vm15, %v347_v0, -inf }
 0x2c1   :  { %579 = vmax.xlane.f32.xlu1 %v578_v2 }
 0x2c6   :  { %v379_v1 = vpop.f32.mrf.mxu2 }
 0x2c7   :  { %v584_v3 = vsel %vm574_vm15, %v379_v1, -inf }
 0x2c8   :  { %585 = vmax.xlane.f32.xlu0 %v584_v3 }
 0x2c9   :  { %582 = vmax.xlane.f32.xlu1 %v581_v4 }
 0x2f0   :  { %v1901_v5 = vpop.f32.mrf.mxu3 }
 0x2f1   :  { %v587_v6 = vsel %vm574_vm15, %v1901_v5, -inf }
 0x2f2   :  { %588 = vmax.xlane.f32.xlu0 %v587_v6 }
 0x2f8   :  { %v1909_v9 = vpop.f32.mrf.mxu3 }
 0x2f9   :  { %v590_v10 = vsel %vm574_vm15, %v1909_v9, -inf }
 0x320   :  { %v1905_v7 = vpop.f32.mrf.mxu2 }
 0x321   :  { %v599_v8 = vsel %vm574_vm15, %v1905_v7, -inf }
 0x322   :  { %600 = vmax.xlane.f32.xlu2 %v599_v8 }
 0x328   :  { %v1935_v36 = vpop.f32.mrf.mxu2 }
 0x329   :  { %v602_v39 = vsel %vm574_vm15, %v1935_v36, -inf }
 0x32a   :  { %591 = vmax.xlane.f32.xlu2 %v590_v10 }
 0x32b   :  { %v1913_v11 = vpop.f32.mrf.mxu1 }
 0x32c   :  { %v577_v12 = vpop.xlane.xlu2 %576  ;;  %v593_v40 = vsel %vm574_vm15, %v1913_v11, -inf }
 0x32d   :  { %v623_v13 = vsub.f32 %v345_v43, %v577_v12 }
 0x32f   :  { %v639_v15 = vmul.f32 1.442695, %v623_v13 }
 0x330   :  { %v1915_v16 = vpop.f32.mrf.mxu3 }
 0x331   :  { %v605_v17 = vsel %vm574_vm15, %v1915_v16, -inf  ;;  %1579 = vpow2.f32 %v639_v15 }
 0x332   :  { %606 = vmax.xlane.f32.xlu2 %v605_v17 }
 0x333   :  { %v1919_v18 = vpop.f32.mrf.mxu0  ;;  %v1923_v22 = vpop.f32.mrf.mxu1 }
 0x334   :  { %v580_v20 = vpop.xlane.xlu1 %579  ;;  %v611_v21 = vsel %vm574_vm15, %v1919_v18, -inf  ;;  %v596_v24 = vsel %vm574_vm15, %v1923_v22, -inf }
 0x335   :  { %612 = vmax.xlane.f32.xlu1 %v611_v21  ;;  %v624_v25 = vsub.f32 %v347_v0, %v580_v20 }
 0x337   :  { %v1925_v23 = vpop.eup %1579  ;;  %v641_v33 = vmul.f32 1.442695, %v624_v25 }
 0x338   :  { %v671_v30 = vsel %vm574_vm15, %v1925_v23, 0.0  ;;  %v1949_v49 = vpop.f32.mrf.mxu3 }
 0x339   :  { %v608_v51 = vsel %vm574_vm15, %v1949_v49, -inf }
 0x33a   :  { %597 = vmax.xlane.f32.xlu2 %v596_v24 }
 0x33b   :  { %v1929_v26 = vpop.f32.mrf.mxu0  ;;  %v586_v35 = vpop.xlane.xlu0 %585 }
 0x33c   :  { %v583_v27 = vpop.xlane.xlu1 %582  ;;  %v614_v31 = vsel %vm574_vm15, %v1929_v26, -inf  ;;  %v626_v37 = vsub.f32 %v379_v1, %v586_v35  ;;  %v1937_v38 = vpop.f32.mrf.mxu1 }
 0x33d   :  { %v625_v32 = vsub.f32 %v377_v63, %v583_v27  ;;  %672 = vadd.xlane.f32.xlu1 %v671_v30  ;;  %615 = vmax.xlane.f32.xlu0 %v614_v31  ;;  %v617_v57 = vsel %vm574_vm15, %v1937_v38, -inf }
 0x33e   :  { %v645_v41 = vmul.f32 1.442695, %v626_v37 }
 0x33f   :  { %v643_v34 = vmul.f32 1.442695, %v625_v32 }
 0x341   :  { %1581 = vpow2.f32 %v643_v34 }
 0x342   :  { %1583 = vpow2.f32 %v641_v33 }
 0x343   :  { %1585 = vpow2.f32 %v645_v41 }
 0x344   :  { %v1955_v52 = vpop.f32.mrf.mxu1 }
 0x345   :  { %603 = vmax.xlane.f32.xlu1 %v602_v39  ;;  %594 = vmax.xlane.f32.xlu0 %v593_v40  ;;  %v620_v53 = vsel %vm574_vm15, %v1955_v52, -inf }
 0x347   :  { %v1943_v29 = vpop.eup %1581 }
 0x348   :  { %v677_v45 = vsel %vm574_vm15, %v1943_v29, 0.0  ;;  %v1947_v47 = vpop.eup %1583 }
 0x349   :  { %678 = vadd.xlane.f32.xlu2 %v677_v45  ;;  %v674_v50 = vsel %vm574_vm15, %v1947_v47, 0.0  ;;  %v1959_v54 = vpop.eup %1585 }
 0x34a   :  { %v680_v55 = vsel %vm574_vm15, %v1959_v54, 0.0 }
 0x34d   :  { %675 = vadd.xlane.f32.xlu0 %v674_v50  ;;  %609 = vmax.xlane.f32.xlu1 %v608_v51 }
 0x351   :  { %621 = vmax.xlane.f32.xlu2 %v620_v53 }
 0x355   :  { %681 = vadd.xlane.f32.xlu1 %v680_v55  ;;  %618 = vmax.xlane.f32.xlu0 %v617_v57 }
 0x365   :  { %v589_v58 = vpop.xlane.xlu0 %588 }
 0x366   :  { %v627_v59 = vsub.f32 %v1901_v5, %v589_v58 }
 0x368   :  { %v647_v42 = vmul.f32 1.442695, %v627_v59 }
 0x369   :  { %847 = vrot.lane.b32.xlu0 %v1857_v48, %s1721_s16 }
 0x36a   :  { %1587 = vpow2.f32 %v647_v42 }
 0x370   :  { %v1968_v43 = vpop.eup %1587 }
 0x371   :  { %v683_v19 = vsel %vm574_vm15, %v1968_v43, 0.0 }
 0x372   :  { %684 = vadd.xlane.f32.xlu2 %v683_v19 }
 0x395   :  { %v601_v44 = vpop.xlane.xlu2 %600 }
 0x396   :  { %v631_v56 = vsub.f32 %v1905_v7, %v601_v44 }
 0x398   :  { %v655_v60 = vmul.f32 1.442695, %v631_v56 }
 0x39a   :  { %1589 = vpow2.f32 %v655_v60 }
 0x39d   :  { %v592_v61 = vpop.xlane.xlu2 %591 }
 0x39e   :  { %v628_v15 = vsub.f32 %v1909_v9, %v592_v61 }
 0x3a0   :  { %v1973_v63 = vpop.eup %1589  ;;  %v649_v20 = vmul.f32 1.442695, %v628_v15 }
 0x3a1   :  { %v695_v0 = vsel %vm574_vm15, %v1973_v63, 0.0 }
 0x3a2   :  { %696 = vadd.xlane.f32.xlu2 %v695_v0 }
 0x3a5   :  { %v607_v48 = vpop.xlane.xlu2 %606 }
 0x3a6   :  { %v633_v2 = vsub.f32 %v1915_v16, %v607_v48 }
 0x3a8   :  { %v659_v1 = vmul.f32 1.442695, %v633_v2  ;;  %v613_v3 = vpop.xlane.xlu1 %612 }
 0x3a9   :  { %v635_v4 = vsub.f32 %v1919_v18, %v613_v3 }
 0x3aa   :  { %1591 = vpow2.f32 %v659_v1 }
 0x3ab   :  { %v663_v5 = vmul.f32 1.442695, %v635_v4 }
 0x3ad   :  { %1593 = vpow2.f32 %v663_v5  ;;  %v598_v17 = vpop.xlane.xlu2 %597 }
 0x3ae   :  { %v630_v39 = vsub.f32 %v1923_v22, %v598_v17 }
 0x3b0   :  { %v1979_v6 = vpop.eup %1591  ;;  %v673_v7 = vpop.xlane.xlu1 %672  ;;  %v653_v53 = vmul.f32 1.442695, %v630_v39 }
 0x3b1   :  { %v616_v8 = vpop.xlane.xlu0 %615  ;;  %v701_v12 = vsel %vm574_vm15, %v1979_v6, 0.0 }
 0x3b2   :  { %v636_v10 = vsub.f32 %v1929_v26, %v616_v8  ;;  %702 = vadd.xlane.f32.xlu2 %v701_v12 }
 0x3b3   :  { %v1984_v13 = vpop.eup %1593 }
 0x3b4   :  { %v665_v16 = vmul.f32 1.442695, %v636_v10  ;;  %v707_v18 = vsel %vm574_vm15, %v1984_v13, 0.0 }
 0x3b5   :  { %708 = vadd.xlane.f32.xlu1 %v707_v18 }
 0x3b6   :  { %1595 = vpow2.f32 %v665_v16 }
 0x3b7   :  { %1597 = vrcp.f32 %v673_v7 }
 0x3b8   :  { %v604_v21 = vpop.xlane.xlu1 %603  ;;  %1599 = vpow2.f32 %v649_v20 }
 0x3b9   :  { %v595_v24 = vpop.xlane.xlu0 %594  ;;  %v632_v27 = vsub.f32 %v1935_v36, %v604_v21 }
 0x3ba   :  { %v629_v25 = vsub.f32 %v1913_v11, %v595_v24 }
 0x3bb   :  { %v657_v32 = vmul.f32 1.442695, %v632_v27 }
 0x3bc   :  { %v1990_v26 = vpop.eup %1595  ;;  %v651_v30 = vmul.f32 1.442695, %v629_v25  ;;  %v679_v9 = vpop.xlane.xlu2 %678 }
 0x3bd   :  { %v710_v31 = vsel %vm574_vm15, %v1990_v26, 0.0  ;;  %v1598_v33 = vpop.eup %1597 }
 0x3be   :  { %711 = vadd.xlane.f32.xlu1 %v710_v31  ;;  %1601 = vpow2.f32 %v651_v30  ;;  %v1995_v37 = vpop.eup %1599  ;;  %v735_v36 = vmul.f32 %v1598_v33, %v1925_v23 }
 0x3bf   :  { %v686_v45 = vsel %vm574_vm15, %v1995_v37, 0.0 }
 0x3c0   :  { %v610_v34 = vpop.xlane.xlu1 %609  ;;  %v751_v23 = vpack.c.bf16 %v735_v36, %v735_v36 }
 0x3c1   :  { %v676_v35 = vpop.xlane.xlu0 %675  ;;  %v634_v11 = vsub.f32 %v1949_v49, %v610_v34 }
 0x3c2   :  { %1603 = vrcp.f32 %v676_v35 }
 0x3c3   :  { %1605 = vpow2.f32 %v657_v32  ;;  %v661_v40 = vmul.f32 1.442695, %v634_v11 }
 0x3c4   :  { %v2000_v41 = vpop.eup %1601  ;;  %1607 = vrcp.f32 %v679_v9  ;;  %v622_v50 = vpop.xlane.xlu2 %621 }
 0x3c5   :  { %1609 = vpow2.f32 %v661_v40  ;;  %v689_v51 = vsel %vm574_vm15, %v2000_v41, 0.0  ;;  %v638_v49 = vsub.f32 %v1955_v52, %v622_v50  ;;  %v769_v52 = vunpack.c.l.b16 %v751_v23 }
 0x3c6   :  { %687 = vadd.xlane.f32.xlu1 %v686_v45  ;;  %690 = vadd.xlane.f32.xlu0 %v689_v51 }
 0x3c7   :  { %v669_v57 = vmul.f32 1.442695, %v638_v49 }
 0x3c8   :  { %v1604_v22 = vpop.eup %1603  ;;  %v682_v58 = vpop.xlane.xlu1 %681 }
 0x3c9   :  { %v736_v55 = vmul.f32 %v1604_v22, %v1947_v47  ;;  %v2008_v59 = vpop.eup %1605  ;;  %1611 = vrcp.f32 %v682_v58  ;;  %v619_v5 = vpop.xlane.xlu0 %618 }
 0x3ca   :  { %v1608_v42 = vpop.eup %1607  ;;  %897 = vrot.lane.b32.xlu2 %v1855_v46, %s1721_s16  ;;  %1613 = vpow2.f32 %v653_v53  ;;  %v698_v60 = vsel %vm574_vm15, %v2008_v59, 0.0 }
 0x3cb   :  { %v752_v19 = vpack.c.bf16 %v736_v55, %v736_v55  ;;  %v2012_v44 = vpop.eup %1609  ;;  %1615 = vpow2.f32 %v669_v57  ;;  %v737_v61 = vmul.f32 %v1608_v42, %v1943_v29 }
 0x3cc   :  { %v704_v47 = vsel %vm574_vm15, %v2012_v44, 0.0 }
 0x3cd   :  { %v770_v56 = vunpack.c.l.b16 %v752_v19  ;;  %v753_v2 = vpack.c.bf16 %v737_v61, %v737_v61 }
 0x3ce   :  { %699 = vadd.xlane.f32.xlu1 %v698_v60  ;;  %705 = vadd.xlane.f32.xlu0 %v704_v47 }
 0x3cf   :  { %v771_v0 = vpack.c.b16 %v770_v56, %v769_v52  ;;  %v1612_v48 = vpop.eup %1611  ;;  %v794_v7 = vunpack.c.l.b16 %v753_v2 }
 0x3d0   :  { %v2020_v46 = vpop.eup %1613  ;;  %v738_v1 = vmul.f32 %v1612_v48, %v1959_v54 }
 0x3d1   :  { %1385 = vmatmul.msk.bf16.vlgmr.msra.gmra.mxu2 %vm574_vm15, %v771_v0  ;;  %v2023_v3 = vpop.eup %1615  ;;  %v692_v29 = vsel %vm574_vm15, %v2020_v46, 0.0 }
 0x3d2   :  { %947 = vrot.lane.b32.xlu2 %v1878_v62, %s1721_s16  ;;  %v754_v4 = vpack.c.bf16 %v738_v1, %v738_v1  ;;  %v716_v10 = vsel %vm574_vm15, %v2023_v3, 0.0  ;;  %v637_v62 = vsub.f32 %v1937_v38, %v619_v5 }
 0x3d4   :  { %v795_v8 = vunpack.c.l.b16 %v754_v4  ;;  %v667_v15 = vmul.f32 1.442695, %v637_v62 }
 0x3d6   :  { %693 = vadd.xlane.f32.xlu1 %v692_v29  ;;  %717 = vadd.xlane.f32.xlu0 %v716_v10  ;;  %v796_v12 = vpack.c.b16 %v795_v8, %v794_v7  ;;  %1617 = vpow2.f32 %v667_v15 }
 0x3d8   :  { %1386 = vmatmul.msk.bf16.vlgmr.msra.gmra.mxu3 %vm574_vm15, %v796_v12 }
 0x3db   :  { %v848_v54 = vpop.permute.xlu0 %847 }
 0x3dc   :  { %860 = vmatpush.bf16.msra.mxu1 %v848_v54  ;;  %v2035_v16 = vpop.eup %1617 }
 0x3dd   :  { %v713_v18 = vsel %vm574_vm15, %v2035_v16, 0.0 }
 0x3e5   :  { %v685_v17 = vpop.xlane.xlu2 %684 }
 0x3e6   :  { %1619 = vrcp.f32 %v685_v17 }
 0x3ec   :  { %v1620_v38 = vpop.eup %1619 }
 0x3ed   :  { %v739_v31 = vmul.f32 %v1620_v38, %v1968_v43 }
 0x3ef   :  { %922 = vrot.lane.b32.xlu1 %v1850_v28, %s1721_s16  ;;  %v755_v33 = vpack.c.bf16 %v739_v31, %v739_v31 }
 0x3f1   :  { %v819_v45 = vunpack.c.l.b16 %v755_v33 }
 0x415   :  { %v697_v20 = vpop.xlane.xlu2 %696 }
 0x419   :  { %714 = vadd.xlane.f32.xlu1 %v713_v18 }
 0x425   :  { %v703_v21 = vpop.xlane.xlu2 %702 }
 0x428   :  { %v709_v24 = vpop.xlane.xlu1 %708 }
 0x42d   :  { %v898_v25 = vpop.permute.xlu2 %897 }
 0x42e   :  { %910 = vmatpush.bf16.msrb.mxu3 %v898_v25 }
 0x431   :  { %v712_v27 = vpop.xlane.xlu1 %711 }
 0x435   :  { %v948_v30 = vpop.permute.xlu2 %947 }
 0x436   :  { %960 = vmatpush.bf16.msrb.mxu1 %v948_v30 }
 0x439   :  { %v688_v28 = vpop.xlane.xlu1 %687  ;;  %v691_v9 = vpop.xlane.xlu0 %690 }
 0x43a   :  { %1621 = vrcp.f32 %v688_v28 }
 0x43b   :  { %1623 = vrcp.f32 %v697_v20 }
 0x43c   :  { %1625 = vrcp.f32 %v703_v21 }
 0x440   :  { %v1622_v32 = vpop.eup %1621 }
 0x441   :  { %v740_v34 = vmul.f32 %v1622_v32, %v1995_v37  ;;  %v700_v35 = vpop.xlane.xlu1 %699  ;;  %v1624_v11 = vpop.eup %1623 }
 0x442   :  { %1627 = vrcp.f32 %v700_v35  ;;  %v706_v39 = vpop.xlane.xlu0 %705  ;;  %v1626_v36 = vpop.eup %1625  ;;  %v743_v50 = vmul.f32 %v1624_v11, %v1973_v63 }
 0x443   :  { %v756_v40 = vpack.c.bf16 %v740_v34, %v740_v34  ;;  %1629 = vrcp.f32 %v706_v39  ;;  %v745_v49 = vmul.f32 %v1626_v36, %v1979_v6 }
 0x444   :  { %1631 = vrcp.f32 %v691_v9  ;;  %v759_v23 = vpack.c.bf16 %v743_v50, %v743_v50 }
 0x445   :  { %v820_v51 = vunpack.c.l.b16 %v756_v40  ;;  %v761_v58 = vpack.c.bf16 %v745_v49, %v745_v49 }
 0x446   :  { %v869_v63 = vunpack.c.l.b16 %v759_v23 }
 0x447   :  { %v821_v43 = vpack.c.b16 %v820_v51, %v819_v45  ;;  %v894_v60 = vunpack.c.l.b16 %v761_v58 }
 0x448   :  { %v1628_v22 = vpop.eup %1627 }
 0x449   :  { %v1630_v53 = vpop.eup %1629  ;;  %v744_v37 = vmul.f32 %v1628_v22, %v2008_v59  ;;  %v694_v55 = vpop.xlane.xlu1 %693  ;;  %1387 = vmatmul.msk.bf16.vlgmr.msrb.gmra.mxu0 %vm574_vm15, %v821_v43 }
 0x44a   :  { %v1632_v57 = vpop.eup %1631  ;;  %v746_v42 = vmul.f32 %v1630_v53, %v2012_v44  ;;  %1633 = vrcp.f32 %v694_v55  ;;  %v718_v17 = vpop.xlane.xlu0 %717  ;;  %v1448_v55 = vld [vmem:[%s2180_s3 + $0x8] sm:$0xff] }
 0x44b   :  { %v760_v19 = vpack.c.bf16 %v744_v37, %v744_v37  ;;  %v741_v56 = vmul.f32 %v1632_v57, %v2000_v41  ;;  %1635 = vrcp.f32 %v712_v27  ;;  %1059 = vmatpush.bf16.msra.mxu2 %v1448_v55  ;;  %v1447_v57 = vld [vmem:[%s2180_s3] sm:$0xff] }
 0x44c   :  { %v762_v52 = vpack.c.bf16 %v746_v42, %v746_v42  ;;  %1637 = vrcp.f32 %v709_v24 }
 0x44d   :  { %v870_v6 = vunpack.c.l.b16 %v760_v19  ;;  %v757_v48 = vpack.c.bf16 %v741_v56, %v741_v56  ;;  %1639 = vrcp.f32 %v718_v17 }
 0x44e   :  { %v895_v47 = vunpack.c.l.b16 %v762_v52 }
 0x44f   :  { %v871_v61 = vpack.c.b16 %v870_v6, %v869_v63  ;;  %v844_v4 = vunpack.c.l.b16 %v757_v48  ;;  %1060 = vmatpush.bf16.msra.mxu2 %v1447_v57 }
 0x450   :  { %v1634_v0 = vpop.eup %1633  ;;  %v896_v59 = vpack.c.b16 %v895_v47, %v894_v60 }
 0x451   :  { %v742_v2 = vmul.f32 %v1634_v0, %v2020_v46  ;;  %1389 = vmatmul.msk.bf16.vlgmr.msrb.gmra.mxu2 %vm574_vm15, %v871_v61  ;;  %v1636_v1 = vpop.eup %1635 }
 0x452   :  { %1390 = vmatmul.msk.bf16.vlgmr.msrb.gmra.mxu3 %vm574_vm15, %v896_v59  ;;  %v1638_v41 = vpop.eup %1637  ;;  %v748_v29 = vmul.f32 %v1636_v1, %v1990_v26 }
 0x453   :  { %v758_v44 = vpack.c.bf16 %v742_v2, %v742_v2  ;;  %v747_v8 = vmul.f32 %v1638_v41, %v1984_v13  ;;  %v1640_v20 = vpop.eup %1639 }
 0x454   :  { %v764_v10 = vpack.c.bf16 %v748_v29, %v748_v29  ;;  %v750_v26 = vmul.f32 %v1640_v20, %v2023_v3  ;;  %v787_v38 = vpop.f32.mrf.mxu2 }
 0x455   :  { %v845_v5 = vunpack.c.l.b16 %v758_v44  ;;  %v763_v12 = vpack.c.bf16 %v747_v8, %v747_v8 }
 0x456   :  { %v920_v54 = vunpack.c.l.b16 %v764_v10  ;;  %v766_v13 = vpack.c.bf16 %v750_v26, %v750_v26 }
 0x457   :  { %v846_v7 = vpack.c.b16 %v845_v5, %v844_v4  ;;  %v919_v46 = vunpack.c.l.b16 %v763_v12 }
 0x458   :  { %v945_v27 = vunpack.c.l.b16 %v766_v13 }
 0x459   :  { %1388 = vmatmul.msk.bf16.vlgmr.msra.gmra.mxu1 %vm574_vm15, %v846_v7  ;;  %v921_v15 = vpack.c.b16 %v920_v54, %v919_v46 }
 0x45b   :  { %v812_v32 = vpop.f32.mrf.mxu3 }
 0x45c   :  { %v789_v31 = vpop.f32.mrf.mxu2 }
 0x461   :  { %v923_v62 = vpop.permute.xlu1 %922 }
 0x462   :  { %935 = vmatpush.bf16.msra.mxu0 %v923_v62 }
 0x463   :  { %v814_v35 = vpop.f32.mrf.mxu3 }
 0x465   :  { %1391 = vmatmul.msk.bf16.vlgmr.msra.gmra.mxu0 %vm574_vm15, %v921_v15 }
 0x48c   :  { %v715_v18 = vpop.xlane.xlu1 %714 }
 0x48d   :  { %1641 = vrcp.f32 %v715_v18 }
 0x493   :  { %v1642_v21 = vpop.eup %1641 }
 0x494   :  { %v749_v24 = vmul.f32 %v1642_v21, %v2035_v16  ;;  %v1564_v21 = vld [vmem:[#allocation2 + $0x4] ss:$0 sm:$0xff] }
 0x496   :  { %v765_v25 = vpack.c.bf16 %v749_v24, %v749_v24 }
 0x498   :  { %v944_v30 = vunpack.c.l.b16 %v765_v25  ;;  %v1659_v25 = vld [vmem:[%s2177_s0] sm:$0xff] }
 0x49a   :  { %v946_v28 = vpack.c.b16 %v945_v27, %v944_v30 }
 0x49c   :  { %1392 = vmatmul.msk.bf16.vlgmr.msrb.gmra.mxu1 %vm574_vm15, %v946_v28 }
 0x4c6   :  { %v837_v9 = vpop.f32.mrf.mxu0 }
 0x4ce   :  { %v839_v33 = vpop.f32.mrf.mxu0 }
 0x4cf   :  { %v1531_v34 = vpack.i.bf16 %v839_v33, %v837_v9  ;;  %v1660_v9 = vld [vmem:[%s2177_s0 + $0x8] sm:$0xff] }
 0x4d1   :  { %1532 = vrot.lane.b32.xlu1 %v1531_v34, %s1722_s17 }
 0x4d4   :  { %v887_v3 = vpop.f32.mrf.mxu2 }
 0x4d5   :  { %v912_v36 = vpop.f32.mrf.mxu3 }
 0x4d6   :  { %v862_v11 = vpop.f32.mrf.mxu1 }
 0x4dc   :  { %v889_v39 = vpop.f32.mrf.mxu2 }
 0x4dd   :  { %v1536_v16 = vpack.i.bf16 %v889_v39, %v887_v3  ;;  %v914_v51 = vpop.f32.mrf.mxu3  ;;  %v1661_v3 = vld [vmem:[%s2177_s0 + $0x10] sm:$0xff] }
 0x4de   :  { %v864_v40 = vpop.f32.mrf.mxu1  ;;  %v1551_v22 = vpack.i.bf16 %v914_v51, %v912_v36  ;;  %v1662_v36 = vld [vmem:[%s2177_s0 + $0x18] sm:$0xff] }
 0x4df   :  { %1537 = vrot.lane.b32.xlu2 %v1536_v16, %s1723_s18  ;;  %v1546_v50 = vpack.i.bf16 %v864_v40, %v862_v11 }
 0x4e2   :  { %v937_v45 = vpop.f32.mrf.mxu0 }
 0x4e7   :  { %1547 = vrot.lane.b32.xlu2 %v1546_v50, %s1722_s17 }
 0x4ea   :  { %v939_v49 = vpop.f32.mrf.mxu0 }
 0x4eb   :  { %v1541_v43 = vpack.i.bf16 %v939_v49, %v937_v45 }
 0x4ed   :  { %1542 = vrot.lane.b32.xlu0 %v1541_v43, %s1724_s19 }
 0x4ef   :  { %1552 = vrot.lane.b32.xlu2 %v1551_v22, %s1723_s18 }
 0x519   :  { %v962_v53 = vpop.f32.mrf.mxu1 }
 0x521   :  { %v964_v23 = vpop.f32.mrf.mxu1 }
 0x522   :  { %v1556_v37 = vpack.i.bf16 %v964_v23, %v962_v53 }
 0x524   :  { %1557 = vrot.lane.b32.xlu1 %v1556_v37, %s1724_s19 }
 0x539   :  { %v1538_v52 = vpop.permute.xlu2 %1537 }
 0x53a   :  { %v1540_v6 = vunpack.i.h.bf16 %v1538_v52  ;;  %v1539_v60 = vunpack.i.l.bf16 %v1538_v52 }
 0x541   :  { %v1548_v4 = vpop.permute.xlu2 %1547 }
 0x542   :  { %v1550_v41 = vunpack.i.h.bf16 %v1548_v4  ;;  %v1549_v29 = vunpack.i.l.bf16 %v1548_v4 }
 0x543   :  { %v1533_v58 = vpop.permute.xlu1 %1532 }
 0x544   :  { %v1535_v42 = vunpack.i.h.bf16 %v1533_v58  ;;  %v1534_v19 = vunpack.i.l.bf16 %v1533_v58  ;;  %v1018_v12 = vsel %vm329_vm14, %v814_v35, %v1550_v41  ;;  %v1017_v54 = vsel %vm329_vm14, %v812_v32, %v1549_v29 }
 0x546   :  { %v1016_v63 = vsel %vm329_vm14, %v789_v31, %v1535_v42  ;;  %v1015_v56 = vsel %vm329_vm14, %v787_v38, %v1534_v19 }
 0x547   :  { %v1019_v59 = vsel %vm574_vm15, %v1015_v56, %v1539_v60  ;;  %v1020_v48 = vsel %vm574_vm15, %v1016_v63, %v1540_v6 }
 0x549   :  { %v1553_v5 = vpop.permute.xlu2 %1552 }
 0x54a   :  { %v1555_v7 = vunpack.i.h.bf16 %v1553_v5  ;;  %v1554_v8 = vunpack.i.l.bf16 %v1553_v5 }
 0x54c   :  { %v1021_v15 = vsel %vm574_vm15, %v1017_v54, %v1554_v8  ;;  %v1022_v17 = vsel %vm574_vm15, %v1018_v12, %v1555_v7 }
 0x55f   :  { %v1543_v47 = vpop.permute.xlu0 %1542 }
 0x560   :  { %v1545_v61 = vunpack.i.h.bf16 %v1543_v47  ;;  %v1544_v0 = vunpack.i.l.bf16 %v1543_v47 }
 0x562   :  { %v1024_v2 = vsel %vm1023_vm1, %v1019_v59, %v1544_v0  ;;  %v1025_v44 = vsel %vm1023_vm1, %v1020_v48, %v1545_v61  ;;  %v1450_v0 = vld [vmem:[%s2181_s4 + $0x8] sm:$0xff] }
 0x563   :  { %v1028_v1 = vpack.c.bf16 %v1025_v44, %v1024_v2  ;;  %1205 = vmatpush.bf16.msra.mxu3 %v1450_v0  ;;  %v1449_v44 = vld [vmem:[%s2181_s4] sm:$0xff]  ;;  %v1458_v0 = vld [vmem:[%s2182_s5 + $0x38] sm:$0xff] }
 0x564   :  { %1321 = vmatpush.bf16.msrb.mxu0 %v1458_v0 }
 0x565   :  { %1401 = vmatmul.msk.bf16.vlgmr.msra.gmra.mxu2 %vm51_vm0, %v1028_v1 }
 0x567   :  { %1206 = vmatpush.bf16.msra.mxu3 %v1449_v44  ;;  %v1452_v44 = vld [vmem:[%s2182_s5 + $0x8] sm:$0xff] }
 0x596   :  { %v1558_v10 = vpop.permute.xlu1 %1557 }
 0x597   :  { %v1560_v46 = vunpack.i.h.bf16 %v1558_v10  ;;  %v1559_v62 = vunpack.i.l.bf16 %v1558_v10 }
 0x599   :  { %v1026_v18 = vsel %vm1023_vm1, %v1021_v15, %v1559_v62  ;;  %v1027_v20 = vsel %vm1023_vm1, %v1022_v17, %v1560_v46 }
 0x59a   :  { %v1029_v26 = vpack.c.bf16 %v1027_v20, %v1026_v18  ;;  %v1565_v20 = vld [vmem:[#allocation2 + $0x2] ss:$0 sm:$0xff] }
 0x59c   :  { %1402 = vmatmul.msk.bf16.gmra.mxu2 %vm51_vm0, %v1029_v26 }
 0x5e8   :  { %v1062_v13 = vpop.f32.mrf.mxu2 }
 0x5e9   :  { %v1063_v24 = vadd.f32 %v1564_v21, %v1062_v13 }
 0x5eb   :  { %v2082_v27 = vadd.f32 %v1659_v25, %v1063_v24  ;;  %v1566_v24 = vld [vmem:[#allocation2 + $0x3] ss:$0 sm:$0xff] }
 0x5ed   :  { %v1076_v30 = vsel %vm51_vm0, %v2082_v27, 0.0 }
 0x5ee   :  { %1077 = vadd.xlane.f32.xlu2 %v1076_v30 }
 0x5f0   :  { %v1064_v28 = vpop.f32.mrf.mxu2 }
 0x5f1   :  { %v1065_v38 = vadd.f32 %v1564_v21, %v1064_v28 }
 0x5f3   :  { %v2089_v31 = vadd.f32 %v1660_v9, %v1065_v38 }
 0x5f5   :  { %v1079_v32 = vsel %vm51_vm0, %v2089_v31, 0.0 }
 0x5f6   :  { %1080 = vadd.xlane.f32.xlu0 %v1079_v32 }
 0x61f   :  { %v1067_v33 = vpop.f32.mrf.mxu2 }
 0x620   :  { %v1068_v34 = vadd.f32 %v1564_v21, %v1067_v33 }
 0x622   :  { %v2096_v35 = vadd.f32 %v1661_v3, %v1068_v34 }
 0x624   :  { %v1082_v11 = vsel %vm51_vm0, %v2096_v35, 0.0 }
 0x625   :  { %1083 = vadd.xlane.f32.xlu1 %v1082_v11 }
 0x627   :  { %v1069_v39 = vpop.f32.mrf.mxu2 }
 0x628   :  { %v1070_v16 = vadd.f32 %v1564_v21, %v1069_v39 }
 0x62a   :  { %v2103_v40 = vadd.f32 %v1662_v36, %v1070_v16 }
 0x62c   :  { %v1085_v45 = vsel %vm51_vm0, %v2103_v40, 0.0 }
 0x62d   :  { %1086 = vadd.xlane.f32.xlu2 %v1085_v45 }
 0x661   :  { %v1078_v50 = vpop.xlane.xlu2 %1077 }
 0x662   :  { %v1088_v51 = vmul.f32 %v1078_v50, %v1781_v14 }
 0x664   :  { %v1092_v49 = vsub.f32 %v2082_v27, %v1088_v51 }
 0x666   :  { %v1096_v43 = vmul.f32 %v1092_v49, %v1092_v49 }
 0x668   :  { %v1100_v22 = vsel %vm51_vm0, %v1096_v43, 0.0 }
 0x669   :  { %v1081_v53 = vpop.xlane.xlu0 %1080  ;;  %1101 = vadd.xlane.f32.xlu0 %v1100_v22 }
 0x66a   :  { %v1089_v23 = vmul.f32 %v1081_v53, %v1781_v14 }
 0x66c   :  { %v1093_v37 = vsub.f32 %v2089_v31, %v1089_v23 }
 0x66e   :  { %v1097_v55 = vmul.f32 %v1093_v37, %v1093_v37 }
 0x670   :  { %v1103_v57 = vsel %vm51_vm0, %v1097_v55, 0.0 }
 0x671   :  { %1104 = vadd.xlane.f32.xlu1 %v1103_v57 }
 0x698   :  { %v1084_v58 = vpop.xlane.xlu1 %1083 }
 0x699   :  { %v1090_v42 = vmul.f32 %v1084_v58, %v1781_v14 }
 0x69b   :  { %v2115_v19 = vsub.f32 %v2096_v35, %v1090_v42 }
 0x69d   :  { %v1098_v52 = vmul.f32 %v2115_v19, %v2115_v19 }
 0x69f   :  { %v1106_v63 = vsel %vm51_vm0, %v1098_v52, 0.0 }
 0x6a0   :  { %1107 = vadd.xlane.f32.xlu2 %v1106_v63  ;;  %v1087_v56 = vpop.xlane.xlu2 %1086 }
 0x6a1   :  { %v1091_v6 = vmul.f32 %v1087_v56, %v1781_v14 }
 0x6a3   :  { %v2122_v60 = vsub.f32 %v2103_v40, %v1091_v6 }
 0x6a5   :  { %v1099_v47 = vmul.f32 %v2122_v60, %v2122_v60 }
 0x6a7   :  { %v1109_v61 = vsel %vm51_vm0, %v1099_v47, 0.0 }
 0x6a8   :  { %1110 = vadd.xlane.f32.xlu0 %v1109_v61 }
 0x6dc   :  { %v1102_v59 = vpop.xlane.xlu0 %1101 }
 0x6dd   :  { %v1112_v48 = vmul.f32 %v1102_v59, %v1781_v14  ;;  %v1455_v59 = vld [vmem:[%s2182_s5 + $0x20] sm:$0xff] }
 0x6df   :  { %v1116_v2 = vadd.f32 1e-05, %v1112_v48  ;;  %v1454_v48 = vld [vmem:[%s2182_s5 + $0x18] sm:$0xff] }
 0x6e1   :  { %1643 = vrsqrt.f32 %v1116_v2  ;;  %vm1126_vm3 = vweird.f32 %v1116_v2 }
 0x6e4   :  { %v1105_v1 = vpop.xlane.xlu1 %1104 }
 0x6e5   :  { %v1113_v4 = vmul.f32 %v1105_v1, %v1781_v14  ;;  %v1451_v1 = vld [vmem:[%s2182_s5] sm:$0xff] }
 0x6e7   :  { %v1644_v5 = vpop.eup %1643  ;;  %v1117_v41 = vadd.f32 1e-05, %v1113_v4  ;;  %v1567_v4 = vld [vmem:[#allocation2 + $0x7] ss:$0 sm:$0xff] }
 0x6e8   :  { %v1121_v29 = vmul.f32 %v1644_v5, %v1116_v2  ;;  %vm1127_vm2 = vweird.f32 %v1644_v5  ;;  %v1453_v2 = vld [vmem:[%s2182_s5 + $0x10] sm:$0xff] }
 0x6e9   :  { %1645 = vrsqrt.f32 %v1117_v41  ;;  %vm1128_vm4 = vmor %vm1126_vm3, %vm1127_vm2  ;;  %vm1136_vm6 = vweird.f32 %v1117_v41 }
 0x6ea   :  { %v1122_v7 = vmul.f32 %v1644_v5, %v1121_v29 }
 0x6ec   :  { %v1123_v8 = vmul.f32 0.5, %v1122_v7 }
 0x6ee   :  { %v1124_v10 = vsub.f32 1.5, %v1123_v8 }
 0x6ef   :  { %v1646_v12 = vpop.eup %1645 }
 0x6f0   :  { %v1125_v54 = vmul.f32 %v1644_v5, %v1124_v10  ;;  %v1131_v46 = vmul.f32 %v1646_v12, %v1117_v41  ;;  %vm1137_vm5 = vweird.f32 %v1646_v12 }
 0x6f1   :  { %vm1138_vm7 = vmor %vm1136_vm6, %vm1137_vm5 }
 0x6f2   :  { %v1132_v62 = vmul.f32 %v1646_v12, %v1131_v46  ;;  %v1129_v15 = vsel %vm1128_vm4, %v1644_v5, %v1125_v54 }
 0x6f3   :  { %v1160_v26 = vmul.f32 %v1129_v15, %v1092_v49 }
 0x6f4   :  { %v1133_v17 = vmul.f32 0.5, %v1132_v62 }
 0x6f5   :  { %v1165_v25 = vmul.f32 %v1565_v20, %v1160_v26 }
 0x6f6   :  { %v1134_v18 = vsub.f32 1.5, %v1133_v17 }
 0x6f7   :  { %v1170_v38 = vadd.f32 %v1566_v24, %v1165_v25 }
 0x6f8   :  { %v1135_v21 = vmul.f32 %v1646_v12, %v1134_v18 }
 0x6fa   :  { %v1139_v13 = vsel %vm1138_vm7, %v1646_v12, %v1135_v21 }
 0x6fb   :  { %v1161_v30 = vmul.f32 %v1139_v13, %v1093_v37 }
 0x6fd   :  { %v1166_v28 = vmul.f32 %v1565_v20, %v1161_v30 }
 0x6ff   :  { %v1171_v9 = vadd.f32 %v1566_v24, %v1166_v28 }
 0x701   :  { %v1174_v32 = vpack.c.bf16 %v1171_v9, %v1170_v38 }
 0x703   :  { %1411 = vmatmul.msk.bf16.vlgmr.msra.gmra.mxu3 %vm51_vm0, %v1174_v32 }
 0x713   :  { %v1108_v33 = vpop.xlane.xlu2 %1107 }
 0x714   :  { %v1114_v34 = vmul.f32 %v1108_v33, %v1781_v14 }
 0x716   :  { %v1118_v3 = vadd.f32 1e-05, %v1114_v34 }
 0x718   :  { %1647 = vrsqrt.f32 %v1118_v3  ;;  %vm1146_vm9 = vweird.f32 %v1118_v3 }
 0x71b   :  { %v1111_v11 = vpop.xlane.xlu0 %1110 }
 0x71c   :  { %v1115_v39 = vmul.f32 %v1111_v11, %v1781_v14 }
 0x71e   :  { %v1648_v16 = vpop.eup %1647  ;;  %v1119_v36 = vadd.f32 1e-05, %v1115_v39 }
 0x71f   :  { %v1141_v45 = vmul.f32 %v1648_v16, %v1118_v3  ;;  %vm1147_vm8 = vweird.f32 %v1648_v16 }
 0x720   :  { %1649 = vrsqrt.f32 %v1119_v36  ;;  %vm1148_vm10 = vmor %vm1146_vm9, %vm1147_vm8  ;;  %vm1156_vm12 = vweird.f32 %v1119_v36 }
 0x721   :  { %v1142_v50 = vmul.f32 %v1648_v16, %v1141_v45 }
 0x723   :  { %v1143_v51 = vmul.f32 0.5, %v1142_v50 }
 0x725   :  { %v1144_v49 = vsub.f32 1.5, %v1143_v51 }
 0x726   :  { %v1650_v43 = vpop.eup %1649 }
 0x727   :  { %v1145_v22 = vmul.f32 %v1648_v16, %v1144_v49  ;;  %v1151_v53 = vmul.f32 %v1650_v43, %v1119_v36  ;;  %vm1157_vm11 = vweird.f32 %v1650_v43 }
 0x728   :  { %vm1158_vm13 = vmor %vm1156_vm12, %vm1157_vm11 }
 0x729   :  { %v1152_v23 = vmul.f32 %v1650_v43, %v1151_v53  ;;  %v1149_v37 = vsel %vm1148_vm10, %v1648_v16, %v1145_v22 }
 0x72a   :  { %v1162_v14 = vmul.f32 %v1149_v37, %v2115_v19  ;;  %v1457_v19 = vld [vmem:[%s2182_s5 + $0x30] sm:$0xff] }
 0x72b   :  { %v1153_v55 = vmul.f32 0.5, %v1152_v23  ;;  %1322 = vmatpush.bf16.msrb.mxu0 %v1457_v19 }
 0x72c   :  { %v1167_v63 = vmul.f32 %v1565_v20, %v1162_v14 }
 0x72d   :  { %v1154_v57 = vsub.f32 1.5, %v1153_v55 }
 0x72e   :  { %v1172_v6 = vadd.f32 %v1566_v24, %v1167_v63  ;;  %v1568_v63 = vld [vmem:[#allocation2 + $0x5] ss:$0 sm:$0xff] }
 0x72f   :  { %v1155_v58 = vmul.f32 %v1650_v43, %v1154_v57 }
 0x731   :  { %v1159_v42 = vsel %vm1158_vm13, %v1650_v43, %v1155_v58 }
 0x732   :  { %v1163_v52 = vmul.f32 %v1159_v42, %v2122_v60  ;;  %v1456_v60 = vld [vmem:[%s2182_s5 + $0x28] sm:$0xff]  ;;  %s1725_s5 = smov [#allocation5]  }
 0x733   :  { %1323 = vmatpush.bf16.msrb.mxu0 %v1456_v60  ;;  %s1352_s3 = sshll.u32 %s1725_s5, 4  ;;  %s1353_s3 = int_to_ptr.vmem [resolvable:$true] %s1352_s3 }
 0x734   :  { %v1168_v56 = vmul.f32 %v1565_v20, %v1163_v52 }
 0x736   :  { %v1173_v47 = vadd.f32 %v1566_v24, %v1168_v56 }
 0x737   :  { %1324 = vmatpush.bf16.msrb.mxu0 %v1455_v59 }
 0x738   :  { %v1175_v61 = vpack.c.bf16 %v1173_v47, %v1172_v6 }
 0x73a   :  { %1412 = vmatmul.msk.bf16.gmra.mxu3 %vm51_vm0, %v1175_v61 }
 0x73b   :  { %1325 = vmatpush.bf16.msrb.mxu0 %v1454_v48 }
 0x73f   :  { %1326 = vmatpush.bf16.msrb.mxu0 %v1453_v2 }
 0x743   :  { %1327 = vmatpush.bf16.msrb.mxu0 %v1452_v44 }
 0x747   :  { %1328 = vmatpush.bf16.msrb.mxu0 %v1451_v1 }
 0x786   :  { %v1208_v5 = vpop.f32.mrf.mxu3 }
 0x787   :  { %v1209_v41 = vadd.f32 %v1567_v4, %v1208_v5 }
 0x789   :  { %v1222_v29 = vmul.f32 0.044715, %v1209_v41  ;;  %v1218_v24 = vmul.f32 0.5, %v1209_v41 }
 0x78b   :  { %v1226_v7 = vmul.f32 %v1222_v29, %v1209_v41 }
 0x78d   :  { %v1230_v8 = vmul.f32 %v1226_v7, %v1209_v41 }
 0x78e   :  { %v1210_v10 = vpop.f32.mrf.mxu3 }
 0x78f   :  { %v1234_v12 = vadd.f32 %v1230_v8, %v1209_v41  ;;  %v1211_v54 = vadd.f32 %v1567_v4, %v1210_v10 }
 0x791   :  { %v1223_v46 = vmul.f32 0.044715, %v1211_v54  ;;  %v1238_v62 = vmul.f32 0.7978846, %v1234_v12  ;;  %v1219_v25 = vmul.f32 0.5, %v1211_v54 }
 0x793   :  { %v1227_v15 = vmul.f32 %v1223_v46, %v1211_v54  ;;  %1651 = vtanh.f32 %v1238_v62 }
 0x795   :  { %v1231_v17 = vmul.f32 %v1227_v15, %v1211_v54 }
 0x797   :  { %v1235_v18 = vadd.f32 %v1231_v17, %v1211_v54 }
 0x799   :  { %v1239_v20 = vmul.f32 0.7978846, %v1235_v18  ;;  %v1652_v26 = vpop.eup %1651 }
 0x79a   :  { %v1246_v21 = vadd.f32 1.0, %v1652_v26 }
 0x79b   :  { %1653 = vtanh.f32 %v1239_v20 }
 0x79c   :  { %v1250_v28 = vmul.f32 %v1246_v21, %v1218_v24 }
 0x7a1   :  { %v1654_v13 = vpop.eup %1653 }
 0x7a2   :  { %v1247_v30 = vadd.f32 1.0, %v1654_v13 }
 0x7a4   :  { %v1251_v38 = vmul.f32 %v1247_v30, %v1219_v25 }
 0x7a6   :  { %v1254_v9 = vpack.c.bf16 %v1251_v38, %v1250_v28 }
 0x7a8   :  { %1329 = vmatmul.bf16.vlgmr.msrb.gmra.mxu0 %v1254_v9 }
 0x7bd   :  { %v1213_v32 = vpop.f32.mrf.mxu3 }
 0x7be   :  { %v1214_v33 = vadd.f32 %v1567_v4, %v1213_v32 }
 0x7c0   :  { %v1224_v34 = vmul.f32 0.044715, %v1214_v33  ;;  %v1220_v55 = vmul.f32 0.5, %v1214_v33 }
 0x7c2   :  { %v1228_v3 = vmul.f32 %v1224_v34, %v1214_v33 }
 0x7c4   :  { %v1232_v11 = vmul.f32 %v1228_v3, %v1214_v33 }
 0x7c5   :  { %v1215_v39 = vpop.f32.mrf.mxu3 }
 0x7c6   :  { %v1216_v16 = vadd.f32 %v1567_v4, %v1215_v39  ;;  %v1236_v36 = vadd.f32 %v1232_v11, %v1214_v33 }
 0x7c8   :  { %v1225_v45 = vmul.f32 0.044715, %v1216_v16  ;;  %v1240_v51 = vmul.f32 0.7978846, %v1236_v36  ;;  %v1221_v57 = vmul.f32 0.5, %v1216_v16 }
 0x7ca   :  { %v1229_v50 = vmul.f32 %v1225_v45, %v1216_v16  ;;  %1655 = vtanh.f32 %v1240_v51 }
 0x7cc   :  { %v1233_v49 = vmul.f32 %v1229_v50, %v1216_v16 }
 0x7ce   :  { %v1237_v43 = vadd.f32 %v1233_v49, %v1216_v16 }
 0x7d0   :  { %v1241_v22 = vmul.f32 0.7978846, %v1237_v43  ;;  %v1656_v53 = vpop.eup %1655 }
 0x7d1   :  { %v1248_v23 = vadd.f32 1.0, %v1656_v53 }
 0x7d2   :  { %1657 = vtanh.f32 %v1241_v22 }
 0x7d3   :  { %v1252_v58 = vmul.f32 %v1248_v23, %v1220_v55 }
 0x7d8   :  { %v1658_v37 = vpop.eup %1657 }
 0x7d9   :  { %v1249_v14 = vadd.f32 1.0, %v1658_v37 }
 0x7db   :  { %v1253_v42 = vmul.f32 %v1249_v14, %v1221_v57 }
 0x7dd   :  { %v1255_v52 = vpack.c.bf16 %v1253_v42, %v1252_v58 }
 0x7df   :  { %1334 = vmatmul.bf16.gmra.mxu0 %v1255_v52 }
 0x825   :  { %v1330_v56 = vpop.f32.mrf.mxu0 }
 0x826   :  { %v1331_v6 = vadd.f32 %v1568_v63, %v1330_v56 }
 0x828   :  { %v1340_v47 = vadd.f32 %v1331_v6, %v2082_v27 }
 0x82a   :  { %1344 = vst.msk [vmem:[#allocation5] sm:$0xff] %vm51_vm0, %v1340_v47 }
 0x82d   :  { %v1332_v61 = vpop.f32.mrf.mxu0 }
 0x82e   :  { %v1333_v0 = vadd.f32 %v1568_v63, %v1332_v61 }
 0x830   :  { %v1341_v19 = vadd.f32 %v1333_v0, %v2089_v31 }
 0x832   :  { %1345 = vst.msk [vmem:[#allocation5 + $0x8] sm:$0xff] %vm51_vm0, %v1341_v19 }
 0x85c   :  { %v1335_v60 = vpop.f32.mrf.mxu0 }
 0x85d   :  { %v1336_v59 = vadd.f32 %v1568_v63, %v1335_v60 }
 0x85f   :  { %v1342_v48 = vadd.f32 %v1336_v59, %v2096_v35 }
 0x861   :  { %1346 = vst.msk [vmem:[#allocation5 + $0x10] sm:$0xff] %vm51_vm0, %v1342_v48 }
 0x864   :  { %v1337_v2 = vpop.f32.mrf.mxu0 }
 0x865   :  { %v1338_v27 = vadd.f32 %v1568_v63, %v1337_v2 }
 0x867   :  { %v1343_v44 = vadd.f32 %v1338_v27, %v2103_v40 }
 0x869   :  { %1347 = vst.msk [vmem:[#allocation5 + $0x18] sm:$0xff] %vm51_vm0, %v1343_v44 }
 0x86a   :  { %1360 = dma.vmem_to_hbm [thread:$0]  %s1353_s3, 512, %s1355_s26, [#allocation4], %s1726_s27, %s1726_s27, %s1722_s17  }
 0x86b   :  { %1713 = dma.done.wait [#allocation4], 512  }
 0x86c   :  { %1714 = vsyncadd [#allocation4], 4294966784 }
 0x86d   :  { %1365 = vsyncpa [#allocation3], 1 }
 0x86e   :  { %1366 = vsyncpa [#allocation4], 1 }

// kernel: tpu_custom_call.1
= control target key start
LH: loop header
LB: loop body
LE: loop exit
PB: predicated region body
PF: predicated region fallthrough
CT: control target
= control target key end

     0   :  { %11 = vsyncpa [#allocation3], 0  ;;  %s2177_s0 = inlined_call_operand.vmem [shape: f32[2,16,32], index: 0, kind: input, shape index: {}]   ;;  %s2178_s1 = inlined_call_operand.hbm [shape: f32[8,128], index: 1, kind: input, shape index: {}]   ;;  %s2179_s2 = inlined_call_operand.vmem [shape: bf16[32,96], index: 2, kind: input, shape index: {}]   ;;  %s2180_s3 = inlined_call_operand.vmem [shape: bf16[32,32], index: 3, kind: input, shape index: {}]   ;;  %s2181_s4 = inlined_call_operand.vmem [shape: bf16[32,128], index: 4, kind: input, shape index: {}]   ;;  %s2182_s5 = inlined_call_operand.vmem [shape: bf16[128,32], index: 5, kind: input, shape index: {}]   ;;  %s2183_s6 = inlined_call_operand.hbm [shape: f32[2,16,32], index: 6, kind: output, shape index: {}]  }
   0x1   :  { %12 = vsyncpa [#allocation4], 0  ;;  %s20_s23 = sshll.u32 %s2178_s1, 4  ;;  %s1715_s24 = smov [#allocation2]   ;;  %s21_s23 = int_to_ptr.hbm [resolvable:$true] %s20_s23 }
   0x2   :  { %s22_s25 = sshll.u32 %s1715_s24, 4  ;;  %s23_s25 = int_to_ptr.vmem [resolvable:$true] %s22_s25 }
   0x3   :  { %25 = dma.hbm_to_vmem [thread:$0]  %s21_s23, 128, %s23_s25, [#allocation3]  }
   0x4   :  { %1711 = dma.done.wait [#allocation3], 128  }
   0x5   :  { %1712 = vsyncadd [#allocation3], 4294967168  ;;  %vm51_vm0 = vcmask 261120   ;;  %v41_v0 = vld [vmem:[%s2177_s0 + $0x10] sm:$0xff]  ;;  %v39_v1 = vld [vmem:[%s2177_s0] sm:$0xff]  ;;  %v1716_v8 = vmov 32.0  }
   0x6   :  { %v58_v2 = vsel %vm51_vm0, %v41_v0, 0.0  ;;  %v52_v3 = vsel %vm51_vm0, %v39_v1, 0.0  ;;  %v42_v4 = vld [vmem:[%s2177_s0 + $0x18] sm:$0xff]  ;;  %v40_v5 = vld [vmem:[%s2177_s0 + $0x8] sm:$0xff]  ;;  %1569 = vrcp.f32 %v1716_v8  ;;  %v1445_v39 = vld [vmem:[%s2179_s2] sm:$0xff]  ;;  %s1718_s13 = smov 120  }
   0x7   :  { %59 = vadd.xlane.f32.xlu1 %v58_v2  ;;  %53 = vadd.xlane.f32.xlu0 %v52_v3  ;;  %v61_v6 = vsel %vm51_vm0, %v42_v4, 0.0  ;;  %v55_v7 = vsel %vm51_vm0, %v40_v5, 0.0  ;;  %v1446_v35 = vld [vmem:[%s2179_s2 + $0x8] sm:$0xff]  ;;  %s1717_s2 = smov 112   ;;  %s1719_s14 = smov 104   ;;  %vm329_vm14 = vcmask 64512  }
   0x8   :  { %188 = vmatpush.bf16.msra.mxu1 %v1446_v35  ;;  %s1720_s15 = smov 96   ;;  %s1721_s16 = smov 64   ;;  %vm574_vm15 = vcmask 130048  }
   0x9   :  { %s1722_s17 = smov 8   ;;  %s1723_s18 = smov 16  }
   0xa   :  { %s1724_s19 = smov 24   ;;  %s1354_s26 = sshll.u32 %s2183_s6, 4  ;;  %s1355_s26 = int_to_ptr.hbm [resolvable:$true] %s1354_s26 }
   0xb   :  { %s1726_s27 = smov 128  }
   0xc   :  { %v1570_v9 = vpop.eup %1569  ;;  %189 = vmatpush.bf16.msra.mxu1 %v1445_v39 }
   0xd   :  { %v65_v10 = vmul.f32 32.0, %v1570_v9  ;;  %vm69_vm1 = vweird.f32 %v1570_v9 }
   0xf   :  { %62 = vadd.xlane.f32.xlu1 %v61_v6  ;;  %56 = vadd.xlane.f32.xlu0 %v55_v7  ;;  %v66_v11 = vsub.f32 1.0, %v65_v10 }
  0x11   :  { %v67_v12 = vmul.f32 %v1570_v9, %v66_v11 }
  0x13   :  { %v68_v13 = vadd.f32 %v1570_v9, %v67_v12  ;;  %v1562_v12 = vld [vmem:[#allocation2 + $0x1] ss:$0 sm:$0xff] }
  0x15   :  { %v1781_v14 = vsel %vm69_vm1, %v1570_v9, %v68_v13  ;;  %vm1023_vm1 = vcmask 195584  }
  0x7a   :  { %v60_v15 = vpop.xlane.xlu1 %59  ;;  %v54_v16 = vpop.xlane.xlu0 %53 }
  0x7b   :  { %v73_v17 = vmul.f32 %v1781_v14, %v60_v15  ;;  %v71_v18 = vmul.f32 %v1781_v14, %v54_v16 }
  0x7d   :  { %v1785_v19 = vsub.f32 %v41_v0, %v73_v17  ;;  %v75_v20 = vsub.f32 %v39_v1, %v71_v18 }
  0x7f   :  { %v81_v21 = vmul.f32 %v1785_v19, %v1785_v19  ;;  %v79_v22 = vmul.f32 %v75_v20, %v75_v20 }
  0x81   :  { %v89_v23 = vsel %vm51_vm0, %v81_v21, 0.0  ;;  %v83_v24 = vsel %vm51_vm0, %v79_v22, 0.0 }
  0x82   :  { %v63_v25 = vpop.xlane.xlu1 %62  ;;  %90 = vadd.xlane.f32.xlu0 %v89_v23  ;;  %84 = vadd.xlane.f32.xlu2 %v83_v24  ;;  %v57_v26 = vpop.xlane.xlu0 %56 }
  0x83   :  { %v74_v27 = vmul.f32 %v1781_v14, %v63_v25  ;;  %v72_v28 = vmul.f32 %v1781_v14, %v57_v26 }
  0x85   :  { %v1793_v29 = vsub.f32 %v42_v4, %v74_v27  ;;  %v76_v30 = vsub.f32 %v40_v5, %v72_v28  ;;  %v1561_v5 = vld [vmem:[#allocation2] ss:$0 sm:$0xff] }
  0x87   :  { %v82_v31 = vmul.f32 %v1793_v29, %v1793_v29  ;;  %v80_v32 = vmul.f32 %v76_v30, %v76_v30 }
  0x89   :  { %v92_v33 = vsel %vm51_vm0, %v82_v31, 0.0  ;;  %v86_v34 = vsel %vm51_vm0, %v80_v32, 0.0  ;;  %v1563_v32 = vld [vmem:[#allocation2 + $0x6] ss:$0 sm:$0xff] }
  0x8a   :  { %93 = vadd.xlane.f32.xlu1 %v92_v33  ;;  %87 = vadd.xlane.f32.xlu2 %v86_v34 }
  0xf5   :  { %v85_v36 = vpop.xlane.xlu2 %84  ;;  %v91_v38 = vpop.xlane.xlu0 %90 }
  0xf6   :  { %v95_v37 = vmul.f32 %v85_v36, %v1781_v14  ;;  %v97_v41 = vmul.f32 %v91_v38, %v1781_v14 }
  0xf8   :  { %v99_v40 = vadd.f32 1e-05, %v95_v37  ;;  %v101_v42 = vadd.f32 1e-05, %v97_v41 }
  0xfa   :  { %1571 = vrsqrt.f32 %v99_v40  ;;  %vm109_vm3 = vweird.f32 %v99_v40  ;;  %vm129_vm10 = vweird.f32 %v101_v42 }
  0xfb   :  { %1573 = vrsqrt.f32 %v101_v42 }
  0xfd   :  { %v94_v43 = vpop.xlane.xlu1 %93  ;;  %v88_v44 = vpop.xlane.xlu2 %87 }
  0xfe   :  { %v98_v45 = vmul.f32 %v94_v43, %v1781_v14  ;;  %v96_v46 = vmul.f32 %v88_v44, %v1781_v14 }
 0x100   :  { %v1572_v47 = vpop.eup %1571  ;;  %v102_v48 = vadd.f32 1e-05, %v98_v45  ;;  %v100_v49 = vadd.f32 1e-05, %v96_v46 }
 0x101   :  { %v104_v50 = vmul.f32 %v1572_v47, %v99_v40  ;;  %v1574_v53 = vpop.eup %1573  ;;  %vm110_vm2 = vweird.f32 %v1572_v47 }
 0x102   :  { %1575 = vrsqrt.f32 %v102_v48  ;;  %v124_v59 = vmul.f32 %v1574_v53, %v101_v42  ;;  %vm111_vm4 = vmor %vm109_vm3, %vm110_vm2  ;;  %vm119_vm6 = vweird.f32 %v100_v49  ;;  %vm139_vm8 = vweird.f32 %v102_v48 }
 0x103   :  { %v105_v51 = vmul.f32 %v1572_v47, %v104_v50  ;;  %1577 = vrsqrt.f32 %v100_v49  ;;  %vm130_vm11 = vweird.f32 %v1574_v53 }
 0x104   :  { %v125_v0 = vmul.f32 %v1574_v53, %v124_v59  ;;  %vm131_vm13 = vmor %vm129_vm10, %vm130_vm11 }
 0x105   :  { %v106_v52 = vmul.f32 0.5, %v105_v51 }
 0x106   :  { %v126_v6 = vmul.f32 0.5, %v125_v0 }
 0x107   :  { %v107_v54 = vsub.f32 1.5, %v106_v52 }
 0x108   :  { %v1576_v55 = vpop.eup %1575  ;;  %v127_v13 = vsub.f32 1.5, %v126_v6 }
 0x109   :  { %v1578_v56 = vpop.eup %1577  ;;  %v134_v57 = vmul.f32 %v1576_v55, %v102_v48  ;;  %v108_v58 = vmul.f32 %v1572_v47, %v107_v54  ;;  %vm140_vm9 = vweird.f32 %v1576_v55 }
 0x10a   :  { %v114_v60 = vmul.f32 %v1578_v56, %v100_v49  ;;  %vm120_vm5 = vweird.f32 %v1578_v56  ;;  %vm141_vm12 = vmor %vm139_vm8, %vm140_vm9 }
 0x10b   :  { %v135_v61 = vmul.f32 %v1576_v55, %v134_v57  ;;  %v112_v63 = vsel %vm111_vm4, %v1572_v47, %v108_v58  ;;  %vm121_vm7 = vmor %vm119_vm6, %vm120_vm5 }
 0x10c   :  { %v115_v62 = vmul.f32 %v1578_v56, %v114_v60  ;;  %v143_v4 = vmul.f32 %v112_v63, %v75_v20  ;;  %v128_v20 = vmul.f32 %v1574_v53, %v127_v13 }
 0x10d   :  { %v136_v2 = vmul.f32 0.5, %v135_v61 }
 0x10e   :  { %v116_v1 = vmul.f32 0.5, %v115_v62  ;;  %v148_v11 = vmul.f32 %v1561_v5, %v143_v4  ;;  %v132_v23 = vsel %vm131_vm13, %v1574_v53, %v128_v20 }
 0x10f   :  { %v137_v8 = vsub.f32 1.5, %v136_v2  ;;  %v145_v25 = vmul.f32 %v132_v23, %v1785_v19 }
 0x110   :  { %v117_v3 = vsub.f32 1.5, %v116_v1  ;;  %v153_v17 = vadd.f32 %v1562_v12, %v148_v11 }
 0x111   :  { %v138_v16 = vmul.f32 %v1576_v55, %v137_v8  ;;  %v150_v27 = vmul.f32 %v1561_v5, %v145_v25 }
 0x112   :  { %v118_v7 = vmul.f32 %v1578_v56, %v117_v3 }
 0x113   :  { %v142_v22 = vsel %vm141_vm12, %v1576_v55, %v138_v16 }
 0x114   :  { %v122_v9 = vsel %vm121_vm7, %v1578_v56, %v118_v7  ;;  %v146_v24 = vmul.f32 %v142_v22, %v1793_v29 }
 0x115   :  { %v144_v10 = vmul.f32 %v122_v9, %v76_v30  ;;  %v155_v30 = vadd.f32 %v1562_v12, %v150_v27 }
 0x116   :  { %v151_v26 = vmul.f32 %v1561_v5, %v146_v24 }
 0x117   :  { %v149_v15 = vmul.f32 %v1561_v5, %v144_v10 }
 0x118   :  { %v156_v28 = vadd.f32 %v1562_v12, %v151_v26 }
 0x119   :  { %v154_v18 = vadd.f32 %v1562_v12, %v149_v15 }
 0x11a   :  { %v158_v31 = vpack.c.bf16 %v156_v28, %v155_v30 }
 0x11b   :  { %v157_v21 = vpack.c.bf16 %v154_v18, %v153_v17 }
 0x11d   :  { %1375 = vmatmul.msk.bf16.vlgmr.msra.gmra.mxu1 %vm51_vm0, %v157_v21 }
 0x12d   :  { %1376 = vmatmul.msk.bf16.gmra.mxu1 %vm51_vm0, %v158_v31 }
 0x19a   :  { %v191_v33 = vpop.f32.mrf.mxu1 }
 0x19b   :  { %v192_v34 = vadd.f32 %v1563_v32, %v191_v33 }
 0x19d   :  { %v201_v36 = vmul.f32 0.35355338, %v192_v34  ;;  %v301_v54 = vpack.c.bf16 %v192_v34, %v192_v34 }
 0x19f   :  { %v245_v40 = vpack.c.bf16 %v201_v36, %v201_v36  ;;  %v324_v62 = vunpack.c.l.b16 %v301_v54 }
 0x1a1   :  { %v1817_v42 = vunpack.c.l.b16 %v245_v40 }
 0x1a2   :  { %v193_v35 = vpop.f32.mrf.mxu1 }
 0x1a3   :  { %v194_v37 = vadd.f32 %v1563_v32, %v193_v35 }
 0x1a5   :  { %v1476_v38 = vpack.i.bf16 %v194_v37, %v192_v34  ;;  %v202_v39 = vmul.f32 0.35355338, %v194_v37  ;;  %v302_v50 = vpack.c.bf16 %v194_v37, %v194_v37 }
 0x1a7   :  { %1477 = vrot.lane.b32.xlu0 %v1476_v38, %s1717_s2  ;;  %1472 = vrot.lane.b32.xlu2 %v1476_v38, %s1718_s13  ;;  %v1815_v19 = vpack.i.bf16 %v202_v39, %v201_v36  ;;  %v246_v29 = vpack.c.bf16 %v202_v39, %v202_v39  ;;  %v325_v58 = vunpack.c.l.b16 %v302_v50 }
 0x1a9   :  { %v1819_v43 = vunpack.c.l.b16 %v246_v29  ;;  %v1835_v1 = vpack.c.b16 %v325_v58, %v324_v62 }
 0x1aa   :  { %v196_v41 = vpop.f32.mrf.mxu1 }
 0x1ab   :  { %v321_v44 = vpack.c.b16 %v1819_v43, %v1817_v42  ;;  %v197_v45 = vadd.f32 %v1563_v32, %v196_v41 }
 0x1ad   :  { %v203_v47 = vmul.f32 0.35355338, %v197_v45  ;;  %v303_v55 = vpack.c.bf16 %v197_v45, %v197_v45 }
 0x1af   :  { %1487 = vrot.lane.b32.xlu2 %v1476_v38, %s1719_s14  ;;  %v247_v53 = vpack.c.bf16 %v203_v47, %v203_v47  ;;  %v357_v63 = vunpack.c.l.b16 %v303_v55 }
 0x1b1   :  { %v1829_v60 = vunpack.c.l.b16 %v247_v53 }
 0x1b2   :  { %v198_v46 = vpop.f32.mrf.mxu1 }
 0x1b3   :  { %v199_v48 = vadd.f32 %v1563_v32, %v198_v46 }
 0x1b5   :  { %v1496_v49 = vpack.i.bf16 %v199_v48, %v197_v45  ;;  %v304_v51 = vpack.c.bf16 %v199_v48, %v199_v48  ;;  %v204_v52 = vmul.f32 0.35355338, %v199_v48 }
 0x1b7   :  { %1497 = vrot.lane.b32.xlu2 %v1496_v49, %s1719_s14  ;;  %1492 = vrot.lane.b32.xlu0 %v1496_v49, %s1717_s2  ;;  %v1827_v56 = vpack.i.bf16 %v204_v52, %v203_v47  ;;  %v248_v57 = vpack.c.bf16 %v204_v52, %v204_v52  ;;  %v358_v59 = vunpack.c.l.b16 %v304_v51 }
 0x1b8   :  { %1482 = vrot.lane.b32.xlu1 %v1496_v49, %s1718_s13 }
 0x1b9   :  { %v1831_v61 = vunpack.c.l.b16 %v248_v57  ;;  %v359_v2 = vpack.c.b16 %v358_v59, %v357_v63 }
 0x1bb   :  { %v354_v0 = vpack.c.b16 %v1831_v61, %v1829_v60 }
 0x1bf   :  { %327 = vrot.lane.b32.xlu0 %v1835_v1, %s1720_s15 }
 0x1c0   :  { %360 = vrot.lane.b32.xlu1 %v359_v2, %s1720_s15 }
 0x1c8   :  { %1502 = vrot.lane.b32.xlu1 %v1815_v19, %s1718_s13 }
 0x201   :  { %v1473_v3 = vpop.permute.xlu2 %1472 }
 0x202   :  { %v1475_v4 = vunpack.i.h.bf16 %v1473_v3  ;;  %v1474_v5 = vunpack.i.l.bf16 %v1473_v3 }
 0x204   :  { %v306_v6 = vpack.c.bf16 %v1475_v4, %v1475_v4  ;;  %v305_v7 = vpack.c.bf16 %v1474_v5, %v1474_v5 }
 0x206   :  { %v390_v8 = vunpack.c.l.b16 %v306_v6  ;;  %v389_v9 = vunpack.c.l.b16 %v305_v7 }
 0x208   :  { %v391_v10 = vpack.c.b16 %v390_v8, %v389_v9 }
 0x209   :  { %v1488_v11 = vpop.permute.xlu2 %1487 }
 0x20a   :  { %392 = vrot.lane.b32.xlu2 %v391_v10, %s1720_s15  ;;  %v1490_v16 = vunpack.i.h.bf16 %v1488_v11  ;;  %v1489_v17 = vunpack.i.l.bf16 %v1488_v11 }
 0x20c   :  { %v314_v23 = vpack.c.bf16 %v1490_v16, %v1490_v16  ;;  %v313_v24 = vpack.c.bf16 %v1489_v17, %v1489_v17 }
 0x20e   :  { %v518_v26 = vunpack.c.l.b16 %v314_v23  ;;  %v517_v27 = vunpack.c.l.b16 %v313_v24 }
 0x210   :  { %v1850_v28 = vpack.c.b16 %v518_v26, %v517_v27 }
 0x211   :  { %v1498_v49 = vpop.permute.xlu2 %1497 }
 0x212   :  { %1507 = vrot.lane.b32.xlu2 %v1815_v19, %s1717_s2  ;;  %v1500_v53 = vunpack.i.h.bf16 %v1498_v49  ;;  %v1499_v54 = vunpack.i.l.bf16 %v1498_v49 }
 0x214   :  { %v316_v55 = vpack.c.bf16 %v1500_v53, %v1500_v53  ;;  %v315_v57 = vpack.c.bf16 %v1499_v54, %v1499_v54 }
 0x216   :  { %v550_v58 = vunpack.c.l.b16 %v316_v55  ;;  %v549_v59 = vunpack.c.l.b16 %v315_v57 }
 0x218   :  { %v1878_v62 = vpack.c.b16 %v550_v58, %v549_v59 }
 0x219   :  { %v1478_v12 = vpop.permute.xlu0 %1477 }
 0x21a   :  { %v1480_v13 = vunpack.i.h.bf16 %v1478_v12  ;;  %v1479_v15 = vunpack.i.l.bf16 %v1478_v12  ;;  %1512 = vrot.lane.b32.xlu2 %v1827_v56, %s1718_s13 }
 0x21c   :  { %v310_v18 = vpack.c.bf16 %v1480_v13, %v1480_v13  ;;  %v309_v20 = vpack.c.bf16 %v1479_v15, %v1479_v15 }
 0x21e   :  { %v454_v21 = vunpack.c.l.b16 %v310_v18  ;;  %v453_v22 = vunpack.c.l.b16 %v309_v20 }
 0x220   :  { %v455_v25 = vpack.c.b16 %v454_v21, %v453_v22 }
 0x222   :  { %1522 = vrot.lane.b32.xlu2 %v1827_v56, %s1717_s2  ;;  %456 = vrot.lane.b32.xlu0 %v455_v25, %s1720_s15 }
 0x229   :  { %v1493_v30 = vpop.permute.xlu0 %1492 }
 0x22a   :  { %v1483_v31 = vpop.permute.xlu1 %1482  ;;  %v1495_v32 = vunpack.i.h.bf16 %v1493_v30  ;;  %v1494_v33 = vunpack.i.l.bf16 %v1493_v30  ;;  %822 = vrot.lane.b32.xlu2 %v391_v10, %s1721_s16  ;;  %520 = vrot.lane.b32.xlu0 %v1850_v28, %s1720_s15 }
 0x22b   :  { %v1485_v34 = vunpack.i.h.bf16 %v1483_v31  ;;  %v1484_v35 = vunpack.i.l.bf16 %v1483_v31 }
 0x22c   :  { %v312_v36 = vpack.c.bf16 %v1495_v32, %v1495_v32  ;;  %v311_v37 = vpack.c.bf16 %v1494_v33, %v1494_v33 }
 0x22d   :  { %v308_v38 = vpack.c.bf16 %v1485_v34, %v1485_v34  ;;  %v307_v39 = vpack.c.bf16 %v1484_v35, %v1484_v35 }
 0x22e   :  { %v486_v40 = vunpack.c.l.b16 %v312_v36  ;;  %v485_v29 = vunpack.c.l.b16 %v311_v37 }
 0x22f   :  { %v422_v41 = vunpack.c.l.b16 %v308_v38  ;;  %v421_v45 = vunpack.c.l.b16 %v307_v39 }
 0x230   :  { %v1855_v46 = vpack.c.b16 %v486_v40, %v485_v29 }
 0x231   :  { %v328_v47 = vpop.permute.xlu0 %327  ;;  %v1857_v48 = vpack.c.b16 %v422_v41, %v421_v45 }
 0x232   :  { %v361_v50 = vpop.permute.xlu1 %360  ;;  %797 = vrot.lane.b32.xlu2 %v359_v2, %s1721_s16  ;;  %488 = vrot.lane.b32.xlu0 %v1855_v46, %s1720_s15  ;;  %v334_v51 = vsel %vm329_vm14, %v328_v47, 0 }
 0x233   :  { %424 = vrot.lane.b32.xlu1 %v1857_v48, %s1720_s15  ;;  %343 = vmatpush.bf16.xpose.msrb.mxu1 %v334_v51  ;;  %v366_v52 = vsel %vm329_vm14, %v361_v50, 0 }
 0x234   :  { %375 = vmatpush.bf16.xpose.msra.mxu2 %v366_v52 }
 0x23a   :  { %1377 = vmatmul.msk.bf16.vlgmr.msrb.gmra.mxu1 %vm329_vm14, %v321_v44  ;;  %1527 = vrot.lane.b32.xlu0 %v1827_v56, %s1719_s14  ;;  %v1503_v42 = vpop.permute.xlu1 %1502 }
 0x23b   :  { %1517 = vrot.lane.b32.xlu1 %v1815_v19, %s1719_s14  ;;  %1378 = vmatmul.msk.bf16.vlgmr.msra.gmra.mxu2 %vm329_vm14, %v354_v0  ;;  %v1505_v43 = vunpack.i.h.bf16 %v1503_v42  ;;  %v1504_v19 = vunpack.i.l.bf16 %v1503_v42 }
 0x23d   :  { %v250_v44 = vpack.c.bf16 %v1505_v43, %v1505_v43  ;;  %v249_v56 = vpack.c.bf16 %v1504_v19, %v1504_v19 }
 0x23f   :  { %v385_v63 = vunpack.c.l.b16 %v250_v44  ;;  %v384_v0 = vunpack.c.l.b16 %v249_v56 }
 0x241   :  { %v386_v2 = vpack.c.b16 %v385_v63, %v384_v0 }
 0x242   :  { %772 = vrot.lane.b32.xlu0 %v1835_v1, %s1721_s16 }
 0x243   :  { %552 = vrot.lane.b32.xlu1 %v1878_v62, %s1720_s15 }
 0x24b   :  { %872 = vrot.lane.b32.xlu1 %v455_v25, %s1721_s16 }
 0x264   :  { %v393_v60 = vpop.permute.xlu2 %392 }
 0x265   :  { %v398_v61 = vsel %vm329_vm14, %v393_v60, 0 }
 0x266   :  { %407 = vmatpush.bf16.xpose.msra.mxu3 %v398_v61 }
 0x26c   :  { %v1508_v1 = vpop.permute.xlu2 %1507 }
 0x26d   :  { %1379 = vmatmul.msk.bf16.vlgmr.msra.gmra.mxu3 %vm329_vm14, %v386_v2  ;;  %v1510_v4 = vunpack.i.h.bf16 %v1508_v1  ;;  %v1509_v5 = vunpack.i.l.bf16 %v1508_v1 }
 0x26f   :  { %v254_v7 = vpack.c.bf16 %v1510_v4, %v1510_v4  ;;  %v253_v8 = vpack.c.bf16 %v1509_v5, %v1509_v5 }
 0x271   :  { %v449_v11 = vunpack.c.l.b16 %v254_v7  ;;  %v448_v12 = vunpack.c.l.b16 %v253_v8 }
 0x273   :  { %v450_v13 = vpack.c.b16 %v449_v11, %v448_v12 }
 0x274   :  { %v1513_v3 = vpop.permute.xlu2 %1512 }
 0x275   :  { %v1515_v21 = vunpack.i.h.bf16 %v1513_v3  ;;  %v1514_v22 = vunpack.i.l.bf16 %v1513_v3 }
 0x277   :  { %v252_v25 = vpack.c.bf16 %v1515_v21, %v1515_v21  ;;  %v251_v26 = vpack.c.bf16 %v1514_v22, %v1514_v22 }
 0x279   :  { %v417_v36 = vunpack.c.l.b16 %v252_v25  ;;  %v416_v37 = vunpack.c.l.b16 %v251_v26 }
 0x27b   :  { %v418_v39 = vpack.c.b16 %v417_v36, %v416_v37 }
 0x27c   :  { %v1523_v6 = vpop.permute.xlu2 %1522 }
 0x27d   :  { %v1525_v18 = vunpack.i.h.bf16 %v1523_v6  ;;  %v1524_v20 = vunpack.i.l.bf16 %v1523_v6 }
 0x27f   :  { %v256_v23 = vpack.c.bf16 %v1525_v18, %v1525_v18  ;;  %v255_v24 = vpack.c.bf16 %v1524_v20, %v1524_v20 }
 0x281   :  { %v481_v34 = vunpack.c.l.b16 %v256_v23  ;;  %v480_v35 = vunpack.c.l.b16 %v255_v24 }
 0x283   :  { %v482_v38 = vpack.c.b16 %v481_v34, %v480_v35 }
 0x284   :  { %v823_v15 = vpop.permute.xlu2 %822 }
 0x28c   :  { %v798_v32 = vpop.permute.xlu2 %797 }
 0x294   :  { %v457_v9 = vpop.permute.xlu0 %456 }
 0x295   :  { %v462_v10 = vsel %vm329_vm14, %v457_v9, 0 }
 0x296   :  { %471 = vmatpush.bf16.xpose.msrb.mxu2 %v462_v10 }
 0x29c   :  { %v521_v16 = vpop.permute.xlu0 %520 }
 0x29d   :  { %1381 = vmatmul.msk.bf16.vlgmr.msrb.gmra.mxu2 %vm329_vm14, %v450_v13  ;;  %v526_v17 = vsel %vm329_vm14, %v521_v16, 0 }
 0x29e   :  { %535 = vmatpush.bf16.xpose.msra.mxu0 %v526_v17 }
 0x2a4   :  { %v489_v27 = vpop.permute.xlu0 %488 }
 0x2a5   :  { %v425_v30 = vpop.permute.xlu1 %424  ;;  %v494_v31 = vsel %vm329_vm14, %v489_v27, 0 }
 0x2a6   :  { %835 = vmatpush.bf16.msrb.mxu0 %v823_v15  ;;  %v430_v33 = vsel %vm329_vm14, %v425_v30, 0  ;;  %503 = vmatpush.bf16.xpose.msrb.mxu3 %v494_v31 }
 0x2a7   :  { %439 = vmatpush.bf16.xpose.msra.mxu1 %v430_v33 }
 0x2ac   :  { %v1528_v40 = vpop.permute.xlu0 %1527 }
 0x2ad   :  { %v1518_v29 = vpop.permute.xlu1 %1517  ;;  %1382 = vmatmul.msk.bf16.vlgmr.msrb.gmra.mxu3 %vm329_vm14, %v482_v38  ;;  %v1530_v50 = vunpack.i.h.bf16 %v1528_v40  ;;  %v1529_v51 = vunpack.i.l.bf16 %v1528_v40 }
 0x2ae   :  { %810 = vmatpush.bf16.msra.mxu3 %v798_v32  ;;  %v1520_v41 = vunpack.i.h.bf16 %v1518_v29  ;;  %v1519_v45 = vunpack.i.l.bf16 %v1518_v29  ;;  %1380 = vmatmul.msk.bf16.vlgmr.msra.gmra.mxu1 %vm329_vm14, %v418_v39 }
 0x2af   :  { %v260_v54 = vpack.c.bf16 %v1530_v50, %v1530_v50  ;;  %v259_v55 = vpack.c.bf16 %v1529_v51, %v1529_v51 }
 0x2b0   :  { %v258_v47 = vpack.c.bf16 %v1520_v41, %v1520_v41  ;;  %v257_v49 = vpack.c.bf16 %v1519_v45, %v1519_v45 }
 0x2b1   :  { %v545_v19 = vunpack.c.l.b16 %v260_v54  ;;  %v544_v44 = vunpack.c.l.b16 %v259_v55 }
 0x2b2   :  { %v513_v52 = vunpack.c.l.b16 %v258_v47  ;;  %v512_v53 = vunpack.c.l.b16 %v257_v49 }
 0x2b3   :  { %v546_v60 = vpack.c.b16 %v545_v19, %v544_v44 }
 0x2b4   :  { %v773_v57 = vpop.permute.xlu0 %772  ;;  %v514_v58 = vpack.c.b16 %v513_v52, %v512_v53 }
 0x2b5   :  { %v553_v59 = vpop.permute.xlu1 %552  ;;  %785 = vmatpush.bf16.msra.mxu2 %v773_v57 }
 0x2b6   :  { %v558_v42 = vsel %vm329_vm14, %v553_v59, 0  ;;  %1383 = vmatmul.msk.bf16.vlgmr.msra.gmra.mxu0 %vm329_vm14, %v514_v58 }
 0x2b7   :  { %567 = vmatpush.bf16.xpose.msrb.mxu1 %v558_v42  ;;  %v345_v43 = vpop.f32.mrf.mxu1 }
 0x2b8   :  { %v575_v56 = vsel %vm574_vm15, %v345_v43, -inf }
 0x2b9   :  { %576 = vmax.xlane.f32.xlu2 %v575_v56 }
 0x2bd   :  { %v873_v61 = vpop.permute.xlu1 %872 }
 0x2be   :  { %v377_v63 = vpop.f32.mrf.mxu2  ;;  %1384 = vmatmul.msk.bf16.vlgmr.msrb.gmra.mxu1 %vm329_vm14, %v546_v60  ;;  %885 = vmatpush.bf16.msrb.mxu2 %v873_v61 }
 0x2bf   :  { %v347_v0 = vpop.f32.mrf.mxu1  ;;  %v581_v4 = vsel %vm574_vm15, %v377_v63, -inf }
 0x2c0   :  { %v578_v2 = vsel %vm574_vm15, %v347_v0, -inf }
 0x2c1   :  { %579 = vmax.xlane.f32.xlu1 %v578_v2 }
 0x2c6   :  { %v379_v1 = vpop.f32.mrf.mxu2 }
 0x2c7   :  { %v584_v3 = vsel %vm574_vm15, %v379_v1, -inf }
 0x2c8   :  { %585 = vmax.xlane.f32.xlu0 %v584_v3 }
 0x2c9   :  { %582 = vmax.xlane.f32.xlu1 %v581_v4 }
 0x2f0   :  { %v1901_v5 = vpop.f32.mrf.mxu3 }
 0x2f1   :  { %v587_v6 = vsel %vm574_vm15, %v1901_v5, -inf }
 0x2f2   :  { %588 = vmax.xlane.f32.xlu0 %v587_v6 }
 0x2f8   :  { %v1909_v9 = vpop.f32.mrf.mxu3 }
 0x2f9   :  { %v590_v10 = vsel %vm574_vm15, %v1909_v9, -inf }
 0x320   :  { %v1905_v7 = vpop.f32.mrf.mxu2 }
 0x321   :  { %v599_v8 = vsel %vm574_vm15, %v1905_v7, -inf }
 0x322   :  { %600 = vmax.xlane.f32.xlu2 %v599_v8 }
 0x328   :  { %v1935_v36 = vpop.f32.mrf.mxu2 }
 0x329   :  { %v602_v39 = vsel %vm574_vm15, %v1935_v36, -inf }
 0x32a   :  { %591 = vmax.xlane.f32.xlu2 %v590_v10 }
 0x32b   :  { %v1913_v11 = vpop.f32.mrf.mxu1 }
 0x32c   :  { %v577_v12 = vpop.xlane.xlu2 %576  ;;  %v593_v40 = vsel %vm574_vm15, %v1913_v11, -inf }
 0x32d   :  { %v623_v13 = vsub.f32 %v345_v43, %v577_v12 }
 0x32f   :  { %v639_v15 = vmul.f32 1.442695, %v623_v13 }
 0x330   :  { %v1915_v16 = vpop.f32.mrf.mxu3 }
 0x331   :  { %v605_v17 = vsel %vm574_vm15, %v1915_v16, -inf  ;;  %1579 = vpow2.f32 %v639_v15 }
 0x332   :  { %606 = vmax.xlane.f32.xlu2 %v605_v17 }
 0x333   :  { %v1919_v18 = vpop.f32.mrf.mxu0  ;;  %v1923_v22 = vpop.f32.mrf.mxu1 }
 0x334   :  { %v580_v20 = vpop.xlane.xlu1 %579  ;;  %v611_v21 = vsel %vm574_vm15, %v1919_v18, -inf  ;;  %v596_v24 = vsel %vm574_vm15, %v1923_v22, -inf }
 0x335   :  { %612 = vmax.xlane.f32.xlu1 %v611_v21  ;;  %v624_v25 = vsub.f32 %v347_v0, %v580_v20 }
 0x337   :  { %v1925_v23 = vpop.eup %1579  ;;  %v641_v33 = vmul.f32 1.442695, %v624_v25 }
 0x338   :  { %v671_v30 = vsel %vm574_vm15, %v1925_v23, 0.0  ;;  %v1949_v49 = vpop.f32.mrf.mxu3 }
 0x339   :  { %v608_v51 = vsel %vm574_vm15, %v1949_v49, -inf }
 0x33a   :  { %597 = vmax.xlane.f32.xlu2 %v596_v24 }
 0x33b   :  { %v1929_v26 = vpop.f32.mrf.mxu0  ;;  %v586_v35 = vpop.xlane.xlu0 %585 }
 0x33c   :  { %v583_v27 = vpop.xlane.xlu1 %582  ;;  %v614_v31 = vsel %vm574_vm15, %v1929_v26, -inf  ;;  %v626_v37 = vsub.f32 %v379_v1, %v586_v35  ;;  %v1937_v38 = vpop.f32.mrf.mxu1 }
 0x33d   :  { %v625_v32 = vsub.f32 %v377_v63, %v583_v27  ;;  %672 = vadd.xlane.f32.xlu1 %v671_v30  ;;  %615 = vmax.xlane.f32.xlu0 %v614_v31  ;;  %v617_v57 = vsel %vm574_vm15, %v1937_v38, -inf }
 0x33e   :  { %v645_v41 = vmul.f32 1.442695, %v626_v37 }
 0x33f   :  { %v643_v34 = vmul.f32 1.442695, %v625_v32 }
 0x341   :  { %1581 = vpow2.f32 %v643_v34 }
 0x342   :  { %1583 = vpow2.f32 %v641_v33 }
 0x343   :  { %1585 = vpow2.f32 %v645_v41 }
 0x344   :  { %v1955_v52 = vpop.f32.mrf.mxu1 }
 0x345   :  { %603 = vmax.xlane.f32.xlu1 %v602_v39  ;;  %594 = vmax.xlane.f32.xlu0 %v593_v40  ;;  %v620_v53 = vsel %vm574_vm15, %v1955_v52, -inf }
 0x347   :  { %v1943_v29 = vpop.eup %1581 }
 0x348   :  { %v677_v45 = vsel %vm574_vm15, %v1943_v29, 0.0  ;;  %v1947_v47 = vpop.eup %1583 }
 0x349   :  { %678 = vadd.xlane.f32.xlu2 %v677_v45  ;;  %v674_v50 = vsel %vm574_vm15, %v1947_v47, 0.0  ;;  %v1959_v54 = vpop.eup %1585 }
 0x34a   :  { %v680_v55 = vsel %vm574_vm15, %v1959_v54, 0.0 }
 0x34d   :  { %675 = vadd.xlane.f32.xlu0 %v674_v50  ;;  %609 = vmax.xlane.f32.xlu1 %v608_v51 }
 0x351   :  { %621 = vmax.xlane.f32.xlu2 %v620_v53 }
 0x355   :  { %681 = vadd.xlane.f32.xlu1 %v680_v55  ;;  %618 = vmax.xlane.f32.xlu0 %v617_v57 }
 0x365   :  { %v589_v58 = vpop.xlane.xlu0 %588 }
 0x366   :  { %v627_v59 = vsub.f32 %v1901_v5, %v589_v58 }
 0x368   :  { %v647_v42 = vmul.f32 1.442695, %v627_v59 }
 0x369   :  { %847 = vrot.lane.b32.xlu0 %v1857_v48, %s1721_s16 }
 0x36a   :  { %1587 = vpow2.f32 %v647_v42 }
 0x370   :  { %v1968_v43 = vpop.eup %1587 }
 0x371   :  { %v683_v19 = vsel %vm574_vm15, %v1968_v43, 0.0 }
 0x372   :  { %684 = vadd.xlane.f32.xlu2 %v683_v19 }
 0x395   :  { %v601_v44 = vpop.xlane.xlu2 %600 }
 0x396   :  { %v631_v56 = vsub.f32 %v1905_v7, %v601_v44 }
 0x398   :  { %v655_v60 = vmul.f32 1.442695, %v631_v56 }
 0x39a   :  { %1589 = vpow2.f32 %v655_v60 }
 0x39d   :  { %v592_v61 = vpop.xlane.xlu2 %591 }
 0x39e   :  { %v628_v15 = vsub.f32 %v1909_v9, %v592_v61 }
 0x3a0   :  { %v1973_v63 = vpop.eup %1589  ;;  %v649_v20 = vmul.f32 1.442695, %v628_v15 }
 0x3a1   :  { %v695_v0 = vsel %vm574_vm15, %v1973_v63, 0.0 }
 0x3a2   :  { %696 = vadd.xlane.f32.xlu2 %v695_v0 }
 0x3a5   :  { %v607_v48 = vpop.xlane.xlu2 %606 }
 0x3a6   :  { %v633_v2 = vsub.f32 %v1915_v16, %v607_v48 }
 0x3a8   :  { %v659_v1 = vmul.f32 1.442695, %v633_v2  ;;  %v613_v3 = vpop.xlane.xlu1 %612 }
 0x3a9   :  { %v635_v4 = vsub.f32 %v1919_v18, %v613_v3 }
 0x3aa   :  { %1591 = vpow2.f32 %v659_v1 }
 0x3ab   :  { %v663_v5 = vmul.f32 1.442695, %v635_v4 }
 0x3ad   :  { %1593 = vpow2.f32 %v663_v5  ;;  %v598_v17 = vpop.xlane.xlu2 %597 }
 0x3ae   :  { %v630_v39 = vsub.f32 %v1923_v22, %v598_v17 }
 0x3b0   :  { %v1979_v6 = vpop.eup %1591  ;;  %v673_v7 = vpop.xlane.xlu1 %672  ;;  %v653_v53 = vmul.f32 1.442695, %v630_v39 }
 0x3b1   :  { %v616_v8 = vpop.xlane.xlu0 %615  ;;  %v701_v12 = vsel %vm574_vm15, %v1979_v6, 0.0 }
 0x3b2   :  { %v636_v10 = vsub.f32 %v1929_v26, %v616_v8  ;;  %702 = vadd.xlane.f32.xlu2 %v701_v12 }
 0x3b3   :  { %v1984_v13 = vpop.eup %1593 }
 0x3b4   :  { %v665_v16 = vmul.f32 1.442695, %v636_v10  ;;  %v707_v18 = vsel %vm574_vm15, %v1984_v13, 0.0 }
 0x3b5   :  { %708 = vadd.xlane.f32.xlu1 %v707_v18 }
 0x3b6   :  { %1595 = vpow2.f32 %v665_v16 }
 0x3b7   :  { %1597 = vrcp.f32 %v673_v7 }
 0x3b8   :  { %v604_v21 = vpop.xlane.xlu1 %603  ;;  %1599 = vpow2.f32 %v649_v20 }
 0x3b9   :  { %v595_v24 = vpop.xlane.xlu0 %594  ;;  %v632_v27 = vsub.f32 %v1935_v36, %v604_v21 }
 0x3ba   :  { %v629_v25 = vsub.f32 %v1913_v11, %v595_v24 }
 0x3bb   :  { %v657_v32 = vmul.f32 1.442695, %v632_v27 }
 0x3bc   :  { %v1990_v26 = vpop.eup %1595  ;;  %v651_v30 = vmul.f32 1.442695, %v629_v25  ;;  %v679_v9 = vpop.xlane.xlu2 %678 }
 0x3bd   :  { %v710_v31 = vsel %vm574_vm15, %v1990_v26, 0.0  ;;  %v1598_v33 = vpop.eup %1597 }
 0x3be   :  { %711 = vadd.xlane.f32.xlu1 %v710_v31  ;;  %1601 = vpow2.f32 %v651_v30  ;;  %v1995_v37 = vpop.eup %1599  ;;  %v735_v36 = vmul.f32 %v1598_v33, %v1925_v23 }
 0x3bf   :  { %v686_v45 = vsel %vm574_vm15, %v1995_v37, 0.0 }
 0x3c0   :  { %v610_v34 = vpop.xlane.xlu1 %609  ;;  %v751_v23 = vpack.c.bf16 %v735_v36, %v735_v36 }
 0x3c1   :  { %v676_v35 = vpop.xlane.xlu0 %675  ;;  %v634_v11 = vsub.f32 %v1949_v49, %v610_v34 }
 0x3c2   :  { %1603 = vrcp.f32 %v676_v35 }
 0x3c3   :  { %1605 = vpow2.f32 %v657_v32  ;;  %v661_v40 = vmul.f32 1.442695, %v634_v11 }
 0x3c4   :  { %v2000_v41 = vpop.eup %1601  ;;  %1607 = vrcp.f32 %v679_v9  ;;  %v622_v50 = vpop.xlane.xlu2 %621 }
 0x3c5   :  { %1609 = vpow2.f32 %v661_v40  ;;  %v689_v51 = vsel %vm574_vm15, %v2000_v41, 0.0  ;;  %v638_v49 = vsub.f32 %v1955_v52, %v622_v50  ;;  %v769_v52 = vunpack.c.l.b16 %v751_v23 }
 0x3c6   :  { %687 = vadd.xlane.f32.xlu1 %v686_v45  ;;  %690 = vadd.xlane.f32.xlu0 %v689_v51 }
 0x3c7   :  { %v669_v57 = vmul.f32 1.442695, %v638_v49 }
 0x3c8   :  { %v1604_v22 = vpop.eup %1603  ;;  %v682_v58 = vpop.xlane.xlu1 %681 }
 0x3c9   :  { %v736_v55 = vmul.f32 %v1604_v22, %v1947_v47  ;;  %v2008_v59 = vpop.eup %1605  ;;  %1611 = vrcp.f32 %v682_v58  ;;  %v619_v5 = vpop.xlane.xlu0 %618 }
 0x3ca   :  { %v1608_v42 = vpop.eup %1607  ;;  %897 = vrot.lane.b32.xlu2 %v1855_v46, %s1721_s16  ;;  %1613 = vpow2.f32 %v653_v53  ;;  %v698_v60 = vsel %vm574_vm15, %v2008_v59, 0.0 }
 0x3cb   :  { %v752_v19 = vpack.c.bf16 %v736_v55, %v736_v55  ;;  %v2012_v44 = vpop.eup %1609  ;;  %1615 = vpow2.f32 %v669_v57  ;;  %v737_v61 = vmul.f32 %v1608_v42, %v1943_v29 }
 0x3cc   :  { %v704_v47 = vsel %vm574_vm15, %v2012_v44, 0.0 }
 0x3cd   :  { %v770_v56 = vunpack.c.l.b16 %v752_v19  ;;  %v753_v2 = vpack.c.bf16 %v737_v61, %v737_v61 }
 0x3ce   :  { %699 = vadd.xlane.f32.xlu1 %v698_v60  ;;  %705 = vadd.xlane.f32.xlu0 %v704_v47 }
 0x3cf   :  { %v771_v0 = vpack.c.b16 %v770_v56, %v769_v52  ;;  %v1612_v48 = vpop.eup %1611  ;;  %v794_v7 = vunpack.c.l.b16 %v753_v2 }
 0x3d0   :  { %v2020_v46 = vpop.eup %1613  ;;  %v738_v1 = vmul.f32 %v1612_v48, %v1959_v54 }
 0x3d1   :  { %1385 = vmatmul.msk.bf16.vlgmr.msra.gmra.mxu2 %vm574_vm15, %v771_v0  ;;  %v2023_v3 = vpop.eup %1615  ;;  %v692_v29 = vsel %vm574_vm15, %v2020_v46, 0.0 }
 0x3d2   :  { %947 = vrot.lane.b32.xlu2 %v1878_v62, %s1721_s16  ;;  %v754_v4 = vpack.c.bf16 %v738_v1, %v738_v1  ;;  %v716_v10 = vsel %vm574_vm15, %v2023_v3, 0.0  ;;  %v637_v62 = vsub.f32 %v1937_v38, %v619_v5 }
 0x3d4   :  { %v795_v8 = vunpack.c.l.b16 %v754_v4  ;;  %v667_v15 = vmul.f32 1.442695, %v637_v62 }
 0x3d6   :  { %693 = vadd.xlane.f32.xlu1 %v692_v29  ;;  %717 = vadd.xlane.f32.xlu0 %v716_v10  ;;  %v796_v12 = vpack.c.b16 %v795_v8, %v794_v7  ;;  %1617 = vpow2.f32 %v667_v15 }
 0x3d8   :  { %1386 = vmatmul.msk.bf16.vlgmr.msra.gmra.mxu3 %vm574_vm15, %v796_v12 }
 0x3db   :  { %v848_v54 = vpop.permute.xlu0 %847 }
 0x3dc   :  { %860 = vmatpush.bf16.msra.mxu1 %v848_v54  ;;  %v2035_v16 = vpop.eup %1617 }
 0x3dd   :  { %v713_v18 = vsel %vm574_vm15, %v2035_v16, 0.0 }
 0x3e5   :  { %v685_v17 = vpop.xlane.xlu2 %684 }
 0x3e6   :  { %1619 = vrcp.f32 %v685_v17 }
 0x3ec   :  { %v1620_v38 = vpop.eup %1619 }
 0x3ed   :  { %v739_v31 = vmul.f32 %v1620_v38, %v1968_v43 }
 0x3ef   :  { %922 = vrot.lane.b32.xlu1 %v1850_v28, %s1721_s16  ;;  %v755_v33 = vpack.c.bf16 %v739_v31, %v739_v31 }
 0x3f1   :  { %v819_v45 = vunpack.c.l.b16 %v755_v33 }
 0x415   :  { %v697_v20 = vpop.xlane.xlu2 %696 }
 0x419   :  { %714 = vadd.xlane.f32.xlu1 %v713_v18 }
 0x425   :  { %v703_v21 = vpop.xlane.xlu2 %702 }
 0x428   :  { %v709_v24 = vpop.xlane.xlu1 %708 }
 0x42d   :  { %v898_v25 = vpop.permute.xlu2 %897 }
 0x42e   :  { %910 = vmatpush.bf16.msrb.mxu3 %v898_v25 }
 0x431   :  { %v712_v27 = vpop.xlane.xlu1 %711 }
 0x435   :  { %v948_v30 = vpop.permute.xlu2 %947 }
 0x436   :  { %960 = vmatpush.bf16.msrb.mxu1 %v948_v30 }
 0x439   :  { %v688_v28 = vpop.xlane.xlu1 %687  ;;  %v691_v9 = vpop.xlane.xlu0 %690 }
 0x43a   :  { %1621 = vrcp.f32 %v688_v28 }
 0x43b   :  { %1623 = vrcp.f32 %v697_v20 }
 0x43c   :  { %1625 = vrcp.f32 %v703_v21 }
 0x440   :  { %v1622_v32 = vpop.eup %1621 }
 0x441   :  { %v740_v34 = vmul.f32 %v1622_v32, %v1995_v37  ;;  %v700_v35 = vpop.xlane.xlu1 %699  ;;  %v1624_v11 = vpop.eup %1623 }
 0x442   :  { %1627 = vrcp.f32 %v700_v35  ;;  %v706_v39 = vpop.xlane.xlu0 %705  ;;  %v1626_v36 = vpop.eup %1625  ;;  %v743_v50 = vmul.f32 %v1624_v11, %v1973_v63 }
 0x443   :  { %v756_v40 = vpack.c.bf16 %v740_v34, %v740_v34  ;;  %1629 = vrcp.f32 %v706_v39  ;;  %v745_v49 = vmul.f32 %v1626_v36, %v1979_v6 }
 0x444   :  { %1631 = vrcp.f32 %v691_v9  ;;  %v759_v23 = vpack.c.bf16 %v743_v50, %v743_v50 }
 0x445   :  { %v820_v51 = vunpack.c.l.b16 %v756_v40  ;;  %v761_v58 = vpack.c.bf16 %v745_v49, %v745_v49 }
 0x446   :  { %v869_v63 = vunpack.c.l.b16 %v759_v23 }
 0x447   :  { %v821_v43 = vpack.c.b16 %v820_v51, %v819_v45  ;;  %v894_v60 = vunpack.c.l.b16 %v761_v58 }
 0x448   :  { %v1628_v22 = vpop.eup %1627 }
 0x449   :  { %v1630_v53 = vpop.eup %1629  ;;  %v744_v37 = vmul.f32 %v1628_v22, %v2008_v59  ;;  %v694_v55 = vpop.xlane.xlu1 %693  ;;  %1387 = vmatmul.msk.bf16.vlgmr.msrb.gmra.mxu0 %vm574_vm15, %v821_v43 }
 0x44a   :  { %v1632_v57 = vpop.eup %1631  ;;  %v746_v42 = vmul.f32 %v1630_v53, %v2012_v44  ;;  %1633 = vrcp.f32 %v694_v55  ;;  %v718_v17 = vpop.xlane.xlu0 %717  ;;  %v1448_v55 = vld [vmem:[%s2180_s3 + $0x8] sm:$0xff] }
 0x44b   :  { %v760_v19 = vpack.c.bf16 %v744_v37, %v744_v37  ;;  %v741_v56 = vmul.f32 %v1632_v57, %v2000_v41  ;;  %1635 = vrcp.f32 %v712_v27  ;;  %1059 = vmatpush.bf16.msra.mxu2 %v1448_v55  ;;  %v1447_v57 = vld [vmem:[%s2180_s3] sm:$0xff] }
 0x44c   :  { %v762_v52 = vpack.c.bf16 %v746_v42, %v746_v42  ;;  %1637 = vrcp.f32 %v709_v24 }
 0x44d   :  { %v870_v6 = vunpack.c.l.b16 %v760_v19  ;;  %v757_v48 = vpack.c.bf16 %v741_v56, %v741_v56  ;;  %1639 = vrcp.f32 %v718_v17 }
 0x44e   :  { %v895_v47 = vunpack.c.l.b16 %v762_v52 }
 0x44f   :  { %v871_v61 = vpack.c.b16 %v870_v6, %v869_v63  ;;  %v844_v4 = vunpack.c.l.b16 %v757_v48  ;;  %1060 = vmatpush.bf16.msra.mxu2 %v1447_v57 }
 0x450   :  { %v1634_v0 = vpop.eup %1633  ;;  %v896_v59 = vpack.c.b16 %v895_v47, %v894_v60 }
 0x451   :  { %v742_v2 = vmul.f32 %v1634_v0, %v2020_v46  ;;  %1389 = vmatmul.msk.bf16.vlgmr.msrb.gmra.mxu2 %vm574_vm15, %v871_v61  ;;  %v1636_v1 = vpop.eup %1635 }
 0x452   :  { %1390 = vmatmul.msk.bf16.vlgmr.msrb.gmra.mxu3 %vm574_vm15, %v896_v59  ;;  %v1638_v41 = vpop.eup %1637  ;;  %v748_v29 = vmul.f32 %v1636_v1, %v1990_v26 }
 0x453   :  { %v758_v44 = vpack.c.bf16 %v742_v2, %v742_v2  ;;  %v747_v8 = vmul.f32 %v1638_v41, %v1984_v13  ;;  %v1640_v20 = vpop.eup %1639 }
 0x454   :  { %v764_v10 = vpack.c.bf16 %v748_v29, %v748_v29  ;;  %v750_v26 = vmul.f32 %v1640_v20, %v2023_v3  ;;  %v787_v38 = vpop.f32.mrf.mxu2 }
 0x455   :  { %v845_v5 = vunpack.c.l.b16 %v758_v44  ;;  %v763_v12 = vpack.c.bf16 %v747_v8, %v747_v8 }
 0x456   :  { %v920_v54 = vunpack.c.l.b16 %v764_v10  ;;  %v766_v13 = vpack.c.bf16 %v750_v26, %v750_v26 }
 0x457   :  { %v846_v7 = vpack.c.b16 %v845_v5, %v844_v4  ;;  %v919_v46 = vunpack.c.l.b16 %v763_v12 }
 0x458   :  { %v945_v27 = vunpack.c.l.b16 %v766_v13 }
 0x459   :  { %1388 = vmatmul.msk.bf16.vlgmr.msra.gmra.mxu1 %vm574_vm15, %v846_v7  ;;  %v921_v15 = vpack.c.b16 %v920_v54, %v919_v46 }
 0x45b   :  { %v812_v32 = vpop.f32.mrf.mxu3 }
 0x45c   :  { %v789_v31 = vpop.f32.mrf.mxu2 }
 0x461   :  { %v923_v62 = vpop.permute.xlu1 %922 }
 0x462   :  { %935 = vmatpush.bf16.msra.mxu0 %v923_v62 }
 0x463   :  { %v814_v35 = vpop.f32.mrf.mxu3 }
 0x465   :  { %1391 = vmatmul.msk.bf16.vlgmr.msra.gmra.mxu0 %vm574_vm15, %v921_v15 }
 0x48c   :  { %v715_v18 = vpop.xlane.xlu1 %714 }
 0x48d   :  { %1641 = vrcp.f32 %v715_v18 }
 0x493   :  { %v1642_v21 = vpop.eup %1641 }
 0x494   :  { %v749_v24 = vmul.f32 %v1642_v21, %v2035_v16  ;;  %v1564_v21 = vld [vmem:[#allocation2 + $0x4] ss:$0 sm:$0xff] }
 0x496   :  { %v765_v25 = vpack.c.bf16 %v749_v24, %v749_v24 }
 0x498   :  { %v944_v30 = vunpack.c.l.b16 %v765_v25  ;;  %v1659_v25 = vld [vmem:[%s2177_s0] sm:$0xff] }
 0x49a   :  { %v946_v28 = vpack.c.b16 %v945_v27, %v944_v30 }
 0x49c   :  { %1392 = vmatmul.msk.bf16.vlgmr.msrb.gmra.mxu1 %vm574_vm15, %v946_v28 }
 0x4c6   :  { %v837_v9 = vpop.f32.mrf.mxu0 }
 0x4ce   :  { %v839_v33 = vpop.f32.mrf.mxu0 }
 0x4cf   :  { %v1531_v34 = vpack.i.bf16 %v839_v33, %v837_v9  ;;  %v1660_v9 = vld [vmem:[%s2177_s0 + $0x8] sm:$0xff] }
 0x4d1   :  { %1532 = vrot.lane.b32.xlu1 %v1531_v34, %s1722_s17 }
 0x4d4   :  { %v887_v3 = vpop.f32.mrf.mxu2 }
 0x4d5   :  { %v912_v36 = vpop.f32.mrf.mxu3 }
 0x4d6   :  { %v862_v11 = vpop.f32.mrf.mxu1 }
 0x4dc   :  { %v889_v39 = vpop.f32.mrf.mxu2 }
 0x4dd   :  { %v1536_v16 = vpack.i.bf16 %v889_v39, %v887_v3  ;;  %v914_v51 = vpop.f32.mrf.mxu3  ;;  %v1661_v3 = vld [vmem:[%s2177_s0 + $0x10] sm:$0xff] }
 0x4de   :  { %v864_v40 = vpop.f32.mrf.mxu1  ;;  %v1551_v22 = vpack.i.bf16 %v914_v51, %v912_v36  ;;  %v1662_v36 = vld [vmem:[%s2177_s0 + $0x18] sm:$0xff] }
 0x4df   :  { %1537 = vrot.lane.b32.xlu2 %v1536_v16, %s1723_s18  ;;  %v1546_v50 = vpack.i.bf16 %v864_v40, %v862_v11 }
 0x4e2   :  { %v937_v45 = vpop.f32.mrf.mxu0 }
 0x4e7   :  { %1547 = vrot.lane.b32.xlu2 %v1546_v50, %s1722_s17 }
 0x4ea   :  { %v939_v49 = vpop.f32.mrf.mxu0 }
 0x4eb   :  { %v1541_v43 = vpack.i.bf16 %v939_v49, %v937_v45 }
 0x4ed   :  { %1542 = vrot.lane.b32.xlu0 %v1541_v43, %s1724_s19 }
 0x4ef   :  { %1552 = vrot.lane.b32.xlu2 %v1551_v22, %s1723_s18 }
 0x519   :  { %v962_v53 = vpop.f32.mrf.mxu1 }
 0x521   :  { %v964_v23 = vpop.f32.mrf.mxu1 }
 0x522   :  { %v1556_v37 = vpack.i.bf16 %v964_v23, %v962_v53 }
 0x524   :  { %1557 = vrot.lane.b32.xlu1 %v1556_v37, %s1724_s19 }
 0x539   :  { %v1538_v52 = vpop.permute.xlu2 %1537 }
 0x53a   :  { %v1540_v6 = vunpack.i.h.bf16 %v1538_v52  ;;  %v1539_v60 = vunpack.i.l.bf16 %v1538_v52 }
 0x541   :  { %v1548_v4 = vpop.permute.xlu2 %1547 }
 0x542   :  { %v1550_v41 = vunpack.i.h.bf16 %v1548_v4  ;;  %v1549_v29 = vunpack.i.l.bf16 %v1548_v4 }
 0x543   :  { %v1533_v58 = vpop.permute.xlu1 %1532 }
 0x544   :  { %v1535_v42 = vunpack.i.h.bf16 %v1533_v58  ;;  %v1534_v19 = vunpack.i.l.bf16 %v1533_v58  ;;  %v1018_v12 = vsel %vm329_vm14, %v814_v35, %v1550_v41  ;;  %v1017_v54 = vsel %vm329_vm14, %v812_v32, %v1549_v29 }
 0x546   :  { %v1016_v63 = vsel %vm329_vm14, %v789_v31, %v1535_v42  ;;  %v1015_v56 = vsel %vm329_vm14, %v787_v38, %v1534_v19 }
 0x547   :  { %v1019_v59 = vsel %vm574_vm15, %v1015_v56, %v1539_v60  ;;  %v1020_v48 = vsel %vm574_vm15, %v1016_v63, %v1540_v6 }
 0x549   :  { %v1553_v5 = vpop.permute.xlu2 %1552 }
 0x54a   :  { %v1555_v7 = vunpack.i.h.bf16 %v1553_v5  ;;  %v1554_v8 = vunpack.i.l.bf16 %v1553_v5 }
 0x54c   :  { %v1021_v15 = vsel %vm574_vm15, %v1017_v54, %v1554_v8  ;;  %v1022_v17 = vsel %vm574_vm15, %v1018_v12, %v1555_v7 }
 0x55f   :  { %v1543_v47 = vpop.permute.xlu0 %1542 }
 0x560   :  { %v1545_v61 = vunpack.i.h.bf16 %v1543_v47  ;;  %v1544_v0 = vunpack.i.l.bf16 %v1543_v47 }
 0x562   :  { %v1024_v2 = vsel %vm1023_vm1, %v1019_v59, %v1544_v0  ;;  %v1025_v44 = vsel %vm1023_vm1, %v1020_v48, %v1545_v61  ;;  %v1450_v0 = vld [vmem:[%s2181_s4 + $0x8] sm:$0xff] }
 0x563   :  { %v1028_v1 = vpack.c.bf16 %v1025_v44, %v1024_v2  ;;  %1205 = vmatpush.bf16.msra.mxu3 %v1450_v0  ;;  %v1449_v44 = vld [vmem:[%s2181_s4] sm:$0xff]  ;;  %v1458_v0 = vld [vmem:[%s2182_s5 + $0x38] sm:$0xff] }
 0x564   :  { %1321 = vmatpush.bf16.msrb.mxu0 %v1458_v0 }
 0x565   :  { %1401 = vmatmul.msk.bf16.vlgmr.msra.gmra.mxu2 %vm51_vm0, %v1028_v1 }
 0x567   :  { %1206 = vmatpush.bf16.msra.mxu3 %v1449_v44  ;;  %v1452_v44 = vld [vmem:[%s2182_s5 + $0x8] sm:$0xff] }
 0x596   :  { %v1558_v10 = vpop.permute.xlu1 %1557 }
 0x597   :  { %v1560_v46 = vunpack.i.h.bf16 %v1558_v10  ;;  %v1559_v62 = vunpack.i.l.bf16 %v1558_v10 }
 0x599   :  { %v1026_v18 = vsel %vm1023_vm1, %v1021_v15, %v1559_v62  ;;  %v1027_v20 = vsel %vm1023_vm1, %v1022_v17, %v1560_v46 }
 0x59a   :  { %v1029_v26 = vpack.c.bf16 %v1027_v20, %v1026_v18  ;;  %v1565_v20 = vld [vmem:[#allocation2 + $0x2] ss:$0 sm:$0xff] }
 0x59c   :  { %1402 = vmatmul.msk.bf16.gmra.mxu2 %vm51_vm0, %v1029_v26 }
 0x5e8   :  { %v1062_v13 = vpop.f32.mrf.mxu2 }
 0x5e9   :  { %v1063_v24 = vadd.f32 %v1564_v21, %v1062_v13 }
 0x5eb   :  { %v2082_v27 = vadd.f32 %v1659_v25, %v1063_v24  ;;  %v1566_v24 = vld [vmem:[#allocation2 + $0x3] ss:$0 sm:$0xff] }
 0x5ed   :  { %v1076_v30 = vsel %vm51_vm0, %v2082_v27, 0.0 }
 0x5ee   :  { %1077 = vadd.xlane.f32.xlu2 %v1076_v30 }
 0x5f0   :  { %v1064_v28 = vpop.f32.mrf.mxu2 }
 0x5f1   :  { %v1065_v38 = vadd.f32 %v1564_v21, %v1064_v28 }
 0x5f3   :  { %v2089_v31 = vadd.f32 %v1660_v9, %v1065_v38 }
 0x5f5   :  { %v1079_v32 = vsel %vm51_vm0, %v2089_v31, 0.0 }
 0x5f6   :  { %1080 = vadd.xlane.f32.xlu0 %v1079_v32 }
 0x61f   :  { %v1067_v33 = vpop.f32.mrf.mxu2 }
 0x620   :  { %v1068_v34 = vadd.f32 %v1564_v21, %v1067_v33 }
 0x622   :  { %v2096_v35 = vadd.f32 %v1661_v3, %v1068_v34 }
 0x624   :  { %v1082_v11 = vsel %vm51_vm0, %v2096_v35, 0.0 }
 0x625   :  { %1083 = vadd.xlane.f32.xlu1 %v1082_v11 }
 0x627   :  { %v1069_v39 = vpop.f32.mrf.mxu2 }
 0x628   :  { %v1070_v16 = vadd.f32 %v1564_v21, %v1069_v39 }
 0x62a   :  { %v2103_v40 = vadd.f32 %v1662_v36, %v1070_v16 }
 0x62c   :  { %v1085_v45 = vsel %vm51_vm0, %v2103_v40, 0.0 }
 0x62d   :  { %1086 = vadd.xlane.f32.xlu2 %v1085_v45 }
 0x661   :  { %v1078_v50 = vpop.xlane.xlu2 %1077 }
 0x662   :  { %v1088_v51 = vmul.f32 %v1078_v50, %v1781_v14 }
 0x664   :  { %v1092_v49 = vsub.f32 %v2082_v27, %v1088_v51 }
 0x666   :  { %v1096_v43 = vmul.f32 %v1092_v49, %v1092_v49 }
 0x668   :  { %v1100_v22 = vsel %vm51_vm0, %v1096_v43, 0.0 }
 0x669   :  { %v1081_v53 = vpop.xlane.xlu0 %1080  ;;  %1101 = vadd.xlane.f32.xlu0 %v1100_v22 }
 0x66a   :  { %v1089_v23 = vmul.f32 %v1081_v53, %v1781_v14 }
 0x66c   :  { %v1093_v37 = vsub.f32 %v2089_v31, %v1089_v23 }
 0x66e   :  { %v1097_v55 = vmul.f32 %v1093_v37, %v1093_v37 }
 0x670   :  { %v1103_v57 = vsel %vm51_vm0, %v1097_v55, 0.0 }
 0x671   :  { %1104 = vadd.xlane.f32.xlu1 %v1103_v57 }
 0x698   :  { %v1084_v58 = vpop.xlane.xlu1 %1083 }
 0x699   :  { %v1090_v42 = vmul.f32 %v1084_v58, %v1781_v14 }
 0x69b   :  { %v2115_v19 = vsub.f32 %v2096_v35, %v1090_v42 }
 0x69d   :  { %v1098_v52 = vmul.f32 %v2115_v19, %v2115_v19 }
 0x69f   :  { %v1106_v63 = vsel %vm51_vm0, %v1098_v52, 0.0 }
 0x6a0   :  { %1107 = vadd.xlane.f32.xlu2 %v1106_v63  ;;  %v1087_v56 = vpop.xlane.xlu2 %1086 }
 0x6a1   :  { %v1091_v6 = vmul.f32 %v1087_v56, %v1781_v14 }
 0x6a3   :  { %v2122_v60 = vsub.f32 %v2103_v40, %v1091_v6 }
 0x6a5   :  { %v1099_v47 = vmul.f32 %v2122_v60, %v2122_v60 }
 0x6a7   :  { %v1109_v61 = vsel %vm51_vm0, %v1099_v47, 0.0 }
 0x6a8   :  { %1110 = vadd.xlane.f32.xlu0 %v1109_v61 }
 0x6dc   :  { %v1102_v59 = vpop.xlane.xlu0 %1101 }
 0x6dd   :  { %v1112_v48 = vmul.f32 %v1102_v59, %v1781_v14  ;;  %v1455_v59 = vld [vmem:[%s2182_s5 + $0x20] sm:$0xff] }
 0x6df   :  { %v1116_v2 = vadd.f32 1e-05, %v1112_v48  ;;  %v1454_v48 = vld [vmem:[%s2182_s5 + $0x18] sm:$0xff] }
 0x6e1   :  { %1643 = vrsqrt.f32 %v1116_v2  ;;  %vm1126_vm3 = vweird.f32 %v1116_v2 }
 0x6e4   :  { %v1105_v1 = vpop.xlane.xlu1 %1104 }
 0x6e5   :  { %v1113_v4 = vmul.f32 %v1105_v1, %v1781_v14  ;;  %v1451_v1 = vld [vmem:[%s2182_s5] sm:$0xff] }
 0x6e7   :  { %v1644_v5 = vpop.eup %1643  ;;  %v1117_v41 = vadd.f32 1e-05, %v1113_v4  ;;  %v1567_v4 = vld [vmem:[#allocation2 + $0x7] ss:$0 sm:$0xff] }
 0x6e8   :  { %v1121_v29 = vmul.f32 %v1644_v5, %v1116_v2  ;;  %vm1127_vm2 = vweird.f32 %v1644_v5  ;;  %v1453_v2 = vld [vmem:[%s2182_s5 + $0x10] sm:$0xff] }
 0x6e9   :  { %1645 = vrsqrt.f32 %v1117_v41  ;;  %vm1128_vm4 = vmor %vm1126_vm3, %vm1127_vm2  ;;  %vm1136_vm6 = vweird.f32 %v1117_v41 }
 0x6ea   :  { %v1122_v7 = vmul.f32 %v1644_v5, %v1121_v29 }
 0x6ec   :  { %v1123_v8 = vmul.f32 0.5, %v1122_v7 }
 0x6ee   :  { %v1124_v10 = vsub.f32 1.5, %v1123_v8 }
 0x6ef   :  { %v1646_v12 = vpop.eup %1645 }
 0x6f0   :  { %v1125_v54 = vmul.f32 %v1644_v5, %v1124_v10  ;;  %v1131_v46 = vmul.f32 %v1646_v12, %v1117_v41  ;;  %vm1137_vm5 = vweird.f32 %v1646_v12 }
 0x6f1   :  { %vm1138_vm7 = vmor %vm1136_vm6, %vm1137_vm5 }
 0x6f2   :  { %v1132_v62 = vmul.f32 %v1646_v12, %v1131_v46  ;;  %v1129_v15 = vsel %vm1128_vm4, %v1644_v5, %v1125_v54 }
 0x6f3   :  { %v1160_v26 = vmul.f32 %v1129_v15, %v1092_v49 }
 0x6f4   :  { %v1133_v17 = vmul.f32 0.5, %v1132_v62 }
 0x6f5   :  { %v1165_v25 = vmul.f32 %v1565_v20, %v1160_v26 }
 0x6f6   :  { %v1134_v18 = vsub.f32 1.5, %v1133_v17 }
 0x6f7   :  { %v1170_v38 = vadd.f32 %v1566_v24, %v1165_v25 }
 0x6f8   :  { %v1135_v21 = vmul.f32 %v1646_v12, %v1134_v18 }
 0x6fa   :  { %v1139_v13 = vsel %vm1138_vm7, %v1646_v12, %v1135_v21 }
 0x6fb   :  { %v1161_v30 = vmul.f32 %v1139_v13, %v1093_v37 }
 0x6fd   :  { %v1166_v28 = vmul.f32 %v1565_v20, %v1161_v30 }
 0x6ff   :  { %v1171_v9 = vadd.f32 %v1566_v24, %v1166_v28 }
 0x701   :  { %v1174_v32 = vpack.c.bf16 %v1171_v9, %v1170_v38 }
 0x703   :  { %1411 = vmatmul.msk.bf16.vlgmr.msra.gmra.mxu3 %vm51_vm0, %v1174_v32 }
 0x713   :  { %v1108_v33 = vpop.xlane.xlu2 %1107 }
 0x714   :  { %v1114_v34 = vmul.f32 %v1108_v33, %v1781_v14 }
 0x716   :  { %v1118_v3 = vadd.f32 1e-05, %v1114_v34 }
 0x718   :  { %1647 = vrsqrt.f32 %v1118_v3  ;;  %vm1146_vm9 = vweird.f32 %v1118_v3 }
 0x71b   :  { %v1111_v11 = vpop.xlane.xlu0 %1110 }
 0x71c   :  { %v1115_v39 = vmul.f32 %v1111_v11, %v1781_v14 }
 0x71e   :  { %v1648_v16 = vpop.eup %1647  ;;  %v1119_v36 = vadd.f32 1e-05, %v1115_v39 }
 0x71f   :  { %v1141_v45 = vmul.f32 %v1648_v16, %v1118_v3  ;;  %vm1147_vm8 = vweird.f32 %v1648_v16 }
 0x720   :  { %1649 = vrsqrt.f32 %v1119_v36  ;;  %vm1148_vm10 = vmor %vm1146_vm9, %vm1147_vm8  ;;  %vm1156_vm12 = vweird.f32 %v1119_v36 }
 0x721   :  { %v1142_v50 = vmul.f32 %v1648_v16, %v1141_v45 }
 0x723   :  { %v1143_v51 = vmul.f32 0.5, %v1142_v50 }
 0x725   :  { %v1144_v49 = vsub.f32 1.5, %v1143_v51 }
 0x726   :  { %v1650_v43 = vpop.eup %1649 }
 0x727   :  { %v1145_v22 = vmul.f32 %v1648_v16, %v1144_v49  ;;  %v1151_v53 = vmul.f32 %v1650_v43, %v1119_v36  ;;  %vm1157_vm11 = vweird.f32 %v1650_v43 }
 0x728   :  { %vm1158_vm13 = vmor %vm1156_vm12, %vm1157_vm11 }
 0x729   :  { %v1152_v23 = vmul.f32 %v1650_v43, %v1151_v53  ;;  %v1149_v37 = vsel %vm1148_vm10, %v1648_v16, %v1145_v22 }
 0x72a   :  { %v1162_v14 = vmul.f32 %v1149_v37, %v2115_v19  ;;  %v1457_v19 = vld [vmem:[%s2182_s5 + $0x30] sm:$0xff] }
 0x72b   :  { %v1153_v55 = vmul.f32 0.5, %v1152_v23  ;;  %1322 = vmatpush.bf16.msrb.mxu0 %v1457_v19 }
 0x72c   :  { %v1167_v63 = vmul.f32 %v1565_v20, %v1162_v14 }
 0x72d   :  { %v1154_v57 = vsub.f32 1.5, %v1153_v55 }
 0x72e   :  { %v1172_v6 = vadd.f32 %v1566_v24, %v1167_v63  ;;  %v1568_v63 = vld [vmem:[#allocation2 + $0x5] ss:$0 sm:$0xff] }
 0x72f   :  { %v1155_v58 = vmul.f32 %v1650_v43, %v1154_v57 }
 0x731   :  { %v1159_v42 = vsel %vm1158_vm13, %v1650_v43, %v1155_v58 }
 0x732   :  { %v1163_v52 = vmul.f32 %v1159_v42, %v2122_v60  ;;  %v1456_v60 = vld [vmem:[%s2182_s5 + $0x28] sm:$0xff]  ;;  %s1725_s5 = smov [#allocation5]  }
 0x733   :  { %1323 = vmatpush.bf16.msrb.mxu0 %v1456_v60  ;;  %s1352_s3 = sshll.u32 %s1725_s5, 4  ;;  %s1353_s3 = int_to_ptr.vmem [resolvable:$true] %s1352_s3 }
 0x734   :  { %v1168_v56 = vmul.f32 %v1565_v20, %v1163_v52 }
 0x736   :  { %v1173_v47 = vadd.f32 %v1566_v24, %v1168_v56 }
 0x737   :  { %1324 = vmatpush.bf16.msrb.mxu0 %v1455_v59 }
 0x738   :  { %v1175_v61 = vpack.c.bf16 %v1173_v47, %v1172_v6 }
 0x73a   :  { %1412 = vmatmul.msk.bf16.gmra.mxu3 %vm51_vm0, %v1175_v61 }
 0x73b   :  { %1325 = vmatpush.bf16.msrb.mxu0 %v1454_v48 }
 0x73f   :  { %1326 = vmatpush.bf16.msrb.mxu0 %v1453_v2 }
 0x743   :  { %1327 = vmatpush.bf16.msrb.mxu0 %v1452_v44 }
 0x747   :  { %1328 = vmatpush.bf16.msrb.mxu0 %v1451_v1 }
 0x786   :  { %v1208_v5 = vpop.f32.mrf.mxu3 }
 0x787   :  { %v1209_v41 = vadd.f32 %v1567_v4, %v1208_v5 }
 0x789   :  { %v1222_v29 = vmul.f32 0.044715, %v1209_v41  ;;  %v1218_v24 = vmul.f32 0.5, %v1209_v41 }
 0x78b   :  { %v1226_v7 = vmul.f32 %v1222_v29, %v1209_v41 }
 0x78d   :  { %v1230_v8 = vmul.f32 %v1226_v7, %v1209_v41 }
 0x78e   :  { %v1210_v10 = vpop.f32.mrf.mxu3 }
 0x78f   :  { %v1234_v12 = vadd.f32 %v1230_v8, %v1209_v41  ;;  %v1211_v54 = vadd.f32 %v1567_v4, %v1210_v10 }
 0x791   :  { %v1223_v46 = vmul.f32 0.044715, %v1211_v54  ;;  %v1238_v62 = vmul.f32 0.7978846, %v1234_v12  ;;  %v1219_v25 = vmul.f32 0.5, %v1211_v54 }
 0x793   :  { %v1227_v15 = vmul.f32 %v1223_v46, %v1211_v54  ;;  %1651 = vtanh.f32 %v1238_v62 }
 0x795   :  { %v1231_v17 = vmul.f32 %v1227_v15, %v1211_v54 }
 0x797   :  { %v1235_v18 = vadd.f32 %v1231_v17, %v1211_v54 }
 0x799   :  { %v1239_v20 = vmul.f32 0.7978846, %v1235_v18  ;;  %v1652_v26 = vpop.eup %1651 }
 0x79a   :  { %v1246_v21 = vadd.f32 1.0, %v1652_v26 }
 0x79b   :  { %1653 = vtanh.f32 %v1239_v20 }
 0x79c   :  { %v1250_v28 = vmul.f32 %v1246_v21, %v1218_v24 }
 0x7a1   :  { %v1654_v13 = vpop.eup %1653 }
 0x7a2   :  { %v1247_v30 = vadd.f32 1.0, %v1654_v13 }
 0x7a4   :  { %v1251_v38 = vmul.f32 %v1247_v30, %v1219_v25 }
 0x7a6   :  { %v1254_v9 = vpack.c.bf16 %v1251_v38, %v1250_v28 }
 0x7a8   :  { %1329 = vmatmul.bf16.vlgmr.msrb.gmra.mxu0 %v1254_v9 }
 0x7bd   :  { %v1213_v32 = vpop.f32.mrf.mxu3 }
 0x7be   :  { %v1214_v33 = vadd.f32 %v1567_v4, %v1213_v32 }
 0x7c0   :  { %v1224_v34 = vmul.f32 0.044715, %v1214_v33  ;;  %v1220_v55 = vmul.f32 0.5, %v1214_v33 }
 0x7c2   :  { %v1228_v3 = vmul.f32 %v1224_v34, %v1214_v33 }
 0x7c4   :  { %v1232_v11 = vmul.f32 %v1228_v3, %v1214_v33 }
 0x7c5   :  { %v1215_v39 = vpop.f32.mrf.mxu3 }
 0x7c6   :  { %v1216_v16 = vadd.f32 %v1567_v4, %v1215_v39  ;;  %v1236_v36 = vadd.f32 %v1232_v11, %v1214_v33 }
 0x7c8   :  { %v1225_v45 = vmul.f32 0.044715, %v1216_v16  ;;  %v1240_v51 = vmul.f32 0.7978846, %v1236_v36  ;;  %v1221_v57 = vmul.f32 0.5, %v1216_v16 }
 0x7ca   :  { %v1229_v50 = vmul.f32 %v1225_v45, %v1216_v16  ;;  %1655 = vtanh.f32 %v1240_v51 }
 0x7cc   :  { %v1233_v49 = vmul.f32 %v1229_v50, %v1216_v16 }
 0x7ce   :  { %v1237_v43 = vadd.f32 %v1233_v49, %v1216_v16 }
 0x7d0   :  { %v1241_v22 = vmul.f32 0.7978846, %v1237_v43  ;;  %v1656_v53 = vpop.eup %1655 }
 0x7d1   :  { %v1248_v23 = vadd.f32 1.0, %v1656_v53 }
 0x7d2   :  { %1657 = vtanh.f32 %v1241_v22 }
 0x7d3   :  { %v1252_v58 = vmul.f32 %v1248_v23, %v1220_v55 }
 0x7d8   :  { %v1658_v37 = vpop.eup %1657 }
 0x7d9   :  { %v1249_v14 = vadd.f32 1.0, %v1658_v37 }
 0x7db   :  { %v1253_v42 = vmul.f32 %v1249_v14, %v1221_v57 }
 0x7dd   :  { %v1255_v52 = vpack.c.bf16 %v1253_v42, %v1252_v58 }
 0x7df   :  { %1334 = vmatmul.bf16.gmra.mxu0 %v1255_v52 }
 0x825   :  { %v1330_v56 = vpop.f32.mrf.mxu0 }
 0x826   :  { %v1331_v6 = vadd.f32 %v1568_v63, %v1330_v56 }
 0x828   :  { %v1340_v47 = vadd.f32 %v1331_v6, %v2082_v27 }
 0x82a   :  { %1344 = vst.msk [vmem:[#allocation5] sm:$0xff] %vm51_vm0, %v1340_v47 }
 0x82d   :  { %v1332_v61 = vpop.f32.mrf.mxu0 }
 0x82e   :  { %v1333_v0 = vadd.f32 %v1568_v63, %v1332_v61 }
 0x830   :  { %v1341_v19 = vadd.f32 %v1333_v0, %v2089_v31 }
 0x832   :  { %1345 = vst.msk [vmem:[#allocation5 + $0x8] sm:$0xff] %vm51_vm0, %v1341_v19 }
 0x85c   :  { %v1335_v60 = vpop.f32.mrf.mxu0 }
 0x85d   :  { %v1336_v59 = vadd.f32 %v1568_v63, %v1335_v60 }
 0x85f   :  { %v1342_v48 = vadd.f32 %v1336_v59, %v2096_v35 }
 0x861   :  { %1346 = vst.msk [vmem:[#allocation5 + $0x10] sm:$0xff] %vm51_vm0, %v1342_v48 }
 0x864   :  { %v1337_v2 = vpop.f32.mrf.mxu0 }
 0x865   :  { %v1338_v27 = vadd.f32 %v1568_v63, %v1337_v2 }
 0x867   :  { %v1343_v44 = vadd.f32 %v1338_v27, %v2103_v40 }
 0x869   :  { %1347 = vst.msk [vmem:[#allocation5 + $0x18] sm:$0xff] %vm51_vm0, %v1343_v44 }
 0x86a   :  { %1360 = dma.vmem_to_hbm [thread:$0]  %s1353_s3, 512, %s1355_s26, [#allocation4], %s1726_s27, %s1726_s27, %s1722_s17  }
 0x86b   :  { %1713 = dma.done.wait [#allocation4], 512  }
 0x86c   :  { %1714 = vsyncadd [#allocation4], 4294966784 }
 0x86d   :  { %1365 = vsyncpa [#allocation3], 1 }
 0x86e   :  { %1366 = vsyncpa [#allocation4], 1 }

</bundles_post_ra>
